<compile_context>
chip_gen: v7x
topology: tpu7x:2x2x1
jax: 0.10.0
libtpu: 0.0.40
codegen_flags: <defaults>
</compile_context>

<pallas_src>
import functools

import jax
import jax.numpy as jnp
from jax.experimental import pallas as pl
from jax.experimental.pallas import tpu as pltpu


# ------------------------------ Pallas kernel -------------------------------

def _bottleneck_kernel(x_ref, ml_ref, mr_ref, mt_ref, mb_ref,
                       w1_ref, s1_ref, b1_ref,
                       w2_ref, s2_ref, b2_ref,
                       w3_ref, s3_ref, b3_ref,
                       o_ref, pad_ref, *, W, OFF, compute_dtype):
    """One grid step = TILE_M rows (a group of whole images), fully fused.

    x_ref  : (TILE_M, Cin)        f32   input rows (also the residual)
    m*_ref : (TILE_M, 1)          f32   precomputed boundary masks (l/r/top/bot)
    w1_ref : (Cin, P)             bf16  1x1 conv1 weight
    w2_ref : (9*P, P)             bf16  3x3 conv2 weight, rows = (ky, kx, cin)
    w3_ref : (P, 4*P)             bf16  1x1 conv3 weight
    s*/b*  : (1, C)               f32   folded BatchNorm scale / bias
    o_ref  : (TILE_M, 4*P)        bf16  output rows
    pad_ref: (TILE_M + 2*OFF, 3P) f32   staging: [dx=-1 | dx=0 | dx=+1] slots
    """
    TILE_M = x_ref.shape[0]
    P = w1_ref.shape[1]

    # ---- conv1 (1x1) + bn1 + relu  (bf16 MXU inputs, f32 accumulate) --------
    xb = x_ref[...].astype(compute_dtype)                  # in-kernel f32->bf16
    a1 = jnp.dot(xb, w1_ref[...], preferred_element_type=jnp.float32)
    o1 = jnp.maximum(a1 * s1_ref[...] + b1_ref[...], 0.0)  # (TILE_M, P) f32

    # ---- stage conv2 operands: lane slots [dx=-1 | dx=0 | dx=+1] ------------
    # Zero only the two halo bands; all data rows are fully overwritten.
    zero_band = jnp.zeros((OFF, 3 * P), jnp.float32)
    pad_ref[0:OFF, :] = zero_band
    pad_ref[OFF + TILE_M:OFF + TILE_M + OFF, :] = zero_band

    pad_ref[OFF:OFF + TILE_M, P:2 * P] = o1                # center (dx = 0)
    # dx = -1 / +1 taps: read the center slot at a +-1 row offset (the halo
    # supplies the zero boundary) and fold the column-wrap mask into the store.
    left = pad_ref[OFF - 1:OFF - 1 + TILE_M, P:2 * P] * ml_ref[...]
    pad_ref[OFF:OFF + TILE_M, 0:P] = left
    right = pad_ref[OFF + 1:OFF + 1 + TILE_M, P:2 * P] * mr_ref[...]
    pad_ref[OFF:OFF + TILE_M, 2 * P:3 * P] = right

    # ---- conv2 (3x3, stride=1, pad=1) as 3 aligned MXU dots of K = 3*P ------
    acc2 = None
    for ky in range(3):                         # static unroll, aligned slices
        r0 = OFF + (ky - 1) * W
        slab = pad_ref[r0:r0 + TILE_M, :].astype(compute_dtype)  # (TILE_M, 3P)
        wk = w2_ref[ky * 3 * P:(ky + 1) * 3 * P, :]              # (3P, P)
        d = jnp.dot(slab, wk, preferred_element_type=jnp.float32)
        # dy = -1 / +1 must not bleed across the top/bottom of each image
        # (also kills cross-image bleed when several images share the tile).
        if ky == 0:
            d = d * mt_ref[...]
        elif ky == 2:
            d = d * mb_ref[...]
        acc2 = d if acc2 is None else acc2 + d
    o2 = jnp.maximum(acc2 * s2_ref[...] + b2_ref[...], 0.0).astype(compute_dtype)

    # ---- conv3 (1x1) + bn3 + identity residual + relu ------------------------
    a3 = jnp.dot(o2, w3_ref[...], preferred_element_type=jnp.float32)
    a3 = a3 * s3_ref[...] + b3_ref[...] + x_ref[...]       # re-read x (f32)
    o_ref[...] = jnp.maximum(a3, 0.0).astype(o_ref.dtype)


# -------------------------------- wrappers -----------------------------------

def _fold_bn(gamma, beta, mean, var, eps=1e-5):
    scale = gamma / jnp.sqrt(var + eps)
    bias = beta - mean * scale
    return (scale.reshape(1, -1).astype(jnp.float32),
            bias.reshape(1, -1).astype(jnp.float32))


def _vmem_limit_bytes():
    """Per-generation VMEM budget (v7x: 64 MiB/TC; v5e/v6e: 128 MiB)."""
    try:
        info = pltpu.get_tpu_info()
        cap = getattr(info, "vmem_capacity_bytes", None)
        if cap:
            return int(min(96 * 2 ** 20, cap // 2))
    except Exception:
        pass
    return 32 * 2 ** 20


def bottleneck_forward_nhwc(x_nhwc, params, *, images_per_step=None,
                            compute_dtype=jnp.bfloat16, out_dtype=jnp.bfloat16):
    N, H, W, Cin = x_nhwc.shape
    planes = params["w1"].shape[1]
    Cout = params["w3"].shape[1]
    HW = H * W

    # Identity-residual path only (module defaults: stride=1, downsample=None).
    assert Cout == 4 * planes, (Cout, planes)
    assert Cin == Cout, "identity residual requires in_planes == 4*planes"
    # TODO(synk): stride>1 and the downsample branch are not implemented.
    assert W % 8 == 0, "W must be a multiple of 8 (sublane-aligned row shifts)"
    assert planes % 128 == 0 and Cin % 128 == 0, "channels must be lane-aligned"

    # ---- how many whole images to fuse per grid step -------------------------
    # Target ~1024 rows per step (MXU row fill + step-overhead amortization);
    # on v7x this also gives each TensorCore several pipelined steps once the
    # batch is non-trivial.
    if images_per_step is None:
        images_per_step = max(1, 1024 // HW) if HW < 1024 else 1
    G = int(min(max(1, images_per_step), N))
    while N % G:
        G -= 1
    TILE_M = G * HW
    num_steps = N // G
    M = N * HW
    OFF = W                                    # halo rows above/below the tile

    # ---- parameters in matmul layout, bf16 for the MXU -----------------------
    w1 = params["w1"].astype(compute_dtype)                              # (Cin, P)
    w2 = params["w2"].reshape(9 * planes, planes).astype(compute_dtype)  # (9P, P)
    w3 = params["w3"].astype(compute_dtype)                              # (P, 4P)
    s1, b1 = _fold_bn(*params["bn1"])
    s2, b2 = _fold_bn(*params["bn2"])
    s3, b3 = _fold_bn(*params["bn3"])

    # ---- precomputed boundary masks (constant across grid steps) -------------
    r = jnp.arange(TILE_M, dtype=jnp.int32)
    x_col = r % W
    y_row = (r // W) % H
    mask_l = (x_col != 0).astype(jnp.float32).reshape(TILE_M, 1)
    mask_r = (x_col != W - 1).astype(jnp.float32).reshape(TILE_M, 1)
    mask_t = (y_row != 0).astype(jnp.float32).reshape(TILE_M, 1)
    mask_b = (y_row != H - 1).astype(jnp.float32).reshape(TILE_M, 1)

    x2d = x_nhwc.reshape(M, Cin)               # f32 rows; bf16 cast is in-kernel

    flops = 2 * M * (Cin * planes + 9 * planes * planes + planes * Cout)
    bytes_accessed = int(
        4 * M * Cin                                          # x (f32, in-kernel cast)
        + jnp.dtype(out_dtype).itemsize * M * Cout           # bf16 output
        + 2 * (Cin * planes + 9 * planes * planes + planes * Cout)
        + 4 * 2 * (2 * planes + Cout)                        # folded BN consts
        + 4 * 4 * TILE_M)                                    # masks

    kernel = functools.partial(_bottleneck_kernel, W=W, OFF=OFF,
                               compute_dtype=compute_dtype)
    const = lambda i: (0, 0)                   # weights / consts stay VMEM-resident

    out2d = pl.pallas_call(
        kernel,
        out_shape=jax.ShapeDtypeStruct((M, Cout), out_dtype),
        grid=(num_steps,),
        in_specs=[
            pl.BlockSpec((TILE_M, Cin), lambda i: (i, 0)),   # x (rows of whole images)
            pl.BlockSpec((TILE_M, 1), const),                # mask_l
            pl.BlockSpec((TILE_M, 1), const),                # mask_r
            pl.BlockSpec((TILE_M, 1), const),                # mask_top
            pl.BlockSpec((TILE_M, 1), const),                # mask_bottom
            pl.BlockSpec((Cin, planes), const),              # w1
            pl.BlockSpec((1, planes), const),                # s1
            pl.BlockSpec((1, planes), const),                # b1
            pl.BlockSpec((9 * planes, planes), const),       # w2
            pl.BlockSpec((1, planes), const),                # s2
            pl.BlockSpec((1, planes), const),                # b2
            pl.BlockSpec((planes, Cout), const),             # w3
            pl.BlockSpec((1, Cout), const),                  # s3
            pl.BlockSpec((1, Cout), const),                  # b3
        ],
        out_specs=pl.BlockSpec((TILE_M, Cout), lambda i: (i, 0)),
        scratch_shapes=[pltpu.VMEM((TILE_M + 2 * OFF, 3 * planes), jnp.float32)],
        compiler_params=pltpu.CompilerParams(
            dimension_semantics=("parallel",),
            vmem_limit_bytes=_vmem_limit_bytes()),
        cost_estimate=pl.CostEstimate(flops=flops, transcendentals=0,
                                      bytes_accessed=bytes_accessed),
    )(x2d, mask_l, mask_r, mask_t, mask_b,
      w1, s1, b1, w2, s2, b2, w3, s3, b3)

    return out2d.reshape(N, H, W, Cout)


def bottleneck_forward(x_nchw, params, **kw):
    """PyTorch-facing NCHW entry point.

    NOTE: in a full network keep activations NHWC end-to-end and drop these
    transposes — each costs an extra activation pass of HBM bandwidth.
    """
    x_nhwc = jnp.transpose(x_nchw, (0, 2, 3, 1))
    out = bottleneck_forward_nhwc(x_nhwc, params, **kw)
    return jnp.transpose(out, (0, 3, 1, 2))


# --------------------------- pure-JAX reference ------------------------------

def _ref_forward_nhwc(x_nhwc, params, compute_dtype=jnp.bfloat16):
    """Reference with the same bf16 quantization points as the kernel."""
    q = lambda a: a.astype(compute_dtype).astype(jnp.float32)
    in_planes, planes = params["w1"].shape

    x32 = x_nhwc.astype(jnp.float32)
    w1 = q(params["w1"]).reshape(1, 1, in_planes, planes)
    w2 = q(params["w2"]).reshape(3, 3, planes, planes)
    w3 = q(params["w3"]).reshape(1, 1, planes, 4 * planes)

    def bn(y, p):
        s, b = _fold_bn(*p)
        return y * s.reshape(1, 1, 1, -1) + b.reshape(1, 1, 1, -1)

    def conv(y, w, pad):
        return jax.lax.conv_general_dilated(
            y, w, (1, 1), pad, dimension_numbers=("NHWC", "HWIO", "NHWC"))

    o = q(jax.nn.relu(bn(conv(q(x32), w1, [(0, 0), (0, 0)]), params["bn1"])))
    o = q(jax.nn.relu(bn(conv(o, w2, [(1, 1), (1, 1)]), params["bn2"])))
    o = bn(conv(o, w3, [(0, 0), (0, 0)]), params["bn3"]) + x32   # f32 residual
    return jax.nn.relu(o)


# ----------------------------------- main -------------------------------------

def _bn_params(key, c):
    k1, k2, k3, k4 = jax.random.split(key, 4)
    gamma = jax.random.uniform(k1, (c,), jnp.float32, 0.5, 1.5)
    beta = 0.1 * jax.random.normal(k2, (c,), jnp.float32)
    mean = 0.1 * jax.random.normal(k3, (c,), jnp.float32)
    var = jax.random.uniform(k4, (c,), jnp.float32, 0.5, 1.5)
    return (gamma, beta, mean, var)


if __name__ == "__main__":
    key = jax.random.PRNGKey(0)
    ks = jax.random.split(key, 8)

    # ResNet-50 "layer2" identity block: Bottleneck(in_planes=512, planes=128)
    # (identity residual needs in_planes == 4*planes; planes=128 keeps every
    # staging slice lane-aligned).  Small spatial / batch: 4 x 8 x 8.
    in_planes, planes = 512, 128
    N, H, W = 4, 8, 8

    params = {
        # conv weights in matmul form: (Cin, Cout) / (kh*kw, Cin, Cout)
        "w1": jax.random.normal(ks[0], (in_planes, planes), jnp.float32)
              / jnp.sqrt(float(in_planes)),
        "w2": jax.random.normal(ks[1], (9, planes, planes), jnp.float32)
              / jnp.sqrt(float(9 * planes)),
        "w3": jax.random.normal(ks[2], (planes, 4 * planes), jnp.float32)
              / jnp.sqrt(float(planes)),
        "bn1": _bn_params(ks[3], planes),
        "bn2": _bn_params(ks[4], planes),
        "bn3": _bn_params(ks[5], 4 * planes),
    }

    x_nhwc = jax.random.normal(ks[6], (N, H, W, in_planes), jnp.float32)

    # 2 images per grid step -> 2 pipelined steps of 128 fused rows each.
    out = jax.block_until_ready(
        bottleneck_forward_nhwc(x_nhwc, params, images_per_step=2))
    ref = jax.block_until_ready(_ref_forward_nhwc(x_nhwc, params))

    assert out.shape == (N, H, W, 4 * planes), out.shape
    out_f32 = out.astype(jnp.float32)
    max_err = float(jnp.max(jnp.abs(out_f32 - ref)))
    assert jnp.allclose(out_f32, ref, atol=2e-2, rtol=2e-2), max_err

    print("KERNEL_OK")
</pallas_src>

<mosaic_0001>
module attributes {stable_mosaic.version = 11 : i64} {
  func.func @_bottleneck_kernel(%arg0: i32, %arg1: memref<128x512xf32, #tpu.memory_space<vmem>>, %arg2: memref<128x1xf32, #tpu.memory_space<vmem>>, %arg3: memref<128x1xf32, #tpu.memory_space<vmem>>, %arg4: memref<128x1xf32, #tpu.memory_space<vmem>>, %arg5: memref<128x1xf32, #tpu.memory_space<vmem>>, %arg6: memref<512x128xbf16, #tpu.memory_space<vmem>>, %arg7: memref<1x128xf32, #tpu.memory_space<vmem>>, %arg8: memref<1x128xf32, #tpu.memory_space<vmem>>, %arg9: memref<1152x128xbf16, #tpu.memory_space<vmem>>, %arg10: memref<1x128xf32, #tpu.memory_space<vmem>>, %arg11: memref<1x128xf32, #tpu.memory_space<vmem>>, %arg12: memref<128x512xbf16, #tpu.memory_space<vmem>>, %arg13: memref<1x512xf32, #tpu.memory_space<vmem>>, %arg14: memref<1x512xf32, #tpu.memory_space<vmem>>, %arg15: memref<128x512xbf16, #tpu.memory_space<vmem>>, %arg16: memref<144x384xf32, #tpu.memory_space<vmem>>) attributes {dimension_semantics = [#tpu.dimension_semantics<parallel>], iteration_bounds = array<i64: 2>, scalar_prefetch = 0 : i64, scratch_operands = 1 : i64, tpu.core_type = #tpu.core_type<tc>, window_params = [{transform_indices = @transform_0, window_bounds = array<i64: 128, 512>}, {pipeline_mode = #tpu.pipeline_mode<synchronous>, transform_indices = @transform_1, window_bounds = array<i64: 128, 1>}, {pipeline_mode = #tpu.pipeline_mode<synchronous>, transform_indices = @transform_2, window_bounds = array<i64: 128, 1>}, {pipeline_mode = #tpu.pipeline_mode<synchronous>, transform_indices = @transform_3, window_bounds = array<i64: 128, 1>}, {pipeline_mode = #tpu.pipeline_mode<synchronous>, transform_indices = @transform_4, window_bounds = array<i64: 128, 1>}, {pipeline_mode = #tpu.pipeline_mode<synchronous>, transform_indices = @transform_5, window_bounds = array<i64: 512, 128>}, {pipeline_mode = #tpu.pipeline_mode<synchronous>, transform_indices = @transform_6, window_bounds = array<i64: 1, 128>}, {pipeline_mode = #tpu.pipeline_mode<synchronous>, transform_indices = @transform_7, window_bounds = array<i64: 1, 128>}, {pipeline_mode = #tpu.pipeline_mode<synchronous>, transform_indices = @transform_8, window_bounds = array<i64: 1152, 128>}, {pipeline_mode = #tpu.pipeline_mode<synchronous>, transform_indices = @transform_9, window_bounds = array<i64: 1, 128>}, {pipeline_mode = #tpu.pipeline_mode<synchronous>, transform_indices = @transform_10, window_bounds = array<i64: 1, 128>}, {pipeline_mode = #tpu.pipeline_mode<synchronous>, transform_indices = @transform_11, window_bounds = array<i64: 128, 512>}, {pipeline_mode = #tpu.pipeline_mode<synchronous>, transform_indices = @transform_12, window_bounds = array<i64: 1, 512>}, {pipeline_mode = #tpu.pipeline_mode<synchronous>, transform_indices = @transform_13, window_bounds = array<i64: 1, 512>}, {transform_indices = @transform_14, window_bounds = array<i64: 128, 512>}]} {
    %c0 = arith.constant 0 : index
    %c0_0 = arith.constant 0 : index
    %0 = vector.load %arg1[%c0, %c0_0] : memref<128x512xf32, #tpu.memory_space<vmem>>, vector<128x512xf32>
    %1 = arith.truncf %0 : vector<128x512xf32> to vector<128x512xbf16>
    %c0_1 = arith.constant 0 : index
    %c0_2 = arith.constant 0 : index
    %2 = vector.load %arg6[%c0_1, %c0_2] : memref<512x128xbf16, #tpu.memory_space<vmem>>, vector<512x128xbf16>
    %cst = arith.constant dense<0.000000e+00> : vector<128x128xf32>
    %3 = tpu.matmul %1, %2, %cst {dimension_numbers = #tpu.dot_dimension_numbers<[1], [0], [0], [1], [0, 0, 1, 1], [], []>} : vector<128x512xbf16>, vector<512x128xbf16>, vector<128x128xf32> -> vector<128x128xf32>
    %c0_3 = arith.constant 0 : index
    %c0_4 = arith.constant 0 : index
    %4 = vector.load %arg7[%c0_3, %c0_4] : memref<1x128xf32, #tpu.memory_space<vmem>>, vector<1x128xf32>
    %5 = vector.broadcast %4 : vector<1x128xf32> to vector<128x128xf32>
    %6 = arith.mulf %3, %5 : vector<128x128xf32>
    %c0_5 = arith.constant 0 : index
    %c0_6 = arith.constant 0 : index
    %7 = vector.load %arg8[%c0_5, %c0_6] : memref<1x128xf32, #tpu.memory_space<vmem>>, vector<1x128xf32>
    %8 = vector.broadcast %7 : vector<1x128xf32> to vector<128x128xf32>
    %9 = arith.addf %6, %8 : vector<128x128xf32>
    %cst_7 = arith.constant 0.000000e+00 : f32
    %10 = vector.broadcast %cst_7 : f32 to vector<128x128xf32>
    %11 = arith.maximumf %9, %10 : vector<128x128xf32>
    %cst_8 = arith.constant 0.000000e+00 : f32
    %12 = vector.broadcast %cst_8 : f32 to vector<8x384xf32>
    %c0_9 = arith.constant 0 : index
    %c0_10 = arith.constant 0 : index
    %13 = vector.load %arg16[%c0_9, %c0_10] : memref<144x384xf32, #tpu.memory_space<vmem>>, vector<8x384xf32>
    tpu.vector_store %arg16[%c0_9, %c0_10], %12 {strides = array<i32>} : memref<144x384xf32, #tpu.memory_space<vmem>>, vector<8x384xf32>,
    %c136 = arith.constant 136 : index
    %c0_11 = arith.constant 0 : index
    %14 = vector.load %arg16[%c136, %c0_11] : memref<144x384xf32, #tpu.memory_space<vmem>>, vector<8x384xf32>
    tpu.vector_store %arg16[%c136, %c0_11], %12 {strides = array<i32>} : memref<144x384xf32, #tpu.memory_space<vmem>>, vector<8x384xf32>,
    %c8 = arith.constant 8 : index
    %c128 = arith.constant 128 : index
    %15 = vector.load %arg16[%c8, %c128] : memref<144x384xf32, #tpu.memory_space<vmem>>, vector<128x128xf32>
    tpu.vector_store %arg16[%c8, %c128], %11 {strides = array<i32>} : memref<144x384xf32, #tpu.memory_space<vmem>>, vector<128x128xf32>,
    %c7 = arith.constant 7 : index
    %c128_12 = arith.constant 128 : index
    %16 = vector.load %arg16[%c7, %c128_12] : memref<144x384xf32, #tpu.memory_space<vmem>>, vector<128x128xf32>
    %c0_13 = arith.constant 0 : index
    %c0_14 = arith.constant 0 : index
    %17 = vector.load %arg2[%c0_13, %c0_14] : memref<128x1xf32, #tpu.memory_space<vmem>>, vector<128x1xf32>
    %18 = vector.broadcast %17 : vector<128x1xf32> to vector<128x128xf32>
    %19 = arith.mulf %16, %18 : vector<128x128xf32>
    %c8_15 = arith.constant 8 : index
    %c0_16 = arith.constant 0 : index
    %20 = vector.load %arg16[%c8_15, %c0_16] : memref<144x384xf32, #tpu.memory_space<vmem>>, vector<128x128xf32>
    tpu.vector_store %arg16[%c8_15, %c0_16], %19 {strides = array<i32>} : memref<144x384xf32, #tpu.memory_space<vmem>>, vector<128x128xf32>,
    %c9 = arith.constant 9 : index
    %c128_17 = arith.constant 128 : index
    %21 = vector.load %arg16[%c9, %c128_17] : memref<144x384xf32, #tpu.memory_space<vmem>>, vector<128x128xf32>
    %c0_18 = arith.constant 0 : index
    %c0_19 = arith.constant 0 : index
    %22 = vector.load %arg3[%c0_18, %c0_19] : memref<128x1xf32, #tpu.memory_space<vmem>>, vector<128x1xf32>
    %23 = vector.broadcast %22 : vector<128x1xf32> to vector<128x128xf32>
    %24 = arith.mulf %21, %23 : vector<128x128xf32>
    %c8_20 = arith.constant 8 : index
    %c256 = arith.constant 256 : index
    %25 = vector.load %arg16[%c8_20, %c256] : memref<144x384xf32, #tpu.memory_space<vmem>>, vector<128x128xf32>
    tpu.vector_store %arg16[%c8_20, %c256], %24 {strides = array<i32>} : memref<144x384xf32, #tpu.memory_space<vmem>>, vector<128x128xf32>,
    %c0_21 = arith.constant 0 : index
    %c0_22 = arith.constant 0 : index
    %26 = vector.load %arg16[%c0_21, %c0_22] : memref<144x384xf32, #tpu.memory_space<vmem>>, vector<128x384xf32>
    %27 = arith.truncf %26 : vector<128x384xf32> to vector<128x384xbf16>
    %c0_23 = arith.constant 0 : index
    %c0_24 = arith.constant 0 : index
    %28 = vector.load %arg9[%c0_23, %c0_24] : memref<1152x128xbf16, #tpu.memory_space<vmem>>, vector<384x128xbf16>
    %cst_25 = arith.constant dense<0.000000e+00> : vector<128x128xf32>
    %29 = tpu.matmul %27, %28, %cst_25 {dimension_numbers = #tpu.dot_dimension_numbers<[1], [0], [0], [1], [0, 0, 1, 1], [], []>} : vector<128x384xbf16>, vector<384x128xbf16>, vector<128x128xf32> -> vector<128x128xf32>
    %c0_26 = arith.constant 0 : index
    %c0_27 = arith.constant 0 : index
    %30 = vector.load %arg4[%c0_26, %c0_27] : memref<128x1xf32, #tpu.memory_space<vmem>>, vector<128x1xf32>
    %31 = vector.broadcast %30 : vector<128x1xf32> to vector<128x128xf32>
    %32 = arith.mulf %29, %31 : vector<128x128xf32>
    %c8_28 = arith.constant 8 : index
    %c0_29 = arith.constant 0 : index
    %33 = vector.load %arg16[%c8_28, %c0_29] : memref<144x384xf32, #tpu.memory_space<vmem>>, vector<128x384xf32>
    %34 = arith.truncf %33 : vector<128x384xf32> to vector<128x384xbf16>
    %c384 = arith.constant 384 : index
    %c0_30 = arith.constant 0 : index
    %35 = vector.load %arg9[%c384, %c0_30] : memref<1152x128xbf16, #tpu.memory_space<vmem>>, vector<384x128xbf16>
    %cst_31 = arith.constant dense<0.000000e+00> : vector<128x128xf32>
    %36 = tpu.matmul %34, %35, %cst_31 {dimension_numbers = #tpu.dot_dimension_numbers<[1], [0], [0], [1], [0, 0, 1, 1], [], []>} : vector<128x384xbf16>, vector<384x128xbf16>, vector<128x128xf32> -> vector<128x128xf32>
    %37 = arith.addf %32, %36 : vector<128x128xf32>
    %c16 = arith.constant 16 : index
    %c0_32 = arith.constant 0 : index
    %38 = vector.load %arg16[%c16, %c0_32] : memref<144x384xf32, #tpu.memory_space<vmem>>, vector<128x384xf32>
    %39 = arith.truncf %38 : vector<128x384xf32> to vector<128x384xbf16>
    %c768 = arith.constant 768 : index
    %c0_33 = arith.constant 0 : index
    %40 = vector.load %arg9[%c768, %c0_33] : memref<1152x128xbf16, #tpu.memory_space<vmem>>, vector<384x128xbf16>
    %cst_34 = arith.constant dense<0.000000e+00> : vector<128x128xf32>
    %41 = tpu.matmul %39, %40, %cst_34 {dimension_numbers = #tpu.dot_dimension_numbers<[1], [0], [0], [1], [0, 0, 1, 1], [], []>} : vector<128x384xbf16>, vector<384x128xbf16>, vector<128x128xf32> -> vector<128x128xf32>
    %c0_35 = arith.constant 0 : index
    %c0_36 = arith.constant 0 : index
    %42 = vector.load %arg5[%c0_35, %c0_36] : memref<128x1xf32, #tpu.memory_space<vmem>>, vector<128x1xf32>
    %43 = vector.broadcast %42 : vector<128x1xf32> to vector<128x128xf32>
    %44 = arith.mulf %41, %43 : vector<128x128xf32>
    %45 = arith.addf %37, %44 : vector<128x128xf32>
    %c0_37 = arith.constant 0 : index
    %c0_38 = arith.constant 0 : index
    %46 = vector.load %arg10[%c0_37, %c0_38] : memref<1x128xf32, #tpu.memory_space<vmem>>, vector<1x128xf32>
    %47 = vector.broadcast %46 : vector<1x128xf32> to vector<128x128xf32>
    %48 = arith.mulf %45, %47 : vector<128x128xf32>
    %c0_39 = arith.constant 0 : index
    %c0_40 = arith.constant 0 : index
    %49 = vector.load %arg11[%c0_39, %c0_40] : memref<1x128xf32, #tpu.memory_space<vmem>>, vector<1x128xf32>
    %50 = vector.broadcast %49 : vector<1x128xf32> to vector<128x128xf32>
    %51 = arith.addf %48, %50 : vector<128x128xf32>
    %cst_41 = arith.constant 0.000000e+00 : f32
    %52 = vector.broadcast %cst_41 : f32 to vector<128x128xf32>
    %53 = arith.maximumf %51, %52 : vector<128x128xf32>
    %54 = arith.truncf %53 : vector<128x128xf32> to vector<128x128xbf16>
    %c0_42 = arith.constant 0 : index
    %c0_43 = arith.constant 0 : index
    %55 = vector.load %arg12[%c0_42, %c0_43] : memref<128x512xbf16, #tpu.memory_space<vmem>>, vector<128x512xbf16>
    %cst_44 = arith.constant dense<0.000000e+00> : vector<128x512xf32>
    %56 = tpu.matmul %54, %55, %cst_44 {dimension_numbers = #tpu.dot_dimension_numbers<[1], [0], [0], [1], [0, 0, 1, 1], [], []>} : vector<128x128xbf16>, vector<128x512xbf16>, vector<128x512xf32> -> vector<128x512xf32>
    %c0_45 = arith.constant 0 : index
    %c0_46 = arith.constant 0 : index
    %57 = vector.load %arg13[%c0_45, %c0_46] : memref<1x512xf32, #tpu.memory_space<vmem>>, vector<1x512xf32>
    %58 = vector.broadcast %57 : vector<1x512xf32> to vector<128x512xf32>
    %59 = arith.mulf %56, %58 : vector<128x512xf32>
    %c0_47 = arith.constant 0 : index
    %c0_48 = arith.constant 0 : index
    %60 = vector.load %arg14[%c0_47, %c0_48] : memref<1x512xf32, #tpu.memory_space<vmem>>, vector<1x512xf32>
    %61 = vector.broadcast %60 : vector<1x512xf32> to vector<128x512xf32>
    %62 = arith.addf %59, %61 : vector<128x512xf32>
    %c0_49 = arith.constant 0 : index
    %c0_50 = arith.constant 0 : index
    %63 = vector.load %arg1[%c0_49, %c0_50] : memref<128x512xf32, #tpu.memory_space<vmem>>, vector<128x512xf32>
    %64 = arith.addf %62, %63 : vector<128x512xf32>
    %cst_51 = arith.constant 0.000000e+00 : f32
    %65 = vector.broadcast %cst_51 : f32 to vector<128x512xf32>
    %66 = arith.maximumf %64, %65 : vector<128x512xf32>
    %67 = arith.truncf %66 : vector<128x512xf32> to vector<128x512xbf16>
    %c0_52 = arith.constant 0 : index
    %c0_53 = arith.constant 0 : index
    %68 = vector.load %arg15[%c0_52, %c0_53] : memref<128x512xbf16, #tpu.memory_space<vmem>>, vector<128x512xbf16>
    tpu.vector_store %arg15[%c0_52, %c0_53], %67 {strides = array<i32>} : memref<128x512xbf16, #tpu.memory_space<vmem>>, vector<128x512xbf16>,
    return
  }
  func.func @transform_0(%arg0: i32) -> (i32, i32) {
    %c0_i32 = arith.constant 0 : i32
    %c0_i32_0 = arith.constant 0 : i32
    return %arg0, %c0_i32 : i32, i32
  }
  func.func @transform_1(%arg0: i32) -> (i32, i32) {
    %c0_i32 = arith.constant 0 : i32
    %c0_i32_0 = arith.constant 0 : i32
    %c0_i32_1 = arith.constant 0 : i32
    return %c0_i32, %c0_i32_0 : i32, i32
  }
  func.func @transform_2(%arg0: i32) -> (i32, i32) {
    %c0_i32 = arith.constant 0 : i32
    %c0_i32_0 = arith.constant 0 : i32
    %c0_i32_1 = arith.constant 0 : i32
    return %c0_i32, %c0_i32_0 : i32, i32
  }
  func.func @transform_3(%arg0: i32) -> (i32, i32) {
    %c0_i32 = arith.constant 0 : i32
    %c0_i32_0 = arith.constant 0 : i32
    %c0_i32_1 = arith.constant 0 : i32
    return %c0_i32, %c0_i32_0 : i32, i32
  }
  func.func @transform_4(%arg0: i32) -> (i32, i32) {
    %c0_i32 = arith.constant 0 : i32
    %c0_i32_0 = arith.constant 0 : i32
    %c0_i32_1 = arith.constant 0 : i32
    return %c0_i32, %c0_i32_0 : i32, i32
  }
  func.func @transform_5(%arg0: i32) -> (i32, i32) {
    %c0_i32 = arith.constant 0 : i32
    %c0_i32_0 = arith.constant 0 : i32
    %c0_i32_1 = arith.constant 0 : i32
    return %c0_i32, %c0_i32_0 : i32, i32
  }
  func.func @transform_6(%arg0: i32) -> (i32, i32) {
    %c0_i32 = arith.constant 0 : i32
    %c0_i32_0 = arith.constant 0 : i32
    %c0_i32_1 = arith.constant 0 : i32
    return %c0_i32, %c0_i32_0 : i32, i32
  }
  func.func @transform_7(%arg0: i32) -> (i32, i32) {
    %c0_i32 = arith.constant 0 : i32
    %c0_i32_0 = arith.constant 0 : i32
    %c0_i32_1 = arith.constant 0 : i32
    return %c0_i32, %c0_i32_0 : i32, i32
  }
  func.func @transform_8(%arg0: i32) -> (i32, i32) {
    %c0_i32 = arith.constant 0 : i32
    %c0_i32_0 = arith.constant 0 : i32
    %c0_i32_1 = arith.constant 0 : i32
    return %c0_i32, %c0_i32_0 : i32, i32
  }
  func.func @transform_9(%arg0: i32) -> (i32, i32) {
    %c0_i32 = arith.constant 0 : i32
    %c0_i32_0 = arith.constant 0 : i32
    %c0_i32_1 = arith.constant 0 : i32
    return %c0_i32, %c0_i32_0 : i32, i32
  }
  func.func @transform_10(%arg0: i32) -> (i32, i32) {
    %c0_i32 = arith.constant 0 : i32
    %c0_i32_0 = arith.constant 0 : i32
    %c0_i32_1 = arith.constant 0 : i32
    return %c0_i32, %c0_i32_0 : i32, i32
  }
  func.func @transform_11(%arg0: i32) -> (i32, i32) {
    %c0_i32 = arith.constant 0 : i32
    %c0_i32_0 = arith.constant 0 : i32
    %c0_i32_1 = arith.constant 0 : i32
    return %c0_i32, %c0_i32_0 : i32, i32
  }
  func.func @transform_12(%arg0: i32) -> (i32, i32) {
    %c0_i32 = arith.constant 0 : i32
    %c0_i32_0 = arith.constant 0 : i32
    %c0_i32_1 = arith.constant 0 : i32
    return %c0_i32, %c0_i32_0 : i32, i32
  }
  func.func @transform_13(%arg0: i32) -> (i32, i32) {
    %c0_i32 = arith.constant 0 : i32
    %c0_i32_0 = arith.constant 0 : i32
    %c0_i32_1 = arith.constant 0 : i32
    return %c0_i32, %c0_i32_0 : i32, i32
  }
  func.func @transform_14(%arg0: i32) -> (i32, i32) {
    %c0_i32 = arith.constant 0 : i32
    %c0_i32_0 = arith.constant 0 : i32
    return %arg0, %c0_i32 : i32, i32
  }
}

</mosaic_0001>

<bundles_post_ra>
// kernel: tpu_custom_call.1
= control target key start
LH: loop header
LB: loop body
LE: loop exit
PB: predicated region body
PF: predicated region fallthrough
CT: control target
= control target key end

     0   :  { %s7446_s0 = inlined_call_operand.hbm [shape: f32[256,512], index: 0, kind: input, shape index: {}]   ;;  %s7447_s1 = inlined_call_operand.vmem [shape: f32[128,1], index: 1, kind: input, shape index: {}]   ;;  %s7448_s2 = inlined_call_operand.vmem [shape: f32[128,1], index: 2, kind: input, shape index: {}]   ;;  %s7449_s3 = inlined_call_operand.vmem [shape: f32[128,1], index: 3, kind: input, shape index: {}]   ;;  %s7450_s4 = inlined_call_operand.vmem [shape: f32[128,1], index: 4, kind: input, shape index: {}]   ;;  %s7451_s5 = inlined_call_operand.vmem [shape: bf16[512,128], index: 5, kind: input, shape index: {}]   ;;  %s7452_s6 = inlined_call_operand.vmem [shape: f32[1,128], index: 6, kind: input, shape index: {}]   ;;  %s7453_s7 = inlined_call_operand.vmem [shape: f32[1,128], index: 7, kind: input, shape index: {}]   ;;  %s7454_s8 = inlined_call_operand.hbm [shape: bf16[1152,128], index: 8, kind: input, shape index: {}]   ;;  %s7455_s9 = inlined_call_operand.vmem [shape: f32[1,128], index: 9, kind: input, shape index: {}]   ;;  %s7456_s10 = inlined_call_operand.vmem [shape: f32[1,128], index: 10, kind: input, shape index: {}]   ;;  %s7457_s11 = inlined_call_operand.vmem [shape: bf16[128,512], index: 11, kind: input, shape index: {}]   ;;  %s7458_s12 = inlined_call_operand.vmem [shape: f32[1,512], index: 12, kind: input, shape index: {}]   ;;  %s7459_s13 = inlined_call_operand.vmem [shape: f32[1,512], index: 13, kind: input, shape index: {}]   ;;  %s7460_s14 = inlined_call_operand.hbm [shape: bf16[256,512], index: 14, kind: output, shape index: {}]  }
   0x1   :  { %7483 = sst [smem:[#allocation25_spill]] %s7456_s10 }
   0x2   :  { %7484 = sst [smem:[#allocation26_spill]] %s7458_s12 }
   0x3   :  { %7485 = sst [smem:[#allocation27_spill]] %s7459_s13 }
   0x4   :  { %7486 = sst [smem:[#allocation28_spill]] %s7460_s14 }
   0x5   :  { %19 = vsyncpa [#allocation4], 0 }
   0x6   :  { %21 = vsyncpa [#allocation4 + $0x1], 0 }
   0x7   :  { %22 = vsyncpa [#allocation7], 0 }
   0x8   :  { %23 = vsyncpa [#allocation5], 0 }
   0x9   :  { %25 = vsyncpa [#allocation5 + $0x1], 0  ;;  %s5572_s29 = smov 0   ;;  %s5574_s30 = smov 0  }
   0xa   :  { %s5576_s15 = smov 0   ;;  %s5578_s16 = smov 0  }
   0xb LB: > { %7487 = sst [smem:[#allocation12_spill]] %s5472_s29  ;;  %s5593_s17 = sadd.s32 4294967295, %s5484_s16   ;;  %s5484_s16 = sphi %s5578_s16, %s7553_s16   ;;  %s5480_s15 = sphi %s5576_s15, %s7556_s15   ;;  %s5476_s30 = sphi %s5574_s30, %s7555_s30   ;;  %s5472_s29 = sphi %s5572_s29, %s7554_s29  }
   0xc   : > { %s4429_s18 = sadd.s32 4294967294, %s5484_s16   ;;  %p51_p0 = scmp.ne.s32.totalorder %s5476_s30, %s5472_s29 }
   0xd   : > { %p7466_p1 = scmp.eq.s32.totalorder %s5593_s17, 0  ;;  %p354_p3 = scmp.eq.s32.totalorder %s4429_s18, 1 }
   0xe   : > { %p4430_p5 = scmp.ge.s32.totalorder %s5484_s16, 1  ;;  %p361_p7 = scmp.lt.s32.totalorder %s5484_s16, 3 }
   0xf   : > { %p5602_p4 = por %p7466_p1, %p51_p0  ;;  %p5607_p6 = por %p354_p3, %p51_p0 }
  0x10   : > { %p5612_p8 = pnand %p4430_p5, %p361_p7  ;;  %s5486_s22 = smov [#allocation6]  }
  0x11   : > { %s7488_s19 = scalar_select %p5602_p4, 1, 0 }
  0x12   : > { %s7489_s20 = scalar_select %p5607_p6, 1, 0 }
  0x13   : > { %s7491_s21 = scalar_select %p5612_p8, 1, 0 }
  0x14   : > { %7490 = sst [smem:[#allocation13_spill]] %s7489_s20  ;;  %s394_s23 = sshll.u32 %s5486_s22, 4  ;;  %s5616_s23 = int_to_ptr.vmem [resolvable:$true] %s394_s23 }
  0x15   : > { %p5143_p9 = pneg %p5612_p8  ;;  %s5628_s25 = sadd.s32 1, %s5484_s16  }
  0x16   : > { %7493 = sst [smem:[#allocation14_spill]] %s5628_s25  ;;  %s38_s26 = sadd.s32 1, %s5480_s15 }
  0x17   : > { %p5623_p11 = pnand %p5143_p9, %p7466_p1  ;;  %s35_s27 = ssub.s32 %s5484_s16, %s5628_s25 }
  0x18   : > { %s5356_s22 = scalar_lea.hbm %s7454_s8, 9216 }
  0x19   : > { %p5357_p12 = scmp.ne.s32.totalorder %s7454_s8, %s5356_s22  ;;  %p5358_p13 = pneg %p5623_p11 }
  0x1a   : > { %p5363_p5 = scmp.lt.u32.totalorder %s5356_s22, %s7454_s8 }
  0x1b   : > { %p5359_p0 = pnand %p5358_p13, %p5357_p12 }
  0x1d   : > { %p5360_p3 = pneg %p5359_p0 }
  0x1f   : > { %p5365_p7 = pnand %p5363_p5, %p5360_p3 }
  0x21   : > { %5368 = shalt.err (!%p5365_p7)
}
  0x22   : > { %s5369_s25 = scalar_lea.vmem %s5616_s23, 9216  ;;  %p5377_p2 = scmp.lt.s32.totalorder %s5616_s23, %s5616_s23 }
  0x23   : > { %p5370_p9 = scmp.ne.s32.totalorder %s5616_s23, %s5369_s25  ;;  %p5378_p6 = scmp.lt.s32.totalorder %s5369_s25, %s5369_s25 }
  0x25   : > { %p5372_p10 = pnand %p5370_p9, %p5358_p13  ;;  %p5379_p4 = por %p5378_p6, %p5377_p2 }
  0x27   : > { %p5373_p1 = pneg %p5372_p10 }
  0x29   : > { %p5380_p8 = pnand %p5379_p4, %p5373_p1 }
  0x2b   : > { %5383 = shalt.err (!%p5380_p8)
}
  0x2c   : > { %s5487_s29 = smov 64   ;;  %s5488_s13 = smov 4  }
  0x2d   : > { %5146 = dma.hbm_to_vmem [thread:$0]  (!%p5623_p11), %s7454_s8, 9216, %s5616_s23, [#allocation7], %s5487_s29, %s5487_s29, %s5488_s13  }
  0x2e   : > { %p36_p2 = scmp.eq.s32.totalorder %s35_s27, 0  ;;  %p45_p1 = scmp.ne.s32.totalorder %s5480_s15, %s5476_s30 }
  0x2f   : > { %p46_p4 = scmp.eq.s32.totalorder %s5484_s16, 0  ;;  %p5156_p6 = scmp.lt.s32.totalorder %s5484_s16, 2 }
  0x30   : > { %s5659_s25 = scalar_select %p36_p2, %s5480_s15, %s38_s26  }
  0x31   : > { %p47_p8 = por %p46_p4, %p45_p1  ;;  %p7494_p10 = scmp.eq.s32.totalorder %s5593_s17, 1 }
  0x32   : > { %s423_s18 = sand.u32 1, %s5480_s15   ;;  %s4620_s22 = sshll.u32 %s5484_s16, 13 }
  0x33   : > { %p5663_p12 = por %p7494_p10, %p45_p1  ;;  %s4433_s12 = sshll.u32 %s423_s18, 9 }
  0x34   : > { %s5672_s14 = scalar_lea.hbm %s7446_s0, %s4620_s22  ;;  %s427_s23 = scalar_lea.vmem [#allocation3], %s4433_s12 }
  0x35   : > { %s435_s26 = sshll.u32 %s427_s23, 4  ;;  %p5674_p11 = pnand %p5156_p6, %p47_p8  ;;  %s5678_s26 = int_to_ptr.vmem [resolvable:$true] %s435_s26 }
  0x36   : > { %s5680_s29 = scalar_lea.sflag [#allocation4], %s423_s18  ;;  %s5384_s13 = scalar_lea.hbm %s5672_s14, 8192 }
  0x37   : > { %p5385_p13 = scmp.ne.s32.totalorder %s5672_s14, %s5384_s13  ;;  %p5386_p0 = pneg %p5674_p11 }
  0x38   : > { %s5389_s20 = scalar_lea.hbm %s7446_s0, 16384  ;;  %p5390_p7 = scmp.lt.u32.totalorder %s5672_s14, %s7446_s0 }
  0x39   : > { %p5387_p3 = pnand %p5386_p0, %p5385_p13  ;;  %p5391_p9 = scmp.lt.u32.totalorder %s5389_s20, %s5384_s13 }
  0x3a   : > { %p5393_p1 = scmp.lt.u32.totalorder %s5384_s13, %s5672_s14 }
  0x3b   : > { %p5388_p5 = pneg %p5387_p3  ;;  %p5392_p2 = por %p5391_p9, %p5390_p7 }
  0x3d   : > { %p5394_p4 = por %p5393_p1, %p5392_p2 }
  0x3f   : > { %p5395_p6 = pnand %p5394_p4, %p5388_p5 }
  0x41   : > { %5398 = shalt.err (!%p5395_p6)
}
  0x42   : > { %s5399_s18 = scalar_lea.vmem %s5678_s26, 8192  ;;  %s5489_s23 = smov [#allocation3]  }
  0x43   : > { %p5400_p8 = scmp.ne.s32.totalorder %s5678_s26, %s5399_s18  ;;  %s5404_s10 = sshll.u32 %s5489_s23, 4  ;;  %s5405_s10 = int_to_ptr.vmem [resolvable:$false] %s5404_s10 }
  0x44   : > { %s5406_s12 = scalar_lea.vmem %s5405_s10, 16384  ;;  %p5407_p3 = scmp.lt.s32.totalorder %s5678_s26, %s5405_s10 }
  0x45   : > { %p5402_p10 = pnand %p5400_p8, %p5386_p0  ;;  %p5408_p7 = scmp.lt.s32.totalorder %s5406_s12, %s5399_s18 }
  0x47   : > { %p5403_p13 = pneg %p5402_p10  ;;  %p5409_p9 = por %p5408_p7, %p5407_p3 }
  0x49   : > { %p5410_p2 = pnand %p5409_p9, %p5403_p13 }
  0x4b   : > { %5413 = shalt.err (!%p5410_p2)
}
  0x4c   : > { %s5490_s13 = smov 512   ;;  %s5491_s20 = smov 32  }
  0x4d   : > { %5150 = dma.hbm_to_vmem [thread:$0]  (!%p5674_p11), %s5672_s14, 8192, %s5678_s26, %s5680_s29, %s5490_s13, %s5490_s13, %s5491_s20  }
  0x4e   : > { %p7497_p0 = scmp.ne.s32.totalorder %s7491_s21, 0 }
  0x50   : > { %447 = sbr.rel (%p7497_p0) target bundleno = 1033 (0x409), region = 76 }
  0x57   : > { %s5711_s22 = sand.u32 1, %s5476_s30   ;;  %p7498_p5 = scmp.ne.s32.totalorder %s7488_s19, 0 }
  0x58   : > { %s4438_s24 = sshll.u32 %s5711_s22, 9  ;;  %s450_s18 = scalar_lea.sflag [#allocation4], %s5711_s22 }
  0x59   : > { %s5715_s23 = scalar_lea.vmem [#allocation3], %s4438_s24 }
  0x5a   : > { %5459 = dma.done.wait (%p7498_p5), %s450_s18, 8192  }
  0x5b   : > { %5461 = vsyncadd (%p7498_p5), %s450_s18, 4294959104  ;;  %p7499_p11 = scmp.eq.s32.totalorder %s5593_s17, 0 }
  0x5d   : > { %5463 = dma.done.wait (%p7499_p11), [#allocation7], 9216   ;;  %p7500_p1 = pmov %p7499_p11 }
  0x5e   : > { %v7469_v0 = vmov 0   ;;  %v5202_v1 = vld [vmem:[%s7451_s5 + $0x40] sm:$0xff]   ;;  %v5206_v5 = vld [vmem:[%s7451_s5 + $0x48] sm:$0xff]   ;;  %v5210_v9 = vld [vmem:[%s7451_s5 + $0x50] sm:$0xff]   ;;  %v5493_v29 = vmov 0.0   ;;  %vm1315_vm0 = vcmask 1040384  }
  0x5f   : > { %5465 = vsyncadd (%p7500_p1), [#allocation7], 4294958080  ;;  %5201 = vset.pattern.permute.xlu1 %v7469_v0  ;;  %5200 = vset.pattern.permute.xlu0 %v7469_v0  ;;  %v5203_v2 = vld [vmem:[%s7451_s5 + $0xc0] sm:$0xff]   ;;  %v5207_v6 = vld [vmem:[%s7451_s5 + $0xc8] sm:$0xff]   ;;  %1114 = vst [vmem:[#allocation2 + $0x8] sm:$0xff] %v5493_v29  ;;  %vm1232_vm1 = vcmask 1046528  }
  0x60   : > { %4655 = vmatprep.subr.bf16.mxu0 %v5202_v1  ;;  %v5204_v3 = vld [vmem:[%s7451_s5] sm:$0xff]   ;;  %4719 = vmatprep.subr.bf16.mxu1 %v5203_v2  ;;  %v5208_v7 = vld [vmem:[%s7451_s5 + $0x8] sm:$0xff]   ;;  %v5211_v10 = vld [vmem:[%s7451_s5 + $0xd0] sm:$0xff]   ;;  %1117 = vst [vmem:[#allocation2 + $0x1a0] sm:$0xff] %v5493_v29  ;;  %s7535_s21 = sld [smem:[#allocation25_spill]]  ;;  %s7546_s27 = sld [smem:[#allocation26_spill]] }
  0x61   : > { %v5205_v4 = vld [vmem:[%s7451_s5 + $0x80] sm:$0xff]   ;;  %4656 = vmatpush3.bf16.msra.mxu0 %v5204_v3  ;;  %v5209_v8 = vld [vmem:[%s7451_s5 + $0x88] sm:$0xff]   ;;  %v5212_v11 = vld [vmem:[%s7451_s5 + $0x10] sm:$0xff]   ;;  %s7547_s10 = sld [smem:[#allocation27_spill]]  ;;  %s4440_s12 = sshll.u32 %s5711_s22, 8 }
  0x62   : > { %4720 = vmatpush3.bf16.msra.mxu1 %v5205_v4  ;;  %4657 = vmatprep.subr.bf16.mxu0 %v5206_v5  ;;  %v5213_v12 = vld [vmem:[%s7451_s5 + $0x90] sm:$0xff]   ;;  %v5214_v13 = vld [vmem:[%s7451_s5 + $0x58] sm:$0xff]   ;;  %v5218_v17 = vld [vmem:[%s7451_s5 + $0x60] sm:$0xff]   ;;  %s7199_s13 = scalar_lea.vmem [#allocation8], %s4440_s12  ;;  %s4654_s20 = sshll.u32 %s5593_s17, 12 }
  0x63   : > { %4721 = vmatprep.subr.bf16.mxu1 %v5207_v6  ;;  %v5215_v14 = vld [vmem:[%s7451_s5 + $0xd8] sm:$0xff]   ;;  %v5219_v18 = vld [vmem:[%s7451_s5 + $0xe0] sm:$0xff]   ;;  %v5222_v21 = vld [vmem:[%s7451_s5 + $0x68] sm:$0xff]   ;;  %s4346_s24 = sshll.u32 %s7199_s13, 4  ;;  %s7548_s14 = sld [smem:[#allocation28_spill]]  ;;  %s7400_s24 = int_to_ptr.vmem [resolvable:$true] %s4346_s24 }
  0x64   : > { %v5216_v15 = vld [vmem:[%s7451_s5 + $0x18] sm:$0xff]   ;;  %v5220_v19 = vld [vmem:[%s7451_s5 + $0x20] sm:$0xff]   ;;  %v5223_v22 = vld [vmem:[%s7451_s5 + $0xe8] sm:$0xff]   ;;  %s4332_s26 = scalar_lea.sflag [#allocation5], %s5711_s22  ;;  %s5494_s17 = smov [#allocation8]  }
  0x65   : > { %4658 = vmatpush3.bf16.msra.mxu0 %v5208_v7  ;;  %v5217_v16 = vld [vmem:[%s7451_s5 + $0x98] sm:$0xff]   ;;  %v5221_v20 = vld [vmem:[%s7451_s5 + $0xa0] sm:$0xff]   ;;  %v5224_v23 = vld [vmem:[%s7451_s5 + $0x28] sm:$0xff]   ;;  %s5418_s19 = sshll.u32 %s5494_s17, 4  ;;  %s5419_s19 = int_to_ptr.vmem [resolvable:$false] %s5418_s19 }
  0x66   : > { %4722 = vmatpush3.bf16.msra.mxu1 %v5209_v8  ;;  %4659 = vmatprep.subr.bf16.mxu0 %v5210_v9  ;;  %v5225_v24 = vld [vmem:[%s7451_s5 + $0xa8] sm:$0xff]   ;;  %v1398_v25 = vld [vmem:[%s7448_s2] sm:$0xff]  ;;  %v5226_v27 = vld [vmem:[%s7451_s5 + $0x70] sm:$0xff]   ;;  %s5420_s29 = scalar_lea.vmem %s5419_s19, 8192  ;;  %p5421_p10 = scmp.lt.s32.totalorder %s7400_s24, %s5419_s19 }
  0x67   : > { %4723 = vmatprep.subr.bf16.mxu1 %v5211_v10  ;;  %v1152_v26 = vld [vmem:[%s7447_s1] sm:$0xff]  ;;  %1416 = vperm.xlu1 %5201, %v1398_v25   ;;  %v5227_v28 = vld [vmem:[%s7451_s5 + $0xf0] sm:$0xff]   ;;  %v1399_v32 = vld [vmem:[%s7448_s2 + $0x8] sm:$0xff] }
  0x68   : > { %1170 = vperm.xlu0 %5200, %v1152_v26   ;;  %v5228_v30 = vld [vmem:[%s7451_s5 + $0x30] sm:$0xff]   ;;  %v1153_v33 = vld [vmem:[%s7447_s1 + $0x8] sm:$0xff]  ;;  %v5230_v34 = vld [vmem:[%s7451_s5 + $0x78] sm:$0xff]  }
  0x69   : > { %4660 = vmatpush3.bf16.msra.mxu0 %v5212_v11  ;;  %v5229_v31 = vld [vmem:[%s7451_s5 + $0xb0] sm:$0xff]   ;;  %v5231_v35 = vld [vmem:[%s7451_s5 + $0xf8] sm:$0xff]   ;;  %v508_v42 = vld [vmem:[%s5715_s23 + $0x18] sm:$0xff] }
  0x6a   : > { %4724 = vmatpush3.bf16.msra.mxu1 %v5213_v12  ;;  %4661 = vmatprep.subr.bf16.mxu0 %v5214_v13  ;;  %v5232_v36 = vld [vmem:[%s7451_s5 + $0x38] sm:$0xff]   ;;  %v1400_v39 = vld [vmem:[%s7448_s2 + $0x10] sm:$0xff]  ;;  %v512_v44 = vld [vmem:[%s5715_s23 + $0x38] sm:$0xff] }
  0x6b   : > { %4725 = vmatprep.subr.bf16.mxu1 %v5215_v14  ;;  %1420 = vperm.xlu1 %5201, %v1399_v32   ;;  %v5233_v37 = vld [vmem:[%s7451_s5 + $0xb8] sm:$0xff]   ;;  %v505_v45 = vld [vmem:[%s5715_s23] sm:$0xff]  ;;  %v572_v47 = vpack.c.bf16 %v512_v44, %v508_v42  ;;  %v507_v49 = vld [vmem:[%s5715_s23 + $0x10] sm:$0xff] }
  0x6c   : > { %1174 = vperm.xlu0 %5200, %v1153_v33   ;;  %v1401_v38 = vld [vmem:[%s7448_s2 + $0x18] sm:$0xff]  ;;  %v509_v46 = vld [vmem:[%s5715_s23 + $0x20] sm:$0xff]  ;;  %v511_v50 = vld [vmem:[%s5715_s23 + $0x30] sm:$0xff] }
  0x6d   : > { %4662 = vmatpush3.bf16.msra.mxu0 %v5216_v15  ;;  %v506_v40 = vld [vmem:[%s5715_s23 + $0x8] sm:$0xff]  ;;  %v569_v48 = vpack.c.bf16 %v509_v46, %v505_v45  ;;  %v571_v52 = vpack.c.bf16 %v511_v50, %v507_v49  ;;  %v1154_v53 = vld [vmem:[%s7447_s1 + $0x10] sm:$0xff]  ;;  %986 = vmatprep.mubr.bf16.mxu1 %v572_v47  ;;  %v516_v56 = vld [vmem:[%s5715_s23 + $0x58] sm:$0xff] }
  0x6e   : > { %4726 = vmatpush3.bf16.msra.mxu1 %v5217_v16  ;;  %4663 = vmatprep.subr.bf16.mxu0 %v5218_v17  ;;  %v510_v41 = vld [vmem:[%s5715_s23 + $0x28] sm:$0xff]  ;;  %v520_v58 = vld [vmem:[%s5715_s23 + $0x78] sm:$0xff]  ;;  %v513_v59 = vld [vmem:[%s5715_s23 + $0x40] sm:$0xff] }
  0x6f   : > { %4727 = vmatprep.subr.bf16.mxu1 %v5219_v18  ;;  %1428 = vperm.xlu1 %5201, %v1401_v38   ;;  %v570_v43 = vpack.c.bf16 %v510_v41, %v506_v40  ;;  %v1155_v51 = vld [vmem:[%s7447_s1 + $0x18] sm:$0xff]  ;;  %v517_v60 = vld [vmem:[%s5715_s23 + $0x60] sm:$0xff]  ;;  %v1403_v61 = vld [vmem:[%s7448_s2 + $0x28] sm:$0xff]  ;;  %v576_v62 = vpack.c.bf16 %v520_v58, %v516_v56 }
  0x70   : > { %1424 = vperm.xlu0 %5200, %v1400_v39   ;;  %v514_v54 = vld [vmem:[%s5715_s23 + $0x48] sm:$0xff]  ;;  %v515_v63 = vld [vmem:[%s5715_s23 + $0x50] sm:$0xff]  ;;  %v573_v3 = vpack.c.bf16 %v517_v60, %v513_v59  ;;  %v524_v6 = vld [vmem:[%s5715_s23 + $0x98] sm:$0xff] }
  0x71   : > { %4664 = vmatpush3.bf16.msra.mxu0 %v5220_v19  ;;  %889 = vmatprep.mubr.bf16.mxu0 %v570_v43  ;;  %v518_v55 = vld [vmem:[%s5715_s23 + $0x68] sm:$0xff]  ;;  %v519_v1 = vld [vmem:[%s5715_s23 + $0x70] sm:$0xff]  ;;  %v528_v8 = vld [vmem:[%s5715_s23 + $0xb8] sm:$0xff] }
  0x72   : > { %4728 = vmatpush3.bf16.msra.mxu1 %v5221_v20  ;;  %4665 = vmatprep.subr.bf16.mxu0 %v5222_v21  ;;  %v574_v57 = vpack.c.bf16 %v518_v55, %v514_v54  ;;  %v1402_v2 = vld [vmem:[%s7448_s2 + $0x20] sm:$0xff]  ;;  %v522_v4 = vld [vmem:[%s5715_s23 + $0x88] sm:$0xff]  ;;  %v575_v7 = vpack.c.bf16 %v519_v1, %v515_v63  ;;  %v1404_v11 = vld [vmem:[%s7448_s2 + $0x30] sm:$0xff]  ;;  %v580_v12 = vpack.c.bf16 %v528_v8, %v524_v6 }
  0x73   : > { %4729 = vmatprep.subr.bf16.mxu1 %v5223_v22  ;;  %1182 = vperm.xlu1 %5201, %v1155_v51   ;;  %v526_v5 = vld [vmem:[%s5715_s23 + $0xa8] sm:$0xff]  ;;  %v521_v13 = vld [vmem:[%s5715_s23 + $0x80] sm:$0xff]  ;;  %v1157_v15 = vld [vmem:[%s7447_s1 + $0x28] sm:$0xff] }
  0x74   : > { %1178 = vperm.xlu0 %5200, %v1154_v53   ;;  %v1405_v9 = vld [vmem:[%s7448_s2 + $0x38] sm:$0xff]  ;;  %v578_v10 = vpack.c.bf16 %v526_v5, %v522_v4  ;;  %v525_v14 = vld [vmem:[%s5715_s23 + $0xa0] sm:$0xff]  ;;  %v523_v16 = vld [vmem:[%s5715_s23 + $0x90] sm:$0xff] }
  0x75   : > { %4666 = vmatpush3.bf16.msra.mxu0 %v5224_v23  ;;  %v527_v17 = vld [vmem:[%s5715_s23 + $0xb0] sm:$0xff]  ;;  %v530_v19 = vld [vmem:[%s5715_s23 + $0xc8] sm:$0xff]  ;;  %v577_v21 = vpack.c.bf16 %v525_v14, %v521_v13  ;;  %v532_v22 = vld [vmem:[%s5715_s23 + $0xd8] sm:$0xff] }
  0x76   : > { %4730 = vmatpush3.bf16.msra.mxu1 %v5225_v24  ;;  %4667 = vmatprep.subr.bf16.mxu0 %v5226_v27  ;;  %v1156_v18 = vld [vmem:[%s7447_s1 + $0x20] sm:$0xff]  ;;  %v534_v20 = vld [vmem:[%s5715_s23 + $0xe8] sm:$0xff]  ;;  %v536_v23 = vld [vmem:[%s5715_s23 + $0xf8] sm:$0xff]  ;;  %v579_v24 = vpack.c.bf16 %v527_v17, %v523_v16 }
  0x77   : > { %4731 = vmatprep.subr.bf16.mxu1 %v5227_v28  ;;  %1436 = vperm.xlu1 %5201, %v1403_v61   ;;  %v1407_v25 = vld [vmem:[%s7448_s2 + $0x48] sm:$0xff]  ;;  %v582_v26 = vpack.c.bf16 %v534_v20, %v530_v19  ;;  %v1406_v27 = vld [vmem:[%s7448_s2 + $0x40] sm:$0xff]  ;;  %v584_v28 = vpack.c.bf16 %v536_v23, %v532_v22  ;;  %v529_v29 = vld [vmem:[%s5715_s23 + $0xc0] sm:$0xff] }
  0x78   : > { %1432 = vperm.xlu0 %5200, %v1402_v2   ;;  %v531_v32 = vld [vmem:[%s5715_s23 + $0xd0] sm:$0xff]  ;;  %v540_v38 = vld [vmem:[%s5715_s23 + $0x118] sm:$0xff]  ;;  %v1159_v41 = vld [vmem:[%s7447_s1 + $0x38] sm:$0xff] }
  0x79   : > { %4668 = vmatpush3.bf16.msra.mxu0 %v5228_v30  ;;  %v533_v30 = vld [vmem:[%s5715_s23 + $0xe0] sm:$0xff]  ;;  %v535_v33 = vld [vmem:[%s5715_s23 + $0xf0] sm:$0xff]  ;;  %v544_v39 = vld [vmem:[%s5715_s23 + $0x138] sm:$0xff] }
  0x7a   : > { %4732 = vmatpush3.bf16.msra.mxu1 %v5229_v31  ;;  %4669 = vmatprep.subr.bf16.mxu0 %v5230_v34  ;;  %v1409_v31 = vld [vmem:[%s7448_s2 + $0x58] sm:$0xff]  ;;  %v1408_v34 = vld [vmem:[%s7448_s2 + $0x50] sm:$0xff]  ;;  %v583_v40 = vpack.c.bf16 %v535_v33, %v531_v32  ;;  %v588_v44 = vpack.c.bf16 %v544_v39, %v540_v38  ;;  %v1411_v47 = vld [vmem:[%s7448_s2 + $0x68] sm:$0xff] }
  0x7b   : > { %4733 = vmatprep.subr.bf16.mxu1 %v5231_v35  ;;  %1444 = vperm.xlu1 %5201, %v1405_v9   ;;  %v538_v35 = vld [vmem:[%s5715_s23 + $0x108] sm:$0xff]  ;;  %v1158_v43 = vld [vmem:[%s7447_s1 + $0x30] sm:$0xff]  ;;  %v543_v49 = vld [vmem:[%s5715_s23 + $0x130] sm:$0xff] }
  0x7c   : > { %1440 = vperm.xlu0 %5200, %v1404_v11   ;;  %v537_v45 = vld [vmem:[%s5715_s23 + $0x100] sm:$0xff]  ;;  %v1410_v50 = vld [vmem:[%s7448_s2 + $0x60] sm:$0xff]  ;;  %v546_v51 = vld [vmem:[%s5715_s23 + $0x148] sm:$0xff] }
  0x7d   : > { %4670 = vmatpush3.bf16.msra.mxu0 %v5232_v36  ;;  %v542_v36 = vld [vmem:[%s5715_s23 + $0x128] sm:$0xff]  ;;  %v541_v46 = vld [vmem:[%s5715_s23 + $0x120] sm:$0xff]  ;;  %v548_v54 = vld [vmem:[%s5715_s23 + $0x158] sm:$0xff] }
  0x7e   : > { %4734 = vmatpush3.bf16.msra.mxu1 %v5233_v37  ;;  %v581_v37 = vpack.c.bf16 %v533_v30, %v529_v29  ;;  %v586_v42 = vpack.c.bf16 %v542_v36, %v538_v35  ;;  %v585_v53 = vpack.c.bf16 %v541_v46, %v537_v45  ;;  %v552_v55 = vld [vmem:[%s5715_s23 + $0x178] sm:$0xff]  ;;  %v1412_v59 = vld [vmem:[%s7448_s2 + $0x70] sm:$0xff]  ;;  %v547_v1 = vld [vmem:[%s5715_s23 + $0x150] sm:$0xff] }
  0x7f   : > { %1190 = vperm.xlu1 %5201, %v1157_v15   ;;  %v592_v60 = vpack.c.bf16 %v552_v55, %v548_v54  ;;  %v545_v61 = vld [vmem:[%s5715_s23 + $0x140] sm:$0xff]  ;;  %v1161_v63 = vld [vmem:[%s7447_s1 + $0x48] sm:$0xff]  ;;  %v551_v2 = vld [vmem:[%s5715_s23 + $0x170] sm:$0xff] }
  0x80   : > { %890 = vmatmul.mubr.bf16.vlgmr.msra.gmra.mrb[0].mxu0 %v569_v48  ;;  %1186 = vperm.xlu0 %5200, %v1156_v18   ;;  %v539_v48 = vld [vmem:[%s5715_s23 + $0x110] sm:$0xff]  ;;  %v554_v4 = vld [vmem:[%s5715_s23 + $0x188] sm:$0xff]  ;;  %v556_v8 = vld [vmem:[%s5715_s23 + $0x198] sm:$0xff] }
  0x81   : > { %987 = vmatmul.mubr.bf16.vlgmr.msra.gmra.mrb[0].mxu1 %v571_v52  ;;  %897 = vmatprep.mubr.bf16.mxu0 %v574_v57  ;;  %v550_v52 = vld [vmem:[%s5715_s23 + $0x168] sm:$0xff]  ;;  %v587_v56 = vpack.c.bf16 %v543_v49, %v539_v48  ;;  %v560_v9 = vld [vmem:[%s5715_s23 + $0x1b8] sm:$0xff]  ;;  %v1162_v11 = vld [vmem:[%s7447_s1 + $0x50] sm:$0xff] }
  0x82   : > { %994 = vmatprep.mubr.bf16.mxu1 %v576_v62  ;;  %v1413_v57 = vld [vmem:[%s7448_s2 + $0x78] sm:$0xff]  ;;  %v590_v58 = vpack.c.bf16 %v550_v52, %v546_v51  ;;  %v549_v62 = vld [vmem:[%s5715_s23 + $0x160] sm:$0xff]  ;;  %v596_v13 = vpack.c.bf16 %v560_v9, %v556_v8  ;;  %v1165_v16 = vld [vmem:[%s7447_s1 + $0x68] sm:$0xff] }
  0x83   : > { %1452 = vperm.xlu1 %5201, %v1407_v25   ;;  %v558_v5 = vld [vmem:[%s5715_s23 + $0x1a8] sm:$0xff]  ;;  %v589_v6 = vpack.c.bf16 %v549_v62, %v545_v61  ;;  %v553_v14 = vld [vmem:[%s5715_s23 + $0x180] sm:$0xff]  ;;  %v555_v17 = vld [vmem:[%s5715_s23 + $0x190] sm:$0xff] }
  0x84   : > { %1448 = vperm.xlu0 %5200, %v1406_v27   ;;  %v557_v15 = vld [vmem:[%s5715_s23 + $0x1a0] sm:$0xff]  ;;  %v559_v18 = vld [vmem:[%s5715_s23 + $0x1b0] sm:$0xff]  ;;  %v562_v20 = vld [vmem:[%s5715_s23 + $0x1c8] sm:$0xff] }
  0x85   : > { %v1164_v19 = vld [vmem:[%s7447_s1 + $0x60] sm:$0xff]  ;;  %v564_v22 = vld [vmem:[%s5715_s23 + $0x1d8] sm:$0xff]  ;;  %v1167_v25 = vld [vmem:[%s7447_s1 + $0x78] sm:$0xff] }
  0x86   : > { %v568_v23 = vld [vmem:[%s5715_s23 + $0x1f8] sm:$0xff]  ;;  %v1166_v27 = vld [vmem:[%s7447_s1 + $0x70] sm:$0xff]  ;;  %v563_v33 = vld [vmem:[%s5715_s23 + $0x1d0] sm:$0xff] }
  0x87   : > { %1460 = vperm.xlu1 %5201, %v1409_v31   ;;  %v600_v29 = vpack.c.bf16 %v568_v23, %v564_v22  ;;  %v561_v30 = vld [vmem:[%s5715_s23 + $0x1c0] sm:$0xff]  ;;  %v2084_v32 = vld [vmem:[%s7449_s3 + $0x8] sm:$0xff]  ;;  %v2083_v35 = vld [vmem:[%s7449_s3] sm:$0xff] }
  0x88   : > { %898 = vmatmul.mubr.bf16.gmra.mrb[4].mxu0 %v573_v3  ;;  %1456 = vperm.xlu0 %5200, %v1408_v34   ;;  %v1160_v3 = vld [vmem:[%s7447_s1 + $0x40] sm:$0xff]  ;;  %v565_v31 = vld [vmem:[%s5715_s23 + $0x1e0] sm:$0xff]  ;;  %v3132_v46 = vld [vmem:[%s7450_s4 + $0x28] sm:$0xff] }
  0x89   : > { %995 = vmatmul.mubr.bf16.gmra.mrb[4].mxu1 %v575_v7  ;;  %905 = vmatprep.mubr.bf16.mxu0 %v578_v10  ;;  %v1163_v7 = vld [vmem:[%s7447_s1 + $0x58] sm:$0xff]  ;;  %v591_v10 = vpack.c.bf16 %v551_v2, %v547_v1  ;;  %v567_v34 = vld [vmem:[%s5715_s23 + $0x1f0] sm:$0xff]  ;;  %v597_v36 = vpack.c.bf16 %v565_v31, %v561_v30  ;;  %v2089_v49 = vld [vmem:[%s7449_s3 + $0x30] sm:$0xff] }
  0x8a   : > { %1002 = vmatprep.mubr.bf16.mxu1 %v580_v12  ;;  %v594_v12 = vpack.c.bf16 %v558_v5, %v554_v4  ;;  %v599_v38 = vpack.c.bf16 %v567_v34, %v563_v33  ;;  %v3127_v39 = vld [vmem:[%s7450_s4] sm:$0xff]  ;;  %v2090_v48 = vld [vmem:[%s7449_s3 + $0x38] sm:$0xff]  ;;  %v3133_v51 = vld [vmem:[%s7450_s4 + $0x30] sm:$0xff] }
  0x8b   : > { %1198 = vperm.xlu1 %5201, %v1159_v41   ;;  %v2085_v41 = vld [vmem:[%s7449_s3 + $0x10] sm:$0xff]  ;;  %v2087_v45 = vld [vmem:[%s7449_s3 + $0x20] sm:$0xff]  ;;  %v2092_v54 = vld [vmem:[%s7449_s3 + $0x48] sm:$0xff] }
  0x8c   : > { %1194 = vperm.xlu0 %5200, %v1158_v43   ;;  %v3129_v43 = vld [vmem:[%s7450_s4 + $0x10] sm:$0xff]  ;;  %v2091_v55 = vld [vmem:[%s7449_s3 + $0x40] sm:$0xff]  ;;  %v5242_v1 = vld [vmem:[#allocation6 + $0x58] sm:$0xff]  }
  0x8d   : > { %v5234_v52 = vld [vmem:[#allocation6 + $0x40] sm:$0xff]   ;;  %v5240_v61 = vld [vmem:[#allocation6 + $0x10] sm:$0xff]   ;;  %v5241_v4 = vld [vmem:[#allocation6 + $0x88] sm:$0xff]  }
  0x8e   : > { %4783 = vmatprep.subr.bf16.mxu0 %v5234_v52  ;;  %v5236_v62 = vld [vmem:[#allocation6 + $0x80] sm:$0xff]   ;;  %v3138_v5 = vld [vmem:[%s7450_s4 + $0x58] sm:$0xff]  ;;  %v5246_v9 = vld [vmem:[#allocation6 + $0x90] sm:$0xff]  }
  0x8f   : > { %1468 = vperm.xlu1 %5201, %v1411_v47   ;;  %v3131_v47 = vld [vmem:[%s7450_s4 + $0x20] sm:$0xff]  ;;  %5023 = vmatprep.subr.bf16.mxu1 %v5236_v62  ;;  %v2093_v2 = vld [vmem:[%s7449_s3 + $0x50] sm:$0xff]  ;;  %v5254_v22 = vld [vmem:[#allocation6 + $0x38] sm:$0xff]  }
  0x90   : > { %906 = vmatmul.mubr.bf16.gmra.mrb[8].mxu0 %v577_v21  ;;  %1464 = vperm.xlu0 %5200, %v1410_v50   ;;  %v566_v21 = vld [vmem:[%s5715_s23 + $0x1e8] sm:$0xff]  ;;  %v5245_v8 = vld [vmem:[#allocation6 + $0x20] sm:$0xff]  }
  0x91   : > { %1003 = vmatmul.mubr.bf16.gmra.mrb[8].mxu1 %v579_v24  ;;  %913 = vmatprep.mubr.bf16.mxu0 %v582_v26  ;;  %v593_v24 = vpack.c.bf16 %v557_v15, %v553_v14  ;;  %v595_v26 = vpack.c.bf16 %v559_v18, %v555_v17  ;;  %v3134_v50 = vld [vmem:[%s7450_s4 + $0x38] sm:$0xff]  ;;  %v5249_v14 = vld [vmem:[#allocation6 + $0x98] sm:$0xff]   ;;  %v5250_v15 = vld [vmem:[#allocation6 + $0x70] sm:$0xff]  }
  0x92   : > { %1010 = vmatprep.mubr.bf16.mxu1 %v584_v28  ;;  %v598_v28 = vpack.c.bf16 %v566_v21, %v562_v20  ;;  %5024 = vmatpush3.bf16.msra.mxu1 %v5236_v62  ;;  %v5251_v17 = vld [vmem:[#allocation6 + $0x30] sm:$0xff]   ;;  %v5253_v20 = vld [vmem:[#allocation6 + $0x78] sm:$0xff]   ;;  %v2098_v21 = vld [vmem:[%s7449_s3 + $0x78] sm:$0xff] }
  0x93   : > { %1476 = vperm.xlu1 %5201, %v1413_v57   ;;  %v5238_v57 = vld [vmem:[#allocation6 + $0x8] sm:$0xff]   ;;  %5025 = vmatprep.subr.bf16.mxu1 %v5241_v4  ;;  %v3139_v18 = vld [vmem:[%s7450_s4 + $0x60] sm:$0xff]  ;;  %v2097_v23 = vld [vmem:[%s7449_s3 + $0x70] sm:$0xff] }
  0x94   : > { %1472 = vperm.xlu0 %5200, %v1412_v59   ;;  %v3135_v59 = vld [vmem:[%s7450_s4 + $0x40] sm:$0xff]  ;;  %v5259_v30 = vld [vmem:[#allocation6 + $0x100] sm:$0xff]  }
  0x96   : > { %5026 = vmatpush3.bf16.msra.mxu1 %v5241_v4 }
  0x97   : > { %1206 = vperm.xlu1 %5201, %v1161_v63   ;;  %v2094_v63 = vld [vmem:[%s7449_s3 + $0x58] sm:$0xff]  ;;  %5027 = vmatprep.subr.bf16.mxu1 %v5246_v9 }
  0x98   : > { %914 = vmatmul.mubr.bf16.gmra.mrb[12].mxu0 %v581_v37  ;;  %1202 = vperm.xlu0 %5200, %v1160_v3   ;;  %v3128_v37 = vld [vmem:[%s7450_s4 + $0x8] sm:$0xff] }
  0x99   : > { %1011 = vmatmul.mubr.bf16.gmra.mrb[12].mxu1 %v583_v40  ;;  %921 = vmatprep.mubr.bf16.mxu0 %v586_v42  ;;  %v2086_v40 = vld [vmem:[%s7449_s3 + $0x18] sm:$0xff]  ;;  %v5243_v3 = vld [vmem:[#allocation6 + $0x18] sm:$0xff]  }
  0x9a   : > { %1018 = vmatprep.mubr.bf16.mxu1 %v588_v44  ;;  %v3130_v42 = vld [vmem:[%s7450_s4 + $0x18] sm:$0xff]  ;;  %v2088_v44 = vld [vmem:[%s7449_s3 + $0x28] sm:$0xff]  ;;  %5028 = vmatpush3.bf16.msra.mxu1 %v5246_v9 }
  0x9b   : > { %1214 = vperm.xlu1 %5201, %v1163_v7   ;;  %v5244_v7 = vld [vmem:[#allocation6 + $0x60] sm:$0xff]   ;;  %5029 = vmatprep.subr.bf16.mxu1 %v5249_v14 }
  0x9c   : > { %1210 = vperm.xlu0 %5200, %v1162_v11   ;;  %v2095_v11 = vld [vmem:[%s7449_s3 + $0x60] sm:$0xff] }
  0x9e   : > { %5030 = vmatpush3.bf16.msra.mxu1 %v5249_v14 }
  0x9f   : > { %1222 = vperm.xlu1 %5201, %v1165_v16   ;;  %v3140_v16 = vld [vmem:[%s7450_s4 + $0x68] sm:$0xff] }
  0xa0   : > { %922 = vmatmul.mubr.bf16.gmra.mrb[16].mxu0 %v585_v53  ;;  %1218 = vperm.xlu0 %5200, %v1164_v19   ;;  %v5235_v53 = vld [vmem:[#allocation6] sm:$0xff]  }
  0xa1   : > { %1019 = vmatmul.mubr.bf16.gmra.mrb[16].mxu1 %v587_v56  ;;  %929 = vmatprep.mubr.bf16.mxu0 %v590_v58  ;;  %v5237_v56 = vld [vmem:[#allocation6 + $0x48] sm:$0xff]   ;;  %v3136_v58 = vld [vmem:[%s7450_s4 + $0x48] sm:$0xff]  ;;  %v5252_v19 = vld [vmem:[#allocation6 + $0xa0] sm:$0xff]  }
  0xa2   : > { %1026 = vmatprep.mubr.bf16.mxu1 %v592_v60  ;;  %4784 = vmatpush3.bf16.msra.mxu0 %v5235_v53  ;;  %v5239_v60 = vld [vmem:[#allocation6 + $0x50] sm:$0xff]  }
  0xa3   : > { %1230 = vperm.xlu1 %5201, %v1167_v25   ;;  %4785 = vmatprep.subr.bf16.mxu0 %v5237_v56  ;;  %v3142_v25 = vld [vmem:[%s7450_s4 + $0x78] sm:$0xff] }
  0xa4   : > { %1226 = vperm.xlu0 %5200, %v1166_v27   ;;  %5031 = vmatprep.subr.bf16.mxu1 %v5252_v19  ;;  %v5256_v27 = vld [vmem:[#allocation6 + $0xb0] sm:$0xff]  }
  0xa5   : > { %5032 = vmatpush3.bf16.msra.mxu1 %v5252_v19 }
  0xa6   : > { %4786 = vmatpush3.bf16.msra.mxu0 %v5238_v57 }
  0xa7   : > { %2106 = vperm.xlu1 %5201, %v2084_v32   ;;  %4787 = vmatprep.subr.bf16.mxu0 %v5239_v60 }
  0xa8   : > { %930 = vmatmul.mubr.bf16.gmra.mrb[20].mxu0 %v589_v6  ;;  %2101 = vperm.xlu0 %5200, %v2083_v35   ;;  %v3137_v6 = vld [vmem:[%s7450_s4 + $0x50] sm:$0xff] }
  0xa9   : > { %1027 = vmatmul.mubr.bf16.gmra.mrb[20].mxu1 %v591_v10  ;;  %937 = vmatprep.mubr.bf16.mxu0 %v594_v12  ;;  %v2096_v10 = vld [vmem:[%s7449_s3 + $0x68] sm:$0xff]  ;;  %v5247_v12 = vld [vmem:[#allocation6 + $0x68] sm:$0xff]  }
  0xaa   : > { %1034 = vmatprep.mubr.bf16.mxu1 %v596_v13  ;;  %4788 = vmatpush3.bf16.msra.mxu0 %v5240_v61  ;;  %v5248_v13 = vld [vmem:[#allocation6 + $0x28] sm:$0xff]  }
  0xab   : > { %3150 = vperm.xlu1 %5201, %v3128_v37   ;;  %4789 = vmatprep.subr.bf16.mxu0 %v5242_v1 }
  0xac   : > { %3145 = vperm.xlu0 %5200, %v3127_v39  }
  0xae   : > { %4790 = vmatpush3.bf16.msra.mxu0 %v5243_v3 }
  0xaf   : > { %2116 = vperm.xlu1 %5201, %v2086_v40   ;;  %4791 = vmatprep.subr.bf16.mxu0 %v5244_v7 }
  0xb0   : > { %938 = vmatmul.mubr.bf16.gmra.mrb[24].mxu0 %v593_v24  ;;  %2111 = vperm.xlu0 %5200, %v2085_v41   ;;  %v5255_v24 = vld [vmem:[#allocation6 + $0xa8] sm:$0xff]  }
  0xb1   : > { %1035 = vmatmul.mubr.bf16.gmra.mrb[24].mxu1 %v595_v26  ;;  %945 = vmatprep.mubr.bf16.mxu0 %v598_v28  ;;  %v3141_v26 = vld [vmem:[%s7450_s4 + $0x70] sm:$0xff]  ;;  %v5257_v28 = vld [vmem:[#allocation6 + $0xb8] sm:$0xff]  }
  0xb2   : > { %1042 = vmatprep.mubr.bf16.mxu1 %v600_v29  ;;  %4792 = vmatpush3.bf16.msra.mxu0 %v5245_v8  ;;  %v6079_v29 = vld [vmem:[#allocation6 + $0x140] sm:$0xff]  }
  0xb3   : > { %3160 = vperm.xlu1 %5201, %v3130_v42   ;;  %4793 = vmatprep.subr.bf16.mxu0 %v5247_v12 }
  0xb4   : > { %3155 = vperm.xlu0 %5200, %v3129_v43   ;;  %5033 = vmatprep.subr.bf16.mxu1 %v5255_v24 }
  0xb5   : > { %5034 = vmatpush3.bf16.msra.mxu1 %v5255_v24 }
  0xb6   : > { %4794 = vmatpush3.bf16.msra.mxu0 %v5248_v13  ;;  %5035 = vmatprep.subr.bf16.mxu1 %v5256_v27 }
  0xb7   : > { %2126 = vperm.xlu1 %5201, %v2088_v44   ;;  %4795 = vmatprep.subr.bf16.mxu0 %v5250_v15 }
  0xb8   : > { %946 = vmatmul.mubr.bf16.gmra.mrb[28].mxu0 %v597_v36  ;;  %2121 = vperm.xlu0 %5200, %v2087_v45  }
  0xb9   : > { %1043 = vmatmul.mubr.bf16.gmra.mrb[28].mxu1 %v599_v38 }
  0xba   : > { %4796 = vmatpush3.bf16.msra.mxu0 %v5251_v17  ;;  %5036 = vmatpush3.bf16.msra.mxu1 %v5256_v27 }
  0xbb   : > { %3170 = vperm.xlu1 %5201, %v3132_v46   ;;  %4797 = vmatprep.subr.bf16.mxu0 %v5253_v20 }
  0xbc   : > { %3165 = vperm.xlu0 %5200, %v3131_v47   ;;  %5037 = vmatprep.subr.bf16.mxu1 %v5257_v28 }
  0xbe   : > { %4798 = vmatpush3.bf16.msra.mxu0 %v5254_v22  ;;  %5038 = vmatpush3.bf16.msra.mxu1 %v5257_v28 }
  0xbf   : > { %2136 = vperm.xlu1 %5201, %v2090_v48   ;;  %5055 = vmatprep.subr.bf16.mxu0 %v6079_v29 }
  0xc0   : > { %2131 = vperm.xlu0 %5200, %v2089_v49   ;;  %4863 = vmatprep.subr.bf16.mxu1 %v5259_v30 }
  0xc3   : > { %3180 = vperm.xlu1 %5201, %v3134_v50   ;;  %v1135_v50 = vld [vmem:[#allocation2 + $0x8] sm:$0x80] }
  0xc4   : > { %3175 = vperm.xlu0 %5200, %v3133_v51  }
  0xc7   : > { %2146 = vperm.xlu1 %5201, %v2092_v54  }
  0xc8   : > { %2141 = vperm.xlu0 %5200, %v2091_v55  }
  0xcb   : > { %3190 = vperm.xlu1 %5201, %v3136_v58  }
  0xcc   : > { %3185 = vperm.xlu0 %5200, %v3135_v59  }
  0xcf   : > { %2156 = vperm.xlu1 %5201, %v2094_v63  }
  0xd0   : > { %2151 = vperm.xlu0 %5200, %v2093_v2  }
  0xd3   : > { %3200 = vperm.xlu1 %5201, %v3138_v5  }
  0xd4   : > { %3195 = vperm.xlu0 %5200, %v3137_v6  }
  0xd7   : > { %2166 = vperm.xlu1 %5201, %v2096_v10   ;;  %v6124_v10 = vld [vmem:[%s7452_s6] ss:$0 sm:$0xff] }
  0xd8   : > { %2161 = vperm.xlu0 %5200, %v2095_v11  }
  0xdb   : > { %3210 = vperm.xlu1 %5201, %v3140_v16  }
  0xdc   : > { %3205 = vperm.xlu0 %5200, %v3139_v18  }
  0xdf   : > { %2176 = vperm.xlu1 %5201, %v2098_v21  }
  0xe0   : > { %2171 = vperm.xlu0 %5200, %v2097_v23  }
  0xe3   : > { %3220 = vperm.xlu1 %5201, %v3142_v25  }
  0xe4   : > { %3215 = vperm.xlu0 %5200, %v3141_v26   ;;  %v6141_v26 = vld [vmem:[%s7453_s7] ss:$0 sm:$0xff] }
  0xe6   : > { %v6082_v32 = vpop.permute.xlu1 %1416 }
  0xe7   : > { %v1171_v31 = vpop.permute.xlu0 %1170  ;;  %v1478_v54 = vrot.slane %v6082_v32, 7 }
  0xe8   : > { %v1233_v49 = vrot.slane %v1171_v31, 1 }
  0xea   : > { %v1421_v34 = vpop.permute.xlu1 %1420  ;;  %v6106_v53 = vmul.f32 %v1233_v49, %v1135_v50 }
  0xeb   : > { %v1175_v33 = vpop.permute.xlu0 %1174  ;;  %v1479_v55 = vrot.slane %v1421_v34, 7 }
  0xec   : > { %v1234_v56 = vrot.slane %v1175_v33, 1  ;;  %v1316_v60 = vrot.slane %v6106_v53, 7 }
  0xed   : > { %v6115_v63 = vsel %vm1315_vm0, %v1478_v54, %v1479_v55 }
  0xee   : > { %v1429_v36 = vpop.permute.xlu1 %1428  ;;  %v1235_v6 = vsel %vm1232_vm1, %v1233_v49, %v1234_v56 }
  0xef   : > { %v1425_v35 = vpop.permute.xlu0 %1424  ;;  %v1483_v1 = vrot.slane %v1429_v36, 7 }
  0xf0   : > { %v1481_v57 = vrot.slane %v1425_v35, 7 }
  0xf2   : > { %v6084_v38 = vpop.permute.xlu1 %1182  ;;  %v6127_v12 = vsel %vm1315_vm0, %v1479_v55, %v1481_v57  ;;  %v6134_v23 = vsel %vm1315_vm0, %v1481_v57, %v1483_v1 }
  0xf3   : > { %v1179_v37 = vpop.permute.xlu0 %1178  ;;  %v1238_v7 = vrot.slane %v6084_v38, 1 }
  0xf4   : > { %v1236_v2 = vrot.slane %v1179_v37, 1 }
  0xf6   : > { %v1437_v40 = vpop.permute.xlu1 %1436  ;;  %v1237_v24 = vsel %vm1232_vm1, %v1234_v56, %v1236_v2  ;;  %v6144_v28 = vsel %vm1232_vm1, %v1236_v2, %v1238_v7 }
  0xf7   : > { %v1433_v39 = vpop.permute.xlu0 %1432  ;;  %v1487_v13 = vrot.slane %v1437_v40, 7 }
  0xf8   : > { %v1485_v8 = vrot.slane %v1433_v39, 7 }
  0xfa   : > { %v6088_v42 = vpop.permute.xlu1 %1444  ;;  %v6147_v30 = vsel %vm1315_vm0, %v1483_v1, %v1485_v8  ;;  %v6154_v35 = vsel %vm1315_vm0, %v1485_v8, %v1487_v13 }
  0xfb   : > { %v6086_v41 = vpop.permute.xlu0 %1440  ;;  %v1491_v14 = vrot.slane %v6088_v42, 7 }
  0xfc   : > { %v1489_v15 = vrot.slane %v6086_v41, 7 }
  0xfe   : > { %v6092_v44 = vpop.permute.xlu1 %1190  ;;  %v6157_v36 = vsel %vm1315_vm0, %v1487_v13, %v1489_v15  ;;  %v6163_v41 = vsel %vm1315_vm0, %v1489_v15, %v1491_v14  ;;  %v6189_v15 = vld [vmem:[#allocation2 + $0x8] sm:$0xff] }
  0xff   : > { %v6090_v43 = vpop.permute.xlu0 %1186  ;;  %v1242_v18 = vrot.slane %v6092_v44, 1 }
 0x100   : > { %v1240_v19 = vrot.slane %v6090_v43, 1 }
 0x102   : > { %v6096_v46 = vpop.permute.xlu1 %1452  ;;  %v6166_v42 = vsel %vm1232_vm1, %v1238_v7, %v1240_v19  ;;  %v6169_v43 = vsel %vm1232_vm1, %v1240_v19, %v1242_v18 }
 0x103   : > { %v6094_v45 = vpop.permute.xlu0 %1448  ;;  %v1495_v31 = vrot.slane %v6096_v46, 7 }
 0x104   : > { %v1493_v25 = vrot.slane %v6094_v45, 7 }
 0x106   : > { %v6100_v48 = vpop.permute.xlu1 %1460  ;;  %v6173_v49 = vsel %vm1315_vm0, %v1491_v14, %v1493_v25  ;;  %v6178_v57 = vsel %vm1315_vm0, %v1493_v25, %v1495_v31 }
 0x107   : > { %v6098_v47 = vpop.permute.xlu0 %1456 }
 0x108   : > { %v1497_v37 = vrot.slane %v6098_v47, 7  ;;  %v1499_v47 = vrot.slane %v6100_v48, 7 }
 0x10a   : > { %v6104_v52 = vpop.permute.xlu1 %1198  ;;  %v6182_v2 = vsel %vm1315_vm0, %v1495_v31, %v1497_v37 }
 0x10b   : > { %v6102_v51 = vpop.permute.xlu0 %1194 }
 0x10e   : > { %v6117_v3 = vpop.permute.xlu1 %1468 }
 0x10f   : > { %v6109_v58 = vpop.permute.xlu0 %1464 }
 0x112   : > { %v6160_v38 = vpop.permute.xlu1 %1476 }
 0x113   : > { %v6150_v33 = vpop.permute.xlu0 %1472 }
 0x153   : > { %v4671_v59 = vpop.f32.mrb[0].mxu0 }
 0x154   : > { %v4735_v61 = vpop.f32.mrb[0].mxu1  ;;  %v4672_v62 = vpop.f32.mrb[1].mxu0 }
 0x155   : > { %v4673_v4 = vadd.f32 %v4672_v62, %v4671_v59  ;;  %v4736_v5 = vpop.f32.mrb[1].mxu1  ;;  %v4674_v11 = vpop.f32.mrb[2].mxu0  ;;  %v1244_v59 = vrot.slane %v6102_v51, 1 }
 0x156   : > { %v4737_v9 = vadd.f32 %v4736_v5, %v4735_v61  ;;  %v4738_v16 = vpop.f32.mrb[2].mxu1  ;;  %v4675_v17 = vpop.f32.mrb[3].mxu0  ;;  %v1501_v5 = vrot.slane %v6109_v58, 7 }
 0x157   : > { %v4676_v21 = vadd.f32 %v4675_v17, %v4674_v11  ;;  %v4739_v22 = vpop.f32.mrb[3].mxu1  ;;  %v6193_v17 = vsel %vm1315_vm0, %v1497_v37, %v1499_v47 }
 0x158   : > { %v989_v20 = vadd.f32 %v4737_v9, %v4673_v4  ;;  %v4740_v27 = vadd.f32 %v4739_v22, %v4738_v16  ;;  %v1246_v4 = vrot.slane %v6104_v52, 1  ;;  %v1203_v9 = vpop.permute.xlu0 %1202  ;;  %v7471_v52 = vrot.slane %v6117_v3, 7 }
 0x15a   : > { %v1058_v34 = vmul.f32 %v6124_v10, %v989_v20  ;;  %v992_v39 = vadd.f32 %v4740_v27, %v4676_v21  ;;  %v6197_v20 = vsel %vm1232_vm1, %v1242_v18, %v1244_v59  ;;  %v6199_v21 = vpop.permute.xlu1 %1206  ;;  %v6208_v18 = vsel %vm1232_vm1, %v1244_v59, %v1246_v4  ;;  %v5261_v59 = vld [vmem:[#allocation6 + $0x148] sm:$0xff]  }
 0x15b   : > { %v4677_v40 = vpop.f32.mrb[4].mxu0  ;;  %v1250_v27 = vrot.slane %v6199_v21, 1 }
 0x15c   : > { %v1081_v44 = vadd.f32 %v6141_v26, %v1058_v34  ;;  %v4741_v45 = vpop.f32.mrb[4].mxu1  ;;  %v4678_v46 = vpop.f32.mrb[5].mxu0  ;;  %v1059_v50 = vmul.f32 %v6124_v10, %v992_v39 }
 0x15d   : > { %v4679_v55 = vadd.f32 %v4678_v46, %v4677_v40  ;;  %v4742_v56 = vpop.f32.mrb[5].mxu1  ;;  %v4680_v1 = vpop.f32.mrb[6].mxu0  ;;  %v6211_v40 = vsel %vm1315_vm0, %v1499_v47, %v1501_v5 }
 0x15e   : > { %v1097_v61 = vmax.f32 %v1081_v44, 0.0  ;;  %v4743_v62 = vadd.f32 %v4742_v56, %v4741_v45  ;;  %v1082_v48 = vadd.f32 %v6141_v26, %v1059_v50  ;;  %v4744_v7 = vpop.f32.mrb[6].mxu1  ;;  %v4681_v8 = vpop.f32.mrb[7].mxu0 }
 0x15f   : > { %v4682_v51 = vadd.f32 %v4681_v8, %v4680_v1  ;;  %v4745_v14 = vpop.f32.mrb[7].mxu1  ;;  %v6230_v53 = vpop.permute.xlu0 %1210 }
 0x160   : > { %1119 = vst [vmem:[#allocation2 + $0x20] sm:$0xff] %v1097_v61  ;;  %v6187_v11 = vmul.f32 %v1235_v6, %v1097_v61  ;;  %v997_v13 = vadd.f32 %v4743_v62, %v4679_v55  ;;  %v1674_v16 = vpack.c.bf16 %v1097_v61, %v6189_v15  ;;  %v1098_v58 = vmax.f32 %v1082_v48, 0.0 }
 0x161   : > { %v4746_v19 = vadd.f32 %v4745_v14, %v4744_v7  ;;  %v1248_v6 = vrot.slane %v1203_v9, 1  ;;  %v1252_v7 = vrot.slane %v6230_v53, 1 }
 0x162   : > { %v1317_v22 = vrot.slane %v6187_v11, 7  ;;  %v1060_v25 = vmul.f32 %v6124_v10, %v997_v13  ;;  %1921 = vmatprep.mubr.bf16.mxu0 %v1674_v16  ;;  %1120 = vst [vmem:[#allocation2 + $0x38] sm:$0xff] %v1098_v58  ;;  %v6204_v31 = vmul.f32 %v1237_v24, %v1098_v58  ;;  %v1527_v34 = vmul.f32 %v6115_v63, %v1098_v58 }
 0x163   : > { %v1000_v37 = vadd.f32 %v4746_v19, %v4682_v51  ;;  %v4683_v39 = vpop.f32.mrb[8].mxu0  ;;  %v6222_v63 = vsel %vm1315_vm0, %v1501_v5, %v7471_v52  ;;  %v6228_v61 = vsel %vm1232_vm1, %v1246_v4, %v1248_v6  ;;  %v6234_v5 = vsel %vm1232_vm1, %v1248_v6, %v1250_v27 }
 0x164   : > { %v1083_v44 = vadd.f32 %v6141_v26, %v1060_v25  ;;  %v4747_v45 = vpop.f32.mrb[8].mxu1  ;;  %v4684_v46 = vpop.f32.mrb[9].mxu0  ;;  %v6217_v50 = vsel %vm1315_vm0, %v1316_v60, %v1317_v22  ;;  %v1319_v48 = vrot.slane %v6204_v31, 7  ;;  %v1561_v4 = vrot.slane %v1527_v34, 1  ;;  %v5264_v34 = vld [vmem:[#allocation6 + $0x150] sm:$0xff]  }
 0x165   : > { %v1061_v24 = vmul.f32 %v6124_v10, %v1000_v37  ;;  %v4685_v55 = vadd.f32 %v4684_v46, %v4683_v39  ;;  %v4748_v56 = vpop.f32.mrb[9].mxu1  ;;  %v1673_v47 = vpack.c.bf16 %v6217_v50, %v6189_v15  ;;  %v4686_v1 = vpop.f32.mrb[10].mxu0 }
 0x166   : > { %v1099_v60 = vmax.f32 %v1083_v44, 0.0  ;;  %v4749_v62 = vadd.f32 %v4748_v56, %v4747_v45  ;;  %v4750_v11 = vpop.f32.mrb[10].mxu1  ;;  %v4687_v13 = vpop.f32.mrb[11].mxu0 }
 0x167   : > { %v1381_v8 = vld [vmem:[#allocation2 + $0x20] sm:$0xfe]  ;;  %v1084_v9 = vadd.f32 %v6141_v26, %v1061_v24  ;;  %1922 = vmatmul.mubr.bf16.vlgmr.msra.gmra.mrb[32].mxu0 %v1673_v47  ;;  %v4751_v21 = vpop.f32.mrb[11].mxu1  ;;  %v4688_v25 = vadd.f32 %v4687_v13, %v4686_v1  ;;  %v5267_v1 = vld [vmem:[#allocation6 + $0x158] sm:$0xff]  }
 0x168   : > { %v1526_v51 = vmul.f32 %v1478_v54, %v1381_v8  ;;  %1121 = vst [vmem:[#allocation2 + $0x50] sm:$0xff] %v1099_v60  ;;  %v6241_v14 = vmul.f32 %v6144_v28, %v1099_v60  ;;  %v1528_v16 = vmul.f32 %v6127_v12, %v1099_v60  ;;  %v1005_v19 = vadd.f32 %v4749_v62, %v4685_v55 }
 0x169   : > { %5056 = vmatpush3.bf16.msra.mxu0 %v6079_v29  ;;  %v6245_v6 = vmax.f32 %v1084_v9, 0.0  ;;  %v4752_v31 = vadd.f32 %v4751_v21, %v4750_v11  ;;  %v1677_v37 = vpack.c.bf16 %v1099_v60, %v1098_v58  ;;  %v6249_v28 = vsel %vm1315_vm0, %v1317_v22, %v1319_v48 }
 0x16a   : > { %5057 = vmatprep.subr.bf16.mxu0 %v5261_v59  ;;  %v1563_v39 = vrot.slane %v1528_v16, 1  ;;  %v1062_v32 = vmul.f32 %v6124_v10, %v1005_v19  ;;  %v1560_v54 = vrot.slane %v1526_v51, 1  ;;  %v1321_v45 = vrot.slane %v6241_v14, 7 }
 0x16b   : > { %1122 = vst [vmem:[#allocation2 + $0x68] sm:$0xff] %v6245_v6  ;;  %v6254_v12 = vmul.f32 %v6166_v42, %v6245_v6  ;;  %v6258_v29 = vmul.f32 %v6134_v23, %v6245_v6  ;;  %v1008_v58 = vadd.f32 %v4752_v31, %v4688_v25  ;;  %v4689_v44 = vpop.f32.mrb[12].mxu0  ;;  %1929 = vmatprep.mubr.bf16.mxu0 %v1677_v37 }
 0x16c   : > { %v6264_v22 = vsel %vm1232_vm1, %v1250_v27, %v1252_v7  ;;  %v1085_v46 = vadd.f32 %v6141_v26, %v1062_v32  ;;  %v4753_v24 = vpop.f32.mrb[12].mxu1  ;;  %v4690_v55 = vpop.f32.mrb[13].mxu0  ;;  %v6268_v42 = vsel %vm1232_vm1, %v1560_v54, %v1561_v4  ;;  %v6271_v23 = vsel %vm1232_vm1, %v1561_v4, %v1563_v39  ;;  %v5260_v32 = vld [vmem:[#allocation6 + $0xc0] sm:$0xff]  }
 0x16d   : > { %5058 = vmatpush3.bf16.msra.mxu0 %v5261_v59  ;;  %v1565_v56 = vrot.slane %v6258_v29, 1  ;;  %v1063_v47 = vmul.f32 %v6124_v10, %v1008_v58  ;;  %v4691_v60 = vadd.f32 %v4690_v55, %v4689_v44  ;;  %v4754_v62 = vpop.f32.mrb[13].mxu1  ;;  %v1675_v27 = vpack.c.bf16 %v6268_v42, %v6189_v15  ;;  %1610 = vst [vmem:[#allocation2 + $0x40] sm:$0xff] %v6271_v23  ;;  %v4692_v11 = vpop.f32.mrb[14].mxu0  ;;  %v5262_v29 = vld [vmem:[#allocation6 + $0x108] sm:$0xff]  }
 0x16e   : > { %5059 = vmatprep.subr.bf16.mxu0 %v5264_v34  ;;  %v1101_v8 = vmax.f32 %v1085_v46, 0.0  ;;  %v4755_v9 = vadd.f32 %v4754_v62, %v4753_v24  ;;  %v6279_v13 = vsel %vm1315_vm0, %v1319_v48, %v1321_v45  ;;  %v1323_v59 = vrot.slane %v6254_v12, 7  ;;  %v4756_v51 = vpop.f32.mrb[14].mxu1  ;;  %v4693_v14 = vpop.f32.mrb[15].mxu0 }
 0x16f   : > { %v1086_v4 = vadd.f32 %v6141_v26, %v1063_v47  ;;  %5039 = vmatprep.mubr.bf16.mxu1 %v1675_v27  ;;  %v6285_v15 = vpack.c.bf16 %v6279_v13, %v6249_v28  ;;  %v6288_v16 = vsel %vm1232_vm1, %v1563_v39, %v1565_v56  ;;  %v4694_v31 = vadd.f32 %v4693_v14, %v4692_v11  ;;  %v4757_v37 = vpop.f32.mrb[15].mxu1  ;;  %v6309_v55 = vpop.permute.xlu1 %1214 }
 0x170   : > { %1123 = vst [vmem:[#allocation2 + $0x80] sm:$0xff] %v1101_v8  ;;  %v6293_v48 = vmul.f32 %v6169_v43, %v1101_v8  ;;  %v1530_v21 = vmul.f32 %v6147_v30, %v1101_v8  ;;  %v1013_v25 = vadd.f32 %v4755_v9, %v4691_v60  ;;  %1611 = vst [vmem:[#allocation2 + $0x58] sm:$0xff] %v6288_v16  ;;  %v5270_v30 = vld [vmem:[#allocation6 + $0x160] sm:$0xff]   ;;  %v1254_v62 = vrot.slane %v6309_v55, 1 }
 0x171   : > { %5060 = vmatpush3.bf16.msra.mxu0 %v5264_v34  ;;  %v6297_v54 = vmax.f32 %v1086_v4, 0.0  ;;  %v4758_v39 = vadd.f32 %v4757_v37, %v4756_v51  ;;  %v1680_v12 = vpack.c.bf16 %v1101_v8, %v6245_v6  ;;  %v1678_v43 = vpack.c.bf16 %v6288_v16, %v6271_v23  ;;  %v5263_v4 = vld [vmem:[#allocation6 + $0xc8] sm:$0xff]  }
 0x172   : > { %1930 = vmatmul.mubr.bf16.gmra.mrb[36].mxu0 %v6285_v15  ;;  %5061 = vmatprep.subr.bf16.mxu0 %v5267_v1  ;;  %v1064_v58 = vmul.f32 %v6124_v10, %v1013_v25  ;;  %v6305_v44 = vsel %vm1315_vm0, %v1321_v45, %v1323_v59  ;;  %v1325_v34 = vrot.slane %v6293_v48, 7  ;;  %v1567_v46 = vrot.slane %v1530_v21, 1 }
 0x173   : > { %1124 = vst [vmem:[#allocation2 + $0x98] sm:$0xff] %v6297_v54  ;;  %v6314_v6 = vmul.f32 %v6197_v20, %v6297_v54  ;;  %v6318_v47 = vmul.f32 %v6154_v35, %v6297_v54  ;;  %v1016_v60 = vadd.f32 %v4758_v39, %v4694_v31  ;;  %v4695_v45 = vpop.f32.mrb[16].mxu0  ;;  %1937 = vmatprep.mubr.bf16.mxu0 %v1680_v12 }
 0x174   : > { %5040 = vmatmul.mubr.bf16.vlgmr.msra.gmra.mrb[32].mxu1 %v1678_v43  ;;  %v1087_v27 = vadd.f32 %v6141_v26, %v1064_v58  ;;  %v4759_v8 = vpop.f32.mrb[16].mxu1  ;;  %v4696_v9 = vpop.f32.mrb[17].mxu0  ;;  %v6323_v11 = vsel %vm1315_vm0, %v1323_v59, %v1325_v34  ;;  %v6326_v20 = vsel %vm1232_vm1, %v1565_v56, %v1567_v46  ;;  %v5265_v59 = vld [vmem:[#allocation6 + $0x110] sm:$0xff]  }
 0x175   : > { %4864 = vmatpush3.bf16.msra.mxu1 %v5260_v32  ;;  %5062 = vmatpush3.bf16.msra.mxu0 %v5267_v1  ;;  %v1065_v35 = vmul.f32 %v6124_v10, %v1016_v60  ;;  %v4697_v51 = vadd.f32 %v4696_v9, %v4695_v45  ;;  %v4760_v14 = vpop.f32.mrb[17].mxu1  ;;  %v4698_v48 = vpop.f32.mrb[18].mxu0  ;;  %v6331_v21 = vpack.c.bf16 %v6323_v11, %v6305_v44  ;;  %v1569_v25 = vrot.slane %v6318_v47, 1 }
 0x176   : > { %4865 = vmatprep.subr.bf16.mxu1 %v5262_v29  ;;  %5063 = vmatprep.subr.bf16.mxu0 %v5270_v30  ;;  %v1103_v31 = vmax.f32 %v1087_v27, 0.0  ;;  %v4761_v56 = vadd.f32 %v4760_v14, %v4759_v8  ;;  %v4762_v37 = vpop.f32.mrb[18].mxu1  ;;  %v4699_v32 = vpop.f32.mrb[19].mxu0  ;;  %v1327_v1 = vrot.slane %v6314_v6, 7  ;;  %v5266_v8 = vld [vmem:[#allocation6 + $0xd0] sm:$0xff]  }
 0x177   : > { %v1088_v12 = vadd.f32 %v6141_v26, %v1065_v35  ;;  %v4700_v43 = vadd.f32 %v4699_v32, %v4698_v48  ;;  %v4763_v58 = vpop.f32.mrb[19].mxu1  ;;  %v6339_v60 = vsel %vm1232_vm1, %v1567_v46, %v1569_v25 }
 0x178   : > { %1125 = vst [vmem:[#allocation2 + $0xb0] sm:$0xff] %v1103_v31  ;;  %v1288_v47 = vmul.f32 %v6208_v18, %v1103_v31  ;;  %v1532_v45 = vmul.f32 %v6157_v36, %v1103_v31  ;;  %v1021_v27 = vadd.f32 %v4761_v56, %v4697_v51  ;;  %v4764_v6 = vadd.f32 %v4763_v58, %v4762_v37  ;;  %v5268_v18 = vld [vmem:[#allocation6 + $0x118] sm:$0xff]   ;;  %v5273_v36 = vld [vmem:[#allocation6 + $0x168] sm:$0xff]  }
 0x179   : > { %4866 = vmatpush3.bf16.msra.mxu1 %v5263_v4  ;;  %v6345_v9 = vmax.f32 %v1088_v12, 0.0  ;;  %v1683_v35 = vpack.c.bf16 %v1103_v31, %v6297_v54  ;;  %v6351_v46 = vpack.c.bf16 %v6339_v60, %v6326_v20  ;;  %v6354_v14 = vsel %vm1315_vm0, %v1325_v34, %v1327_v1  ;;  %5064 = vmatpush3.bf16.msra.mxu0 %v5270_v30  ;;  %v5276_v31 = vld [vmem:[#allocation6 + $0x170] sm:$0xff]  }
 0x17a   : > { %1938 = vmatmul.mubr.bf16.gmra.mrb[40].mxu0 %v6331_v21  ;;  %4867 = vmatprep.subr.bf16.mxu1 %v5265_v59  ;;  %v1066_v51 = vmul.f32 %v6124_v10, %v1021_v27  ;;  %v1024_v4 = vadd.f32 %v4764_v6, %v4700_v43  ;;  %v1329_v48 = vrot.slane %v1288_v47, 7  ;;  %v1571_v56 = vrot.slane %v1532_v45, 1 }
 0x17b   : > { %v6363_v54 = vsel %vm1232_vm1, %v1252_v7, %v1254_v62  ;;  %1126 = vst [vmem:[#allocation2 + $0xc8] sm:$0xff] %v6345_v9  ;;  %v6368_v34 = vmul.f32 %v6228_v61, %v6345_v9  ;;  %v6372_v59 = vmul.f32 %v6163_v41, %v6345_v9  ;;  %v4701_v30 = vpop.f32.mrb[20].mxu0  ;;  %1945 = vmatprep.mubr.bf16.mxu0 %v1683_v35  ;;  %v5269_v41 = vld [vmem:[#allocation6 + $0xd8] sm:$0xff]  }
 0x17c   : > { %5043 = vmatprep.mubr.bf16.mxu1 %v6351_v46  ;;  %v1089_v53 = vadd.f32 %v6141_v26, %v1066_v51  ;;  %v1067_v7 = vmul.f32 %v6124_v10, %v1024_v4  ;;  %v4765_v32 = vpop.f32.mrb[20].mxu1  ;;  %v4702_v12 = vpop.f32.mrb[21].mxu0  ;;  %v6378_v43 = vsel %vm1315_vm0, %v1327_v1, %v1329_v48  ;;  %v6381_v61 = vsel %vm1232_vm1, %v1569_v25, %v1571_v56  ;;  %v5271_v51 = vld [vmem:[#allocation6 + $0x120] sm:$0xff]  }
 0x17d   : > { %4868 = vmatpush3.bf16.msra.mxu1 %v5266_v8  ;;  %v4703_v58 = vadd.f32 %v4702_v12, %v4701_v30  ;;  %v4766_v47 = vpop.f32.mrb[21].mxu1  ;;  %v4704_v45 = vpop.f32.mrb[22].mxu0  ;;  %v6385_v27 = vpack.c.bf16 %v6378_v43, %v6354_v14  ;;  %v1573_v6 = vrot.slane %v6372_v59, 1  ;;  %v1331_v35 = vrot.slane %v6368_v34, 7  ;;  %5065 = vmatprep.subr.bf16.mxu0 %v5273_v36 }
 0x17e   : > { %4869 = vmatprep.subr.bf16.mxu1 %v5268_v18  ;;  %v1105_v1 = vmax.f32 %v1089_v53, 0.0  ;;  %v1090_v25 = vadd.f32 %v6141_v26, %v1067_v7  ;;  %v4767_v4 = vadd.f32 %v4766_v47, %v4765_v32  ;;  %v4768_v8 = vpop.f32.mrb[22].mxu1  ;;  %v4705_v0 = vpop.f32.mrb[23].mxu0  ;;  %5066 = vmatpush3.bf16.msra.mxu0 %v5273_v36  ;;  %v5279_v47 = vld [vmem:[#allocation6 + $0x178] sm:$0xff]  }
 0x17f   : > { %v4706_v12 = vadd.f32 %v4705_v0, %v4704_v45  ;;  %v4769_v29 = vpop.f32.mrb[23].mxu1  ;;  %v6395_v39 = vsel %vm1232_vm1, %v1571_v56, %v1573_v6  ;;  %v6398_v18 = vsel %vm1315_vm0, %v1329_v48, %v1331_v35  ;;  %5067 = vmatprep.subr.bf16.mxu0 %v5276_v31  ;;  %v6402_v53 = vpop.permute.xlu1 %1222  ;;  %v5272_v56 = vld [vmem:[#allocation6 + $0xe0] sm:$0xff]  }
 0x180   : > { %1127 = vst [vmem:[#allocation2 + $0xe0] sm:$0xff] %v1105_v1  ;;  %v1290_v36 = vmul.f32 %v6234_v5, %v1105_v1  ;;  %v1534_v0 = vmul.f32 %v6173_v49, %v1105_v1  ;;  %v6406_v7 = vmax.f32 %v1090_v25, 0.0  ;;  %v1029_v32 = vadd.f32 %v4767_v4, %v4703_v58  ;;  %v5274_v5 = vld [vmem:[#allocation6 + $0x128] sm:$0xff]   ;;  %v1219_v49 = vpop.permute.xlu0 %1218 }
 0x181   : > { %4870 = vmatpush3.bf16.msra.mxu1 %v5269_v41  ;;  %v1258_v48 = vrot.slane %v6402_v53, 1  ;;  %v4770_v45 = vadd.f32 %v4769_v29, %v4768_v8  ;;  %v1686_v34 = vpack.c.bf16 %v1105_v1, %v6345_v9  ;;  %v6413_v30 = vpack.c.bf16 %v6395_v39, %v6381_v61  ;;  %v5282_v8 = vld [vmem:[#allocation6 + $0x1c0] sm:$0xff]  }
 0x182   : > { %1946 = vmatmul.mubr.bf16.gmra.mrb[44].mxu0 %v6385_v27  ;;  %4871 = vmatprep.subr.bf16.mxu1 %v5271_v51  ;;  %1128 = vst [vmem:[#allocation2 + $0xf8] sm:$0xff] %v6406_v7  ;;  %v6418_v41 = vmul.f32 %v6264_v22, %v6406_v7  ;;  %v6422_v29 = vmul.f32 %v6178_v57, %v6406_v7  ;;  %v1333_v9 = vrot.slane %v1290_v36, 7  ;;  %v1256_v1 = vrot.slane %v1219_v49, 1 }
 0x183   : > { %v1068_v58 = vmul.f32 %v6124_v10, %v1029_v32  ;;  %5068 = vmatpush3.bf16.msra.mxu0 %v5276_v31  ;;  %v1032_v25 = vadd.f32 %v4770_v45, %v4706_v12  ;;  %v4707_v4 = vpop.f32.mrb[24].mxu0  ;;  %1953 = vmatprep.mubr.bf16.mxu0 %v1686_v34  ;;  %v1575_v51 = vrot.slane %v1534_v0, 1  ;;  %v5275_v34 = vld [vmem:[#allocation6 + $0xe8] sm:$0xff]  }
 0x184   : > { %5044 = vmatmul.mubr.bf16.gmra.mrb[36].mxu1 %v6413_v30  ;;  %v4771_v24 = vpop.f32.mrb[24].mxu1  ;;  %v4708_v57 = vpop.f32.mrb[25].mxu0  ;;  %v6430_v52 = vsel %vm1315_vm0, %v1331_v35, %v1333_v9  ;;  %v1577_v31 = vrot.slane %v6422_v29, 1  ;;  %v1335_v12 = vrot.slane %v6418_v41, 7  ;;  %5069 = vmatprep.subr.bf16.mxu0 %v5279_v47 }
 0x185   : > { %v1091_v19 = vadd.f32 %v6141_v26, %v1068_v58  ;;  %4872 = vmatpush3.bf16.msra.mxu1 %v5272_v56  ;;  %v1069_v36 = vmul.f32 %v6124_v10, %v1032_v25  ;;  %v4709_v0 = vadd.f32 %v4708_v57, %v4707_v4  ;;  %v4772_v32 = vpop.f32.mrb[25].mxu1  ;;  %v4710_v45 = vpop.f32.mrb[26].mxu0  ;;  %v6437_v49 = vpack.c.bf16 %v6430_v52, %v6398_v18  ;;  %v5277_v4 = vld [vmem:[#allocation6 + $0x130] sm:$0xff]  }
 0x186   : > { %v6442_v35 = vsel %vm1232_vm1, %v1573_v6, %v1575_v51  ;;  %4873 = vmatprep.subr.bf16.mxu1 %v5274_v5  ;;  %v4773_v41 = vadd.f32 %v4772_v32, %v4771_v24  ;;  %v4774_v56 = vpop.f32.mrb[26].mxu1  ;;  %v4711_v58 = vpop.f32.mrb[27].mxu0  ;;  %v6445_v22 = vsel %vm1232_vm1, %v1575_v51, %v1577_v31  ;;  %v6448_v25 = vsel %vm1315_vm0, %v1333_v9, %v1335_v12 }
 0x187   : > { %v1107_v29 = vmax.f32 %v1091_v19, 0.0  ;;  %5070 = vmatpush3.bf16.msra.mxu0 %v5279_v47  ;;  %v1092_v57 = vadd.f32 %v6141_v26, %v1069_v36  ;;  %v4712_v37 = vadd.f32 %v4711_v58, %v4710_v45  ;;  %v4775_v59 = vpop.f32.mrb[27].mxu1  ;;  %v6453_v6 = vpack.c.bf16 %v6445_v22, %v6442_v35  ;;  %v5278_v47 = vld [vmem:[#allocation6 + $0xf0] sm:$0xff]  }
 0x188   : > { %4943 = vmatprep.subr.bf16.mxu0 %v5282_v8  ;;  %v1037_v9 = vadd.f32 %v4773_v41, %v4709_v0  ;;  %v4776_v51 = vadd.f32 %v4775_v59, %v4774_v56  ;;  %v1257_v36 = vsel %vm1232_vm1, %v1254_v62, %v1256_v1  ;;  %v1259_v8 = vsel %vm1232_vm1, %v1256_v1, %v1258_v48  ;;  %v6470_v0 = vpop.permute.xlu0 %1226 }
 0x189   : > { %1129 = vst [vmem:[#allocation2 + $0x110] sm:$0xff] %v1107_v29  ;;  %v1292_v24 = vmul.f32 %v6363_v54, %v1107_v29  ;;  %v1536_v5 = vmul.f32 %v6182_v2, %v1107_v29  ;;  %4874 = vmatpush3.bf16.msra.mxu1 %v5275_v34  ;;  %v6465_v32 = vmax.f32 %v1092_v57, 0.0  ;;  %v1689_v54 = vpack.c.bf16 %v1107_v29, %v6406_v7  ;;  %v5280_v2 = vld [vmem:[#allocation6 + $0x138] sm:$0xff]  }
 0x18a   : > { %1954 = vmatmul.mubr.bf16.gmra.mrb[48].mxu0 %v6437_v49  ;;  %5047 = vmatprep.mubr.bf16.mxu1 %v6453_v6  ;;  %v1070_v34 = vmul.f32 %v6124_v10, %v1037_v9  ;;  %v1040_v55 = vadd.f32 %v4776_v51, %v4712_v37  ;;  %v7472_v41 = vrot.slane %v6470_v0, 1 }
 0x18b   : > { %v1337_v45 = vrot.slane %v1292_v24, 7  ;;  %v1579_v62 = vrot.slane %v1536_v5, 1  ;;  %4875 = vmatprep.subr.bf16.mxu1 %v5277_v4  ;;  %1130 = vst [vmem:[#allocation2 + $0x128] sm:$0xff] %v6465_v32  ;;  %v1293_v1 = vmul.f32 %v1257_v36, %v6465_v32  ;;  %v6478_v7 = vmul.f32 %v6193_v17, %v6465_v32  ;;  %v4713_v29 = vpop.f32.mrb[28].mxu0  ;;  %1961 = vmatprep.mubr.bf16.mxu0 %v1689_v54  ;;  %v5281_v17 = vld [vmem:[#allocation6 + $0xf8] sm:$0xff]  }
 0x18c   : > { %v1093_v37 = vadd.f32 %v6141_v26, %v1070_v34  ;;  %v1071_v58 = vmul.f32 %v6124_v10, %v1040_v55  ;;  %v4777_v4 = vpop.f32.mrb[28].mxu1  ;;  %v4714_v57 = vpop.f32.mrb[29].mxu0  ;;  %v6495_v55 = vld [vmem:[#allocation6 + $0x200] sm:$0xff]  }
 0x18d   : > { %v6485_v59 = vsel %vm1315_vm0, %v1335_v12, %v1337_v45  ;;  %v6488_v24 = vsel %vm1232_vm1, %v1577_v31, %v1579_v62  ;;  %4876 = vmatpush3.bf16.msra.mxu1 %v5278_v47  ;;  %v4715_v5 = vadd.f32 %v4714_v57, %v4713_v29  ;;  %v4778_v9 = vpop.f32.mrb[29].mxu1  ;;  %v4716_v51 = vpop.f32.mrb[30].mxu0  ;;  %v1581_v54 = vrot.slane %v6478_v7, 1 }
 0x18e   : > { %v6492_v36 = vpack.c.bf16 %v6485_v59, %v6448_v25  ;;  %v1339_v34 = vrot.slane %v1293_v1, 7  ;;  %4877 = vmatprep.subr.bf16.mxu1 %v5280_v2  ;;  %v6497_v12 = vmax.f32 %v1093_v37, 0.0  ;;  %v1094_v31 = vadd.f32 %v6141_v26, %v1071_v58  ;;  %v4780_v47 = vpop.f32.mrb[30].mxu1  ;;  %v4717_v19 = vpop.f32.mrb[31].mxu0 }
 0x18f   : > { %v4779_v56 = vadd.f32 %v4778_v9, %v4777_v4  ;;  %v1261_v7 = vsel %vm1232_vm1, %v1258_v48, %v7472_v41  ;;  %v4718_v1 = vadd.f32 %v4717_v19, %v4716_v51  ;;  %v4781_v2 = vpop.f32.mrb[31].mxu1  ;;  %v6508_v57 = vsel %vm1232_vm1, %v1579_v62, %v1581_v54  ;;  %v6513_v58 = vpop.permute.xlu1 %1230 }
 0x190   : > { %v6511_v37 = vsel %vm1315_vm0, %v1337_v45, %v1339_v34  ;;  %1131 = vst [vmem:[#allocation2 + $0x140] sm:$0xff] %v6497_v12  ;;  %v1294_v4 = vmul.f32 %v1259_v8, %v6497_v12  ;;  %v1538_v9 = vmul.f32 %v6211_v40, %v6497_v12  ;;  %v6519_v53 = vmax.f32 %v1094_v31, 0.0 }
 0x191   : > { %v1045_v48 = vadd.f32 %v4779_v56, %v4715_v5  ;;  %4878 = vmatpush3.bf16.msra.mxu1 %v5281_v17  ;;  %v1262_v19 = vrot.slane %v6513_v58, 1  ;;  %v4782_v62 = vadd.f32 %v4781_v2, %v4780_v47  ;;  %v1692_v45 = vpack.c.bf16 %v6497_v12, %v6465_v32  ;;  %v5289_v58 = vld [vmem:[#allocation6 + $0x208] sm:$0xff]  }
 0x192   : > { %1962 = vmatmul.mubr.bf16.gmra.mrb[52].mxu0 %v6492_v36  ;;  %v6527_v51 = vpack.c.bf16 %v6508_v57, %v6488_v24  ;;  %5087 = vmatprep.subr.bf16.mxu1 %v6495_v55  ;;  %1132 = vst [vmem:[#allocation2 + $0x158] sm:$0xff] %v6519_v53  ;;  %v1295_v40 = vmul.f32 %v1261_v7, %v6519_v53  ;;  %v1341_v17 = vrot.slane %v1294_v4, 7  ;;  %v7501_v5 = vrot.slane %v6150_v33, 7 }
 0x193   : > { %v1539_v8 = vmul.f32 %v6222_v63, %v6519_v53  ;;  %v1072_v56 = vmul.f32 %v6124_v10, %v1045_v48  ;;  %v7502_v31 = vrot.slane %v6117_v3, 7  ;;  %v1048_v2 = vadd.f32 %v4782_v62, %v4718_v1  ;;  %1969 = vmatprep.mubr.bf16.mxu0 %v1692_v45 }
 0x194   : > { %5048 = vmatmul.mubr.bf16.gmra.mrb[40].mxu1 %v6527_v51  ;;  %v1583_v29 = vrot.slane %v1538_v9, 1  ;;  %v6545_v63 = vsel %vm1315_vm0, %v1339_v34, %v1341_v17  ;;  %v1343_v48 = vrot.slane %v1295_v40, 7  ;;  %v7503_v3 = vrot.slane %v6470_v0, 1 }
 0x195   : > { %v1506_v47 = vsel %vm1315_vm0, %v7502_v31, %v7501_v5  ;;  %v1095_v41 = vadd.f32 %v6141_v26, %v1072_v56  ;;  %v1585_v4 = vrot.slane %v1539_v8, 1  ;;  %v1073_v62 = vmul.f32 %v6124_v10, %v1048_v2  ;;  %v1397_v56 = vld [vmem:[#allocation2 + $0x1a0] sm:$0x1] }
 0x196   : > { %v1263_v1 = vsel %vm1232_vm1, %v7503_v3, %v1262_v19  ;;  %v6555_v9 = vpack.c.bf16 %v6545_v63, %v6511_v37  ;;  %v6558_v45 = vsel %vm1232_vm1, %v1581_v54, %v1583_v29  ;;  %v6566_v8 = vsel %vm1315_vm0, %v1341_v17, %v1343_v48 }
 0x197   : > { %v6560_v34 = vmax.f32 %v1095_v41, 0.0  ;;  %v6563_v40 = vsel %vm1232_vm1, %v1583_v29, %v1585_v4  ;;  %v1096_v10 = vadd.f32 %v6141_v26, %v1073_v62  ;;  %v7504_v2 = vrot.slane %v6160_v38, 7 }
 0x198   : > { %v6573_v5 = vpack.c.bf16 %v6563_v40, %v6558_v45 }
 0x199   : > { %v1296_v29 = vmul.f32 %v1263_v1, %v6560_v34  ;;  %v1540_v17 = vmul.f32 %v1506_v47, %v6560_v34  ;;  %v1695_v31 = vpack.c.bf16 %v6560_v34, %v6519_v53  ;;  %v1542_v26 = vmul.f32 %v7504_v2, %v1397_v56 }
 0x19a   : > { %v6585_v3 = vmax.f32 %v1096_v10, 0.0  ;;  %1970 = vmatmul.mubr.bf16.gmra.mrb[56].mxu0 %v6555_v9  ;;  %5051 = vmatprep.mubr.bf16.mxu1 %v6573_v5  ;;  %v7505_v41 = vmov %v7504_v2  ;;  %v7506_v1 = vrot.slane %v6150_v33, 7  ;;  %v5283_v10 = vld [vmem:[#allocation6 + $0x180] sm:$0xff]  }
 0x19b   : > { %1977 = vmatprep.mubr.bf16.mxu0 %v1695_v31  ;;  %v1345_v54 = vrot.slane %v1296_v29, 7  ;;  %v1587_v7 = vrot.slane %v1540_v17, 1  ;;  %v1591_v38 = vrot.slane %v1542_v26, 1  ;;  %v6612_v17 = vld [vmem:[#allocation2 + $0x38] sm:$0xff]  ;;  %v2196_v26 = vld [vmem:[#allocation2 + $0x20] sm:$0xff]  ;;  %v6634_v29 = vld [vmem:[#allocation2 + $0x68] sm:$0xff] }
 0x19c   : > { %v1508_v47 = vsel %vm1315_vm0, %v7506_v1, %v7505_v41  ;;  %1134 = vst [vmem:[#allocation2 + $0x188] sm:$0xff] %v6585_v3  ;;  %v5285_v1 = vld [vmem:[#allocation6 + $0x1c8] sm:$0xff]  }
 0x19d   : > { %v1541_v56 = vmul.f32 %v1508_v47, %v6585_v3  ;;  %v6601_v2 = vsel %vm1315_vm0, %v1343_v48, %v1345_v54  ;;  %v6604_v62 = vsel %vm1232_vm1, %v1585_v4, %v1587_v7  ;;  %v2244_v47 = vpack.c.bf16 %v6612_v17, %v2196_v26 }
 0x19e   : > { %v6608_v33 = vpack.c.bf16 %v6601_v2, %v6566_v8 }
 0x19f   : > { %v1589_v41 = vrot.slane %v1541_v56, 1 }
 0x1a1   : > { %v6615_v31 = vsel %vm1232_vm1, %v1587_v7, %v1589_v41  ;;  %v6618_v48 = vsel %vm1232_vm1, %v1589_v41, %v1591_v38  ;;  %v7507_v7 = vpack.c.bf16 %v6271_v23, %v6268_v42  ;;  %v7508_v42 = vpack.c.bf16 %v6326_v20, %v6288_v16  ;;  %v6644_v23 = vld [vmem:[#allocation2 + $0x50] sm:$0xff]  ;;  %v5294_v16 = vld [vmem:[#allocation6 + $0x210] sm:$0xff]  }
 0x1a2   : > { %v6622_v4 = vpack.c.bf16 %v6615_v31, %v6604_v62  ;;  %1978 = vmatmul.mubr.bf16.gmra.mrb[60].mxu0 %v6608_v33  ;;  %v5288_v20 = vld [vmem:[#allocation6 + $0x190] sm:$0xff]  }
 0x1a3   : > { %v1151_v56 = vld [vmem:[#allocation2 + $0x188] sm:$0x7f]  ;;  %5071 = vmatprep.mubr.bf16.mxu0 %v7507_v7  ;;  %v5287_v7 = vld [vmem:[#allocation6 + $0x1d0] sm:$0xff]  }
 0x1a4   : > { %5052 = vmatmul.mubr.bf16.gmra.mrb[44].mxu1 %v6622_v4  ;;  %v1297_v38 = vmul.f32 %v1262_v19, %v1151_v56  ;;  %v7509_v19 = vpack.c.bf16 %v6381_v61, %v6339_v60  ;;  %v7510_v56 = vpack.c.bf16 %v6249_v28, %v6217_v50  ;;  %v6655_v60 = vld [vmem:[#allocation2 + $0x98] sm:$0xff]  ;;  %v5290_v61 = vld [vmem:[#allocation6 + $0x1d8] sm:$0xff]   ;;  %v2208_v50 = vld [vmem:[#allocation2 + $0x80] sm:$0xff] }
 0x1a5   : > { %2491 = vmatprep.mubr.bf16.mxu1 %v2244_v47  ;;  %v2247_v47 = vpack.c.bf16 %v6634_v29, %v6644_v23  ;;  %v5299_v28 = vld [vmem:[#allocation6 + $0x218] sm:$0xff]  }
 0x1a6   : > { %v1347_v41 = vrot.slane %v1297_v38, 7  ;;  %v5291_v38 = vld [vmem:[#allocation6 + $0x198] sm:$0xff]  }
 0x1a8   : > { %v6637_v0 = vsel %vm1315_vm0, %v1345_v54, %v1347_v41  ;;  %v5286_v54 = vld [vmem:[#allocation6 + $0x188] sm:$0xff]   ;;  %v7513_v41 = vpack.c.bf16 %v6305_v44, %v6279_v13  ;;  %v7515_v44 = vpack.c.bf16 %v6604_v62, %v6563_v40  ;;  %v2718_v40 = vpack.c.bf16 %v6644_v23, %v6612_v17  ;;  %v2226_v17 = vld [vmem:[#allocation2 + $0x110] sm:$0xff] }
 0x1a9   : > { %v2264_v26 = vpack.c.bf16 %v6637_v0, %v6601_v2  ;;  %v5303_v13 = vld [vmem:[#allocation6 + $0x228] sm:$0xff]   ;;  %v7517_v62 = vpack.c.bf16 %v6618_v48, %v6615_v31  ;;  %v2721_v31 = vpack.c.bf16 %v2208_v50, %v6634_v29  ;;  %v2259_v23 = vpack.c.bf16 %v6465_v32, %v2226_v17 }
 0x1aa   : > { %5072 = vmatmul.mubr.bf16.vlgmr.msra.gmra.mrb[64].mxu0 %v7508_v42  ;;  %v5292_v42 = vld [vmem:[#allocation6 + $0x1e0] sm:$0xff]  }
 0x1ab   : > { %5075 = vmatprep.mubr.bf16.mxu0 %v7509_v19  ;;  %4944 = vmatpush3.bf16.msra.mxu0 %v5283_v10  ;;  %v7511_v10 = vpack.c.bf16 %v6442_v35, %v6395_v39  ;;  %v5302_v39 = vld [vmem:[#allocation6 + $0x220] sm:$0xff]  }
 0x1ac   : > { %2492 = vmatmul.mubr.bf16.vlgmr.msra.gmra.mrb[48].mxu1 %v7510_v56  ;;  %4945 = vmatprep.subr.bf16.mxu0 %v5285_v1  ;;  %v2250_v1 = vpack.c.bf16 %v6655_v60, %v2208_v50  ;;  %v5293_v35 = vld [vmem:[#allocation6 + $0x1a0] sm:$0xff]   ;;  %v7516_v56 = vpack.c.bf16 %v6354_v14, %v6323_v11  ;;  %v2220_v11 = vld [vmem:[#allocation2 + $0xe0] sm:$0xff]  ;;  %v5305_v14 = vld [vmem:[#allocation6 + $0x238] sm:$0xff]  }
 0x1ad   : > { %5088 = vmatpush3.bf16.msra.mxu1 %v6495_v55  ;;  %2499 = vmatprep.mubr.bf16.mxu1 %v2247_v47  ;;  %v7512_v55 = vpack.c.bf16 %v6488_v24, %v6445_v22  ;;  %v5295_v22 = vld [vmem:[#allocation6 + $0x1e8] sm:$0xff]   ;;  %v7514_v24 = vpack.c.bf16 %v6558_v45, %v6508_v57  ;;  %v2214_v19 = vld [vmem:[#allocation2 + $0xb0] sm:$0xff]  ;;  %v5304_v57 = vld [vmem:[#allocation6 + $0x230] sm:$0xff]  }
 0x1ae   : > { %5089 = vmatprep.subr.bf16.mxu1 %v5289_v58  ;;  %v5298_v45 = vld [vmem:[#allocation6 + $0x1b0] sm:$0xff]  }
 0x1af   : > { %4946 = vmatpush3.bf16.msra.mxu0 %v5286_v54  ;;  %v5296_v54 = vld [vmem:[#allocation6 + $0x1a8] sm:$0xff]   ;;  %v5318_v50 = vld [vmem:[%s7457_s11 + $0x40] ss:$16 sps:$4 sm:$0xff]  }
 0x1b0   : > { %4947 = vmatprep.subr.bf16.mxu0 %v5287_v7  ;;  %v5297_v7 = vld [vmem:[#allocation6 + $0x1f0] sm:$0xff]  }
 0x1b1   : > { %5090 = vmatpush3.bf16.msra.mxu1 %v5289_v58  ;;  %v2217_v58 = vld [vmem:[#allocation2 + $0xc8] sm:$0xff] }
 0x1b2   : > { %5076 = vmatmul.mubr.bf16.gmra.mrb[68].mxu0 %v7511_v10  ;;  %5091 = vmatprep.subr.bf16.mxu1 %v5294_v16  ;;  %v2253_v47 = vpack.c.bf16 %v2217_v58, %v2214_v19  ;;  %v5301_v10 = vld [vmem:[#allocation6 + $0x1b8] sm:$0xff]   ;;  %v2727_v29 = vpack.c.bf16 %v2220_v11, %v2217_v58  ;;  %v5324_v58 = vld [vmem:[%s7457_s11 + $0x60] ss:$16 sps:$4 sm:$0xff]  }
 0x1b3   : > { %5079 = vmatprep.mubr.bf16.mxu0 %v7512_v55  ;;  %4948 = vmatpush3.bf16.msra.mxu0 %v5288_v20  ;;  %v5300_v20 = vld [vmem:[#allocation6 + $0x1f8] sm:$0xff]   ;;  %v7519_v55 = vpack.c.bf16 %v6448_v25, %v6430_v52  ;;  %v7522_v52 = vpack.c.bf16 %v6566_v8, %v6545_v63  ;;  %v2674_v25 = vld [vmem:[#allocation2 + $0x58] sm:$0xff] }
 0x1b4   : > { %2500 = vmatmul.mubr.bf16.gmra.mrb[52].mxu1 %v7513_v41  ;;  %4949 = vmatprep.subr.bf16.mxu0 %v5290_v61  ;;  %v2706_v63 = vld [vmem:[#allocation2 + $0x158] sm:$0xff]  ;;  %v5355_v8 = vld [vmem:[#allocation2 + $0x8] sm:$0xff] }
 0x1b5   : > { %2507 = vmatprep.mubr.bf16.mxu1 %v2250_v1  ;;  %5092 = vmatpush3.bf16.msra.mxu1 %v5294_v16  ;;  %v2223_v16 = vld [vmem:[#allocation2 + $0xf8] sm:$0xff]  ;;  %v2739_v2 = vpack.c.bf16 %v5355_v8, %v6585_v3  ;;  %v5320_v1 = vld [vmem:[%s7457_s11 + $0x44] ss:$16 sps:$4 sm:$0xff]  }
 0x1b6   : > { %5093 = vmatprep.subr.bf16.mxu1 %v5299_v28  ;;  %v2256_v61 = vpack.c.bf16 %v2223_v16, %v2220_v11  ;;  %v2730_v32 = vpack.c.bf16 %v2226_v17, %v2223_v16  ;;  %v6769_v41 = vld [vmem:[%s7457_s11 + $0x48] ss:$16 sps:$4 sm:$0xff]  }
 0x1b7   : > { %4950 = vmatpush3.bf16.msra.mxu0 %v5291_v38 }
 0x1b8   : > { %4951 = vmatprep.subr.bf16.mxu0 %v5292_v42  ;;  %v6774_v42 = vld [vmem:[%s7457_s11 + $0x4c] ss:$16 sps:$4 sm:$0xff]  }
 0x1b9   : > { %5094 = vmatpush3.bf16.msra.mxu1 %v5299_v28  ;;  %v7518_v28 = vpack.c.bf16 %v6398_v18, %v6378_v43  ;;  %v2724_v43 = vpack.c.bf16 %v2214_v19, %v6655_v60  ;;  %v7520_v18 = vpack.c.bf16 %v6511_v37, %v6485_v59  ;;  %v2671_v59 = vld [vmem:[#allocation2 + $0x40] sm:$0xff]  ;;  %v2700_v37 = vld [vmem:[#allocation2 + $0x128] sm:$0xff] }
 0x1ba   : > { %5080 = vmatmul.mubr.bf16.gmra.mrb[72].mxu0 %v7514_v24  ;;  %5095 = vmatprep.subr.bf16.mxu1 %v5302_v39  ;;  %v6792_v24 = vld [vmem:[%s7457_s11 + $0x68] ss:$16 sps:$4 sm:$0xff]  }
 0x1bb   : > { %5083 = vmatprep.mubr.bf16.mxu0 %v7515_v44  ;;  %4952 = vmatpush3.bf16.msra.mxu0 %v5293_v35  ;;  %v5326_v35 = vld [vmem:[%s7457_s11 + $0x64] ss:$16 sps:$4 sm:$0xff]   ;;  %7526 = vst [vmem:[#allocation16_spill] sm:$0xff] %v6792_v24 }
 0x1bc   : > { %2508 = vmatmul.mubr.bf16.gmra.mrb[56].mxu1 %v7516_v56  ;;  %4953 = vmatprep.subr.bf16.mxu0 %v5295_v22  ;;  %v6786_v22 = vld [vmem:[%s7457_s11 + $0x6c] ss:$16 sps:$4 sm:$0xff]  }
 0x1bd   : > { %2515 = vmatprep.mubr.bf16.mxu1 %v2253_v47  ;;  %5096 = vmatpush3.bf16.msra.mxu1 %v5302_v39  ;;  %7525 = vst [vmem:[#allocation15_spill] sm:$0xff] %v6786_v22 }
 0x1be   : > { %5097 = vmatprep.subr.bf16.mxu1 %v5303_v13 }
 0x1bf   : > { %4954 = vmatpush3.bf16.msra.mxu0 %v5296_v54 }
 0x1c0   : > { %4955 = vmatprep.subr.bf16.mxu0 %v5297_v7 }
 0x1c1   : > { %5098 = vmatpush3.bf16.msra.mxu1 %v5303_v13 }
 0x1c2   : > { %5084 = vmatmul.mubr.bf16.gmra.mrb[76].mxu0 %v7517_v62  ;;  %5099 = vmatprep.subr.bf16.mxu1 %v5304_v57 }
 0x1c3   : > { %4956 = vmatpush3.bf16.msra.mxu0 %v5298_v45  ;;  %2965 = vmatprep.mubr.bf16.mxu0 %v2718_v40 }
 0x1c4   : > { %2516 = vmatmul.mubr.bf16.gmra.mrb[60].mxu1 %v7518_v28  ;;  %4957 = vmatprep.subr.bf16.mxu0 %v5300_v20  ;;  %v6818_v28 = vld [vmem:[%s7457_s11 + $0x8c] ss:$16 sps:$4 sm:$0xff]  }
 0x1c5   : > { %2523 = vmatprep.mubr.bf16.mxu1 %v2256_v61  ;;  %5100 = vmatpush3.bf16.msra.mxu1 %v5304_v57  ;;  %v5332_v61 = vld [vmem:[%s7457_s11 + $0x84] ss:$16 sps:$4 sm:$0xff]   ;;  %7528 = vst [vmem:[#allocation18_spill] sm:$0xff] %v6818_v28 }
 0x1c6   : > { %5101 = vmatprep.subr.bf16.mxu1 %v5305_v14 }
 0x1c7   : > { %4958 = vmatpush3.bf16.msra.mxu0 %v5301_v10  ;;  %v6813_v10 = vld [vmem:[%s7457_s11 + $0x88] ss:$16 sps:$4 sm:$0xff]  }
 0x1c8   : > { %7527 = vst [vmem:[#allocation17_spill] sm:$0xff] %v6813_v10 }
 0x1c9   : > { %5102 = vmatpush3.bf16.msra.mxu1 %v5305_v14  ;;  %v5330_v14 = vld [vmem:[%s7457_s11 + $0x80] ss:$16 sps:$4 sm:$0xff]  }
 0x1ca   : > { %2966 = vmatmul.mubr.bf16.vlgmr.msra.gmra.mrb[80].mxu0 %v6285_v15  ;;  %v7521_v15 = vpack.c.bf16 %v6519_v53, %v6497_v12  ;;  %v2719_v12 = vpack.c.bf16 %v2674_v25, %v2671_v59  ;;  %v5344_v25 = vld [vmem:[%s7457_s11 + $0xc4] ss:$16 sps:$4 sm:$0xff]   ;;  %v6848_v59 = vld [vmem:[%s7457_s11 + $0xcc] ss:$16 sps:$4 sm:$0xff]  }
 0x1cb   : > { %2973 = vmatprep.mubr.bf16.mxu0 %v2721_v31  ;;  %7531 = vst [vmem:[#allocation21_spill] sm:$0xff] %v6848_v59 }
 0x1cc   : > { %2524 = vmatmul.mubr.bf16.gmra.mrb[64].mxu1 %v7519_v55 }
 0x1cd   : > { %2531 = vmatprep.mubr.bf16.mxu1 %v2259_v23 }
 0x1d2   : > { %2974 = vmatmul.mubr.bf16.gmra.mrb[84].mxu0 %v6331_v21  ;;  %v7523_v21 = vpack.c.bf16 %v6585_v3, %v6560_v34  ;;  %v6750_v3 = vld [vmem:[%s7457_s11 + $0x2c] ss:$16 sps:$4 sm:$0xff]  }
 0x1d3   : > { %2981 = vmatprep.mubr.bf16.mxu0 %v2724_v43  ;;  %v5336_v43 = vld [vmem:[%s7457_s11 + $0xa0] ss:$16 sps:$4 sm:$0xff]  }
 0x1d4   : > { %2532 = vmatmul.mubr.bf16.gmra.mrb[68].mxu1 %v7520_v18  ;;  %v5338_v18 = vld [vmem:[%s7457_s11 + $0xa4] ss:$16 sps:$4 sm:$0xff]  }
 0x1d5   : > { %2539 = vmatprep.mubr.bf16.mxu1 %v7521_v15 }
 0x1da   : > { %2982 = vmatmul.mubr.bf16.gmra.mrb[88].mxu0 %v6385_v27  ;;  %v2703_v27 = vld [vmem:[#allocation2 + $0x140] sm:$0xff] }
 0x1db   : > { %2989 = vmatprep.mubr.bf16.mxu0 %v2727_v29  ;;  %v2733_v53 = vpack.c.bf16 %v2703_v27, %v2700_v37  ;;  %v6831_v29 = vld [vmem:[%s7457_s11 + $0xa8] ss:$16 sps:$4 sm:$0xff]   ;;  %v5350_v27 = vld [vmem:[%s7457_s11 + $0xe4] ss:$16 sps:$4 sm:$0xff]   ;;  %v6859_v37 = vpop.permute.xlu1 %2106 }
 0x1dc   : > { %2540 = vmatmul.mubr.bf16.gmra.mrb[72].mxu1 %v7522_v52  ;;  %7529 = vst [vmem:[#allocation19_spill] sm:$0xff] %v6831_v29  ;;  %v6836_v52 = vld [vmem:[%s7457_s11 + $0xac] ss:$16 sps:$4 sm:$0xff]  }
 0x1dd   : > { %2547 = vmatprep.mubr.bf16.mxu1 %v7523_v21  ;;  %7530 = vst [vmem:[#allocation20_spill] sm:$0xff] %v6836_v52 }
 0x1e2   : > { %2990 = vmatmul.mubr.bf16.gmra.mrb[92].mxu0 %v6437_v49  ;;  %v2736_v49 = vpack.c.bf16 %v6560_v34, %v2706_v63  ;;  %v6738_v34 = vld [vmem:[%s7457_s11 + $0xc] ss:$16 sps:$4 sm:$0xff]  }
 0x1e3   : > { %2997 = vmatprep.mubr.bf16.mxu0 %v2730_v32  ;;  %3630 = vmatprep.subr.bf16.mxu0 %v6738_v34  ;;  %v5342_v32 = vld [vmem:[%s7457_s11 + $0xc0] ss:$16 sps:$4 sm:$0xff]  }
 0x1e4   : > { %2548 = vmatmul.mubr.bf16.gmra.mrb[76].mxu1 %v2264_v26 }
 0x1e5   : > { %5103 = vmatprep.mubr.bf16.mxu1 %v2719_v12  ;;  %v6854_v12 = vld [vmem:[%s7457_s11 + $0xc8] ss:$16 sps:$4 sm:$0xff]  }
 0x1e6   : > { %7532 = vst [vmem:[#allocation22_spill] sm:$0xff] %v6854_v12 }
 0x1ea   : > { %2998 = vmatmul.mubr.bf16.gmra.mrb[96].mxu0 %v6492_v36  ;;  %v7524_v36 = vmov 0  }
 0x1eb   : > { %3005 = vmatprep.mubr.bf16.mxu0 %v2733_v53  ;;  %v6865_v53 = vld [vmem:[%s7457_s11 + $0xec] ss:$16 sps:$4 sm:$0xff]  }
 0x1ec   : > { %5104 = vmatmul.mubr.bf16.vlgmr.msra.gmra.mrb[80].mxu1 %v6351_v46  ;;  %v2738_v46 = vpack.c.bf16 %v5355_v8, %v6637_v0  ;;  %v5314_v0 = vld [vmem:[%s7457_s11 + $0x24] ss:$16 sps:$4 sm:$0xff]   ;;  %7533 = vst [vmem:[#allocation23_spill] sm:$0xff] %v6865_v53 }
 0x1ed   : > { %5107 = vmatprep.mubr.bf16.mxu1 %v6413_v30  ;;  %v2740_v30 = vpack.c.bf16 %v5355_v8, %v6618_v48 }
 0x1f2   : > { %3006 = vmatmul.mubr.bf16.gmra.mrb[100].mxu0 %v6555_v9  ;;  %v6733_v9 = vld [vmem:[%s7457_s11 + $0x8] ss:$16 sps:$4 sm:$0xff]  }
 0x1f3   : > { %3013 = vmatprep.mubr.bf16.mxu0 %v2736_v49  ;;  %3631 = vmatpush1.bf16.msra.mxu0 %v6733_v9  ;;  %v6867_v49 = vpop.permute.xlu0 %2101 }
 0x1f4   : > { %5108 = vmatmul.mubr.bf16.gmra.mrb[84].mxu1 %v6453_v6  ;;  %v5306_v6 = vld [vmem:[%s7457_s11] ss:$16 sps:$4 sm:$0xff]   ;;  %3632 = vmatprep.subr.bf16.mxu0 %v6750_v3 }
 0x1f5   : > { %5111 = vmatprep.mubr.bf16.mxu1 %v6527_v51  ;;  %v5308_v51 = vld [vmem:[%s7457_s11 + $0x4] ss:$16 sps:$4 sm:$0xff]  }
 0x1f6   : > { %3517 = vmatprep.subr.bf16.mxu1 %v5308_v51  ;;  %v6876_v51 = vld [vmem:[%s7457_s11 + $0xe8] ss:$16 sps:$4 sm:$0xff]  }
 0x1f7   : > { %3518 = vmatpush1.bf16.msra.mxu1 %v5306_v6  ;;  %7534 = vst [vmem:[#allocation24_spill] sm:$0xff] %v6876_v51 }
 0x1f8   : > { %3519 = vmatprep.subr.bf16.mxu1 %v5314_v0 }
 0x1fa   : > { %3014 = vmatmul.mubr.bf16.gmra.mrb[104].mxu0 %v6608_v33  ;;  %v6756_v33 = vld [vmem:[%s7457_s11 + $0x28] ss:$16 sps:$4 sm:$0xff]  }
 0x1fb   : > { %3021 = vmatprep.mubr.bf16.mxu0 %v2739_v2  ;;  %3633 = vmatpush1.bf16.msra.mxu0 %v6756_v33  ;;  %v5348_v2 = vld [vmem:[%s7457_s11 + $0xe0] ss:$16 sps:$4 sm:$0xff]  }
 0x1fc   : > { %5112 = vmatmul.mubr.bf16.gmra.mrb[88].mxu1 %v6573_v5  ;;  %v5312_v5 = vld [vmem:[%s7457_s11 + $0x20] ss:$16 sps:$4 sm:$0xff]   ;;  %3634 = vmatprep.subr.bf16.mxu0 %v6774_v42 }
 0x1fd   : > { %5115 = vmatprep.mubr.bf16.mxu1 %v6622_v4  ;;  %3520 = vmatpush1.bf16.msra.mxu1 %v5312_v5 }
 0x1fe   : > { %3521 = vmatprep.subr.bf16.mxu1 %v5320_v1 }
 0x1ff   : > { %3635 = vmatpush1.bf16.msra.mxu0 %v6769_v41 }
 0x200   : > { %3636 = vmatprep.subr.bf16.mxu0 %v6786_v22 }
 0x201   : > { %3522 = vmatpush1.bf16.msra.mxu1 %v5318_v50  ;;  %v6883_v50 = vpop.permute.xlu1 %3150 }
 0x202   : > { %3022 = vmatmul.mubr.bf16.gmra.mrb[108].mxu0 %v2738_v46  ;;  %3523 = vmatprep.subr.bf16.mxu1 %v5326_v35  ;;  %v6891_v35 = vpop.permute.xlu0 %3145 }
 0x203   : > { %3662 = vmatprep.mubr.bf16.mxu0 %v7524_v36  ;;  %3637 = vmatpush1.bf16.msra.mxu0 %v6792_v24 }
 0x204   : > { %5116 = vmatmul.mubr.bf16.gmra.mrb[92].mxu1 %v2740_v30  ;;  %3638 = vmatprep.subr.bf16.mxu0 %v6818_v28 }
 0x205   : > { %3549 = vmatprep.mubr.bf16.mxu1 %v7524_v36  ;;  %3524 = vmatpush1.bf16.msra.mxu1 %v5324_v58 }
 0x206   : > { %3525 = vmatprep.subr.bf16.mxu1 %v5332_v61 }
 0x207   : > { %3639 = vmatpush1.bf16.msra.mxu0 %v6813_v10 }
 0x208   : > { %3640 = vmatprep.subr.bf16.mxu0 %v6836_v52 }
 0x209   : > { %3526 = vmatpush1.bf16.msra.mxu1 %v5330_v14 }
 0x20a   : > { %3527 = vmatprep.subr.bf16.mxu1 %v5338_v18 }
 0x20b   : > { %3641 = vmatpush1.bf16.msra.mxu0 %v6831_v29 }
 0x20c   : > { %3642 = vmatprep.subr.bf16.mxu0 %v6848_v59 }
 0x20d   : > { %3528 = vmatpush1.bf16.msra.mxu1 %v5336_v43 }
 0x20e   : > { %3529 = vmatprep.subr.bf16.mxu1 %v5344_v25 }
 0x20f   : > { %3643 = vmatpush1.bf16.msra.mxu0 %v6854_v12 }
 0x210   : > { %3644 = vmatprep.subr.bf16.mxu0 %v6865_v53 }
 0x211   : > { %3530 = vmatpush1.bf16.msra.mxu1 %v5342_v32 }
 0x212   : > { %3531 = vmatprep.subr.bf16.mxu1 %v5350_v27 }
 0x213   : > { %3645 = vmatpush1.bf16.msra.mxu0 %v6876_v51 }
 0x215   : > { %3532 = vmatpush1.bf16.msra.mxu1 %v5348_v2 }
 0x216   : > { %5119 = vmatprep.subr.bf16.mxu1 %v6738_v34 }
 0x23a   : > { %v4799_v48 = vpop.f32.mrb[32].mxu0 }
 0x23b   : > { %v4800_v4 = vpop.f32.mrb[33].mxu0 }
 0x23c   : > { %v4801_v26 = vadd.f32 %v4800_v4, %v4799_v48  ;;  %v4802_v60 = vpop.f32.mrb[34].mxu0 }
 0x23d   : > { %v4803_v38 = vpop.f32.mrb[35].mxu0 }
 0x23e   : > { %v4804_v39 = vadd.f32 %v4803_v38, %v4802_v60 }
 0x245   : > { %v4805_v19 = vpop.f32.mrb[36].mxu0 }
 0x246   : > { %v4806_v13 = vpop.f32.mrb[37].mxu0 }
 0x247   : > { %v4807_v44 = vadd.f32 %v4806_v13, %v4805_v19  ;;  %v4808_v47 = vpop.f32.mrb[38].mxu0  ;;  %v5041_v54 = vpop.f32.mrb[32].mxu1 }
 0x248   : > { %v4809_v56 = vpop.f32.mrb[39].mxu0  ;;  %v2020_v7 = vpop.f32.mrb[33].mxu1 }
 0x249   : > { %v6796_v57 = vadd.f32 %v5041_v54, %v4807_v44  ;;  %v4810_v45 = vadd.f32 %v4809_v56, %v4808_v47  ;;  %v6798_v16 = vadd.f32 %v4801_v26, %v2020_v7  ;;  %v5042_v20 = vpop.f32.mrb[34].mxu1  ;;  %v6893_v47 = vpop.permute.xlu1 %2116 }
 0x24a   : > { %v2023_v40 = vpop.f32.mrb[35].mxu1  ;;  %v6895_v7 = vpop.permute.xlu0 %2111 }
 0x24b   : > { %v6800_v62 = vadd.f32 %v5042_v20, %v4810_v45  ;;  %v6802_v11 = vadd.f32 %v4804_v39, %v2023_v40 }
 0x24d   : > { %v4811_v17 = vpop.f32.mrb[40].mxu0  ;;  %v6897_v20 = vpop.permute.xlu1 %3160 }
 0x24e   : > { %v4812_v31 = vpop.f32.mrb[41].mxu0 }
 0x24f   : > { %v4813_v23 = vadd.f32 %v4812_v31, %v4811_v17  ;;  %v4814_v55 = vpop.f32.mrb[42].mxu0 }
 0x250   : > { %v4815_v15 = vpop.f32.mrb[43].mxu0 }
 0x251   : > { %v4816_v21 = vadd.f32 %v4815_v15, %v4814_v55 }
 0x255   : > { %v4817_v63 = vpop.f32.mrb[44].mxu0 }
 0x256   : > { %v4818_v8 = vpop.f32.mrb[45].mxu0 }
 0x257   : > { %v4819_v46 = vadd.f32 %v4818_v8, %v4817_v63  ;;  %v4820_v30 = vpop.f32.mrb[46].mxu0  ;;  %v5045_v6 = vpop.f32.mrb[36].mxu1 }
 0x258   : > { %v4821_v0 = vpop.f32.mrb[47].mxu0  ;;  %v2036_v5 = vpop.f32.mrb[37].mxu1 }
 0x259   : > { %v6879_v48 = vadd.f32 %v5045_v6, %v4819_v46  ;;  %v4822_v4 = vadd.f32 %v4821_v0, %v4820_v30  ;;  %v6881_v26 = vadd.f32 %v4813_v23, %v2036_v5  ;;  %v5046_v60 = vpop.f32.mrb[38].mxu1  ;;  %v6899_v23 = vpop.permute.xlu0 %3155 }
 0x25a   : > { %v2039_v1 = vpop.f32.mrb[39].mxu1  ;;  %v6909_v63 = vpop.permute.xlu1 %2126 }
 0x25b   : > { %v6885_v38 = vadd.f32 %v5046_v60, %v4822_v4  ;;  %v6887_v39 = vadd.f32 %v4816_v21, %v2039_v1 }
 0x25d   : > { %v4823_v58 = vpop.f32.mrb[48].mxu0  ;;  %v6911_v2 = vpop.permute.xlu0 %2121 }
 0x25e   : > { %v4824_v19 = vpop.f32.mrb[49].mxu0  ;;  %v6913_v5 = vpop.permute.xlu1 %3170 }
 0x25f   : > { %v4825_v13 = vadd.f32 %v4824_v19, %v4823_v58  ;;  %v4826_v44 = vpop.f32.mrb[50].mxu0 }
 0x260   : > { %v4827_v54 = vpop.f32.mrb[51].mxu0 }
 0x261   : > { %v4828_v56 = vadd.f32 %v4827_v54, %v4826_v44  ;;  %v6915_v4 = vpop.permute.xlu0 %3165 }
 0x265   : > { %v4829_v45 = vpop.f32.mrb[52].mxu0 }
 0x266   : > { %v4830_v40 = vpop.f32.mrb[53].mxu0 }
 0x267   : > { %v4831_v14 = vadd.f32 %v4830_v40, %v4829_v45  ;;  %v4832_v61 = vpop.f32.mrb[54].mxu0  ;;  %v5049_v17 = vpop.f32.mrb[40].mxu1 }
 0x268   : > { %v4833_v34 = vpop.f32.mrb[55].mxu0  ;;  %v2052_v31 = vpop.f32.mrb[41].mxu1 }
 0x269   : > { %v6901_v55 = vadd.f32 %v5049_v17, %v4831_v14  ;;  %v4834_v43 = vadd.f32 %v4833_v34, %v4832_v61  ;;  %v6903_v18 = vadd.f32 %v4825_v13, %v2052_v31  ;;  %v5050_v15 = vpop.f32.mrb[42].mxu1  ;;  %v6925_v31 = vpop.permute.xlu1 %2136 }
 0x26a   : > { %v2055_v21 = vpop.f32.mrb[43].mxu1 }
 0x26b   : > { %v6905_v25 = vadd.f32 %v5050_v15, %v4834_v43  ;;  %v6907_v32 = vadd.f32 %v4828_v56, %v2055_v21  ;;  %v6927_v15 = vpop.permute.xlu0 %2131 }
 0x26d   : > { %v4835_v27 = vpop.f32.mrb[56].mxu0 }
 0x26e   : > { %v4836_v8 = vpop.f32.mrb[57].mxu0 }
 0x26f   : > { %v4837_v46 = vadd.f32 %v4836_v8, %v4835_v27  ;;  %v4838_v30 = vpop.f32.mrb[58].mxu0 }
 0x270   : > { %v4839_v6 = vpop.f32.mrb[59].mxu0 }
 0x271   : > { %v4840_v0 = vadd.f32 %v4839_v6, %v4838_v30 }
 0x275   : > { %v4841_v60 = vpop.f32.mrb[60].mxu0 }
 0x276   : > { %v4842_v1 = vpop.f32.mrb[61].mxu0 }
 0x277   : > { %v5053_v58 = vpop.f32.mrb[44].mxu1  ;;  %v4843_v19 = vadd.f32 %v4842_v1, %v4841_v60  ;;  %v4844_v13 = vpop.f32.mrb[62].mxu0 }
 0x278   : > { %v2068_v44 = vpop.f32.mrb[45].mxu1  ;;  %v4845_v54 = vpop.f32.mrb[63].mxu0 }
 0x279   : > { %v6917_v56 = vadd.f32 %v4837_v46, %v2068_v44  ;;  %v5054_v45 = vpop.f32.mrb[46].mxu1  ;;  %v6919_v40 = vadd.f32 %v5053_v58, %v4843_v19  ;;  %v4846_v14 = vadd.f32 %v4845_v54, %v4844_v13  ;;  %v2179_v58 = vmul.f32 %v6867_v49, %v6798_v16  ;;  %v6931_v13 = vpop.permute.xlu1 %3180 }
 0x27a   : > { %v2071_v61 = vpop.f32.mrb[47].mxu1  ;;  %v2180_v44 = vmul.f32 %v6859_v37, %v6802_v11 }
 0x27b   : > { %v6921_v17 = vadd.f32 %v4840_v0, %v2071_v61  ;;  %v6923_v34 = vadd.f32 %v5054_v45, %v4846_v14  ;;  %v6937_v61 = vpop.permute.xlu0 %3175 }
 0x27d   : > { %v5073_v43 = vpop.f32.mrb[64].mxu0 }
 0x27e   : > { %v2590_v21 = vpop.f32.mrb[65].mxu0 }
 0x27f   : > { %v4879_v27 = vpop.f32.mrb[48].mxu1  ;;  %v5074_v8 = vpop.f32.mrb[66].mxu0 }
 0x280   : > { %v4880_v30 = vpop.f32.mrb[49].mxu1  ;;  %v2593_v46 = vpop.f32.mrb[67].mxu0 }
 0x281   : > { %v4881_v6 = vadd.f32 %v4880_v30, %v4879_v27  ;;  %v4882_v60 = vpop.f32.mrb[50].mxu1 }
 0x282   : > { %v4883_v1 = vpop.f32.mrb[51].mxu1 }
 0x283   : > { %v2591_v0 = vadd.f32 %v4881_v6, %v2590_v21  ;;  %v4884_v19 = vadd.f32 %v4883_v1, %v4882_v60  ;;  %v2181_v60 = vmul.f32 %v6895_v7, %v6796_v57  ;;  %v2147_v1 = vpop.permute.xlu1 %2146 }
 0x285   : > { %v6935_v54 = vadd.f32 %v2591_v0, %v2179_v58  ;;  %v2594_v45 = vadd.f32 %v4884_v19, %v2593_v46  ;;  %v5077_v14 = vpop.f32.mrb[68].mxu0  ;;  %v2182_v46 = vmul.f32 %v6893_v47, %v6800_v62  ;;  %v2183_v62 = vmul.f32 %v6911_v2, %v6881_v26 }
 0x286   : > { %v2606_v51 = vpop.f32.mrb[69].mxu0 }
 0x287   : > { %v6939_v27 = vadd.f32 %v2594_v45, %v2180_v44  ;;  %v4885_v30 = vpop.f32.mrb[52].mxu1  ;;  %v5078_v53 = vpop.f32.mrb[70].mxu0 }
 0x288   : > { %v4886_v12 = vpop.f32.mrb[53].mxu1  ;;  %v2609_v16 = vpop.f32.mrb[71].mxu0 }
 0x289   : > { %v4887_v49 = vadd.f32 %v4886_v12, %v4885_v30  ;;  %v4888_v21 = vpop.f32.mrb[54].mxu1  ;;  %v2142_v44 = vpop.permute.xlu0 %2141 }
 0x28a   : > { %v4889_v6 = vpop.f32.mrb[55].mxu1 }
 0x28b   : > { %v2599_v11 = vadd.f32 %v5073_v43, %v4887_v49  ;;  %v4890_v37 = vadd.f32 %v4889_v6, %v4888_v21  ;;  %v2184_v6 = vmul.f32 %v6909_v63, %v6887_v39  ;;  %v2185_v63 = vmul.f32 %v6927_v15, %v6879_v48 }
 0x28d   : > { %v6945_v58 = vadd.f32 %v2599_v11, %v2181_v60  ;;  %v2602_v0 = vadd.f32 %v5074_v8, %v4890_v37  ;;  %v6947_v19 = vpop.f32.mrb[72].mxu0  ;;  %v6955_v8 = vpop.permute.xlu1 %3190 }
 0x28e   : > { %v2622_v45 = vpop.f32.mrb[73].mxu0 }
 0x28f   : > { %v6949_v59 = vadd.f32 %v2602_v0, %v2182_v46  ;;  %v4891_v12 = vpop.f32.mrb[56].mxu1  ;;  %v6951_v30 = vpop.f32.mrb[74].mxu0 }
 0x290   : > { %v4892_v29 = vpop.f32.mrb[57].mxu1  ;;  %v2625_v57 = vpop.f32.mrb[75].mxu0 }
 0x291   : > { %v4893_v7 = vadd.f32 %v4892_v29, %v4891_v12  ;;  %v4894_v43 = vpop.f32.mrb[58].mxu1  ;;  %v6963_v46 = vpop.permute.xlu0 %3185 }
 0x292   : > { %v4895_v49 = vpop.f32.mrb[59].mxu1 }
 0x293   : > { %v2607_v47 = vadd.f32 %v4893_v7, %v2606_v51  ;;  %v4896_v21 = vadd.f32 %v4895_v49, %v4894_v43 }
 0x295   : > { %v6959_v60 = vadd.f32 %v2607_v47, %v2183_v62  ;;  %v2610_v11 = vadd.f32 %v4896_v21, %v2609_v16  ;;  %v6961_v37 = vpop.f32.mrb[76].mxu0  ;;  %v2157_v62 = vpop.permute.xlu1 %2156  ;;  %v2186_v47 = vmul.f32 %v6925_v31, %v6885_v38  ;;  %v2187_v38 = vmul.f32 %v2142_v44, %v6903_v18 }
 0x296   : > { %v6965_v29 = vpop.f32.mrb[77].mxu0  ;;  %v2152_v52 = vpop.permute.xlu0 %2151 }
 0x297   : > { %v6967_v0 = vadd.f32 %v2610_v11, %v2184_v6  ;;  %v4897_v12 = vpop.f32.mrb[60].mxu1  ;;  %v6969_v26 = vpop.f32.mrb[78].mxu0 }
 0x298   : > { %v4898_v51 = vpop.f32.mrb[61].mxu1  ;;  %v6971_v2 = vpop.f32.mrb[79].mxu0 }
 0x299   : > { %v4899_v7 = vadd.f32 %v4898_v51, %v4897_v12  ;;  %v4900_v43 = vpop.f32.mrb[62].mxu1 }
 0x29a   : > { %v4901_v39 = vpop.f32.mrb[63].mxu1 }
 0x29b   : > { %v2615_v16 = vadd.f32 %v5077_v14, %v4899_v7  ;;  %v4902_v49 = vadd.f32 %v4901_v39, %v4900_v43  ;;  %v6986_v39 = vpop.permute.xlu1 %3200 }
 0x29d   : > { %v6977_v21 = vadd.f32 %v2615_v16, %v2185_v63  ;;  %v2618_v6 = vadd.f32 %v5078_v53, %v4902_v49  ;;  %v4959_v11 = vpop.f32.mrb[80].mxu0  ;;  %v2188_v63 = vmul.f32 %v2147_v1, %v6907_v32  ;;  %v2189_v1 = vmul.f32 %v2152_v52, %v6901_v55 }
 0x29e   : > { %v4960_v10 = vpop.f32.mrb[81].mxu0 }
 0x29f   : > { %v6979_v28 = vadd.f32 %v2618_v6, %v2186_v47  ;;  %v6981_v12 = vadd.f32 %v4960_v10, %v4959_v11  ;;  %v4903_v51 = vpop.f32.mrb[64].mxu1  ;;  %v4962_v24 = vpop.f32.mrb[82].mxu0 }
 0x2a0   : > { %v4904_v22 = vpop.f32.mrb[65].mxu1  ;;  %v4963_v48 = vpop.f32.mrb[83].mxu0 }
 0x2a1   : > { %v4905_v15 = vadd.f32 %v4904_v22, %v4903_v51  ;;  %v6983_v14 = vadd.f32 %v4963_v48, %v4962_v24  ;;  %v4906_v7 = vpop.f32.mrb[66].mxu1  ;;  %v6991_v47 = vpop.permute.xlu0 %3195 }
 0x2a2   : > { %v4907_v43 = vpop.f32.mrb[67].mxu1 }
 0x2a3   : > { %v2623_v31 = vadd.f32 %v4905_v15, %v2622_v45  ;;  %v4908_v53 = vadd.f32 %v4907_v43, %v4906_v7  ;;  %v2167_v43 = vpop.permute.xlu1 %2166 }
 0x2a5   : > { %v6989_v16 = vadd.f32 %v2623_v31, %v2187_v38  ;;  %v2626_v10 = vadd.f32 %v4908_v53, %v2625_v57  ;;  %v4965_v49 = vpop.f32.mrb[84].mxu0  ;;  %v2190_v38 = vmul.f32 %v2157_v62, %v6905_v25 }
 0x2a6   : > { %v4966_v6 = vpop.f32.mrb[85].mxu0 }
 0x2a7   : > { %v6993_v22 = vadd.f32 %v2626_v10, %v2188_v63  ;;  %v6995_v24 = vadd.f32 %v4966_v6, %v4965_v49  ;;  %v4909_v11 = vpop.f32.mrb[68].mxu1  ;;  %v4968_v51 = vpop.f32.mrb[86].mxu0 }
 0x2a8   : > { %v4910_v18 = vpop.f32.mrb[69].mxu1  ;;  %v4969_v44 = vpop.f32.mrb[87].mxu0 }
 0x2a9   : > { %v4911_v45 = vadd.f32 %v4910_v18, %v4909_v11  ;;  %v6997_v48 = vadd.f32 %v4969_v44, %v4968_v51  ;;  %v4912_v15 = vpop.f32.mrb[70].mxu1  ;;  %v2162_v10 = vpop.permute.xlu0 %2161 }
 0x2aa   : > { %v4913_v32 = vpop.f32.mrb[71].mxu1  ;;  %v2191_v62 = vmul.f32 %v2162_v10, %v6917_v56 }
 0x2ab   : > { %v2631_v57 = vadd.f32 %v6947_v19, %v4911_v45  ;;  %v4914_v7 = vadd.f32 %v4913_v32, %v4912_v15 }
 0x2ad   : > { %v7002_v31 = vadd.f32 %v2631_v57, %v2189_v1  ;;  %v2634_v53 = vadd.f32 %v6951_v30, %v4914_v7  ;;  %v4971_v63 = vpop.f32.mrb[88].mxu0  ;;  %v7013_v32 = vpop.permute.xlu0 %3205  ;;  %v2192_v1 = vmul.f32 %v2167_v43, %v6921_v17 }
 0x2ae   : > { %v4972_v49 = vpop.f32.mrb[89].mxu0 }
 0x2af   : > { %v7005_v6 = vadd.f32 %v2634_v53, %v2190_v38  ;;  %v7007_v11 = vadd.f32 %v4972_v49, %v4971_v63  ;;  %v4915_v51 = vpop.f32.mrb[72].mxu1  ;;  %v4974_v18 = vpop.f32.mrb[90].mxu0 }
 0x2b0   : > { %v4916_v52 = vpop.f32.mrb[73].mxu1  ;;  %v4975_v55 = vpop.f32.mrb[91].mxu0 }
 0x2b1   : > { %v4917_v19 = vadd.f32 %v4916_v52, %v4915_v51  ;;  %v7009_v44 = vadd.f32 %v4975_v55, %v4974_v18  ;;  %v4918_v45 = vpop.f32.mrb[74].mxu1  ;;  %v7019_v53 = vpop.permute.xlu1 %3210 }
 0x2b2   : > { %v4919_v25 = vpop.f32.mrb[75].mxu1 }
 0x2b3   : > { %v2639_v30 = vadd.f32 %v4917_v19, %v6965_v29  ;;  %v4920_v15 = vadd.f32 %v4919_v25, %v4918_v45  ;;  %v2172_v45 = vpop.permute.xlu0 %2171 }
 0x2b4   : > { %v2193_v43 = vmul.f32 %v2172_v45, %v6919_v40 }
 0x2b5   : > { %v7016_v57 = vadd.f32 %v2639_v30, %v2191_v62  ;;  %v2642_v7 = vadd.f32 %v4920_v15, %v6971_v2  ;;  %v4977_v38 = vpop.f32.mrb[92].mxu0  ;;  %v2177_v62 = vpop.permute.xlu1 %2176 }
 0x2b6   : > { %v4978_v63 = vpop.f32.mrb[93].mxu0  ;;  %v2194_v30 = vmul.f32 %v2177_v62, %v6923_v34 }
 0x2b7   : > { %v7021_v49 = vadd.f32 %v2642_v7, %v2192_v1  ;;  %v4979_v51 = vadd.f32 %v4978_v63, %v4977_v38  ;;  %v4921_v18 = vpop.f32.mrb[76].mxu1  ;;  %v4980_v56 = vpop.f32.mrb[94].mxu0 }
 0x2b8   : > { %v4922_v10 = vpop.f32.mrb[77].mxu1  ;;  %v4981_v29 = vpop.f32.mrb[95].mxu0 }
 0x2b9   : > { %v4923_v52 = vadd.f32 %v4922_v10, %v4921_v18  ;;  %v4982_v55 = vadd.f32 %v4981_v29, %v4980_v56  ;;  %v4924_v19 = vpop.f32.mrb[78].mxu1 }
 0x2ba   : > { %v4925_v17 = vpop.f32.mrb[79].mxu1 }
 0x2bb   : > { %v2647_v2 = vadd.f32 %v6961_v37, %v4923_v52  ;;  %v4926_v25 = vadd.f32 %v4925_v17, %v4924_v19 }
 0x2bd   : > { %v7026_v15 = vadd.f32 %v2647_v2, %v2193_v43  ;;  %v2650_v1 = vadd.f32 %v6969_v26, %v4926_v25  ;;  %v4983_v7 = vpop.f32.mrb[96].mxu0  ;;  %v7042_v43 = vld [vmem:[%s7455_s9] ss:$0 sm:$0xff] }
 0x2be   : > { %v4984_v38 = vpop.f32.mrb[97].mxu0 }
 0x2bf   : > { %v7029_v63 = vadd.f32 %v2650_v1, %v2194_v30  ;;  %v7031_v18 = vadd.f32 %v4984_v38, %v4983_v7  ;;  %v4986_v56 = vpop.f32.mrb[98].mxu0  ;;  %v5105_v10 = vpop.f32.mrb[80].mxu1 }
 0x2c0   : > { %v3073_v40 = vadd.f32 %v5105_v10, %v6995_v24  ;;  %v4987_v29 = vpop.f32.mrb[99].mxu0  ;;  %v3064_v37 = vpop.f32.mrb[81].mxu1 }
 0x2c1   : > { %v7034_v52 = vadd.f32 %v4987_v29, %v4986_v56  ;;  %v3065_v34 = vadd.f32 %v6981_v12, %v3064_v37  ;;  %v5106_v19 = vpop.f32.mrb[82].mxu1 }
 0x2c2   : > { %v3225_v45 = vmul.f32 %v6899_v23, %v3073_v40  ;;  %v3076_v26 = vadd.f32 %v5106_v19, %v6997_v48  ;;  %v3067_v17 = vpop.f32.mrb[83].mxu1  ;;  %v7052_v23 = vld [vmem:[%s7535_s21] ss:$0 sm:$0xff] }
 0x2c3   : > { %v3223_v2 = vmul.f32 %v6891_v35, %v3065_v34  ;;  %v3068_v24 = vadd.f32 %v6983_v14, %v3067_v17 }
 0x2c4   : > { %v3241_v25 = vadd.f32 %v3225_v45, %v6945_v58  ;;  %v3226_v62 = vmul.f32 %v6897_v20, %v3076_v26 }
 0x2c5   : > { %v3239_v12 = vadd.f32 %v3223_v2, %v6935_v54  ;;  %v3224_v48 = vmul.f32 %v6883_v50, %v3068_v24  ;;  %v4989_v30 = vpop.f32.mrb[100].mxu0 }
 0x2c6   : > { %v3264_v1 = vmul.f32 %v7042_v43, %v3241_v25  ;;  %v3242_v35 = vadd.f32 %v3226_v62, %v6949_v59  ;;  %v4990_v7 = vpop.f32.mrb[101].mxu0 }
 0x2c7   : > { %v3262_v14 = vmul.f32 %v7042_v43, %v3239_v12  ;;  %v3240_v58 = vadd.f32 %v3224_v48, %v6939_v27  ;;  %v4991_v20 = vadd.f32 %v4990_v7, %v4989_v30  ;;  %v4992_v38 = vpop.f32.mrb[102].mxu0  ;;  %v5109_v54 = vpop.f32.mrb[84].mxu1 }
 0x2c8   : > { %v3265_v56 = vmul.f32 %v7042_v43, %v3242_v35  ;;  %v3089_v10 = vadd.f32 %v5109_v54, %v4979_v51  ;;  %v4993_v40 = vpop.f32.mrb[103].mxu0  ;;  %v3080_v29 = vpop.f32.mrb[85].mxu1  ;;  %v3287_v50 = vadd.f32 %v7052_v23, %v3264_v1 }
 0x2c9   : > { %v3285_v37 = vadd.f32 %v7052_v23, %v3262_v14  ;;  %v3263_v34 = vmul.f32 %v7042_v43, %v3240_v58  ;;  %v4994_v59 = vadd.f32 %v4993_v40, %v4992_v38  ;;  %v3081_v19 = vadd.f32 %v7007_v11, %v3080_v29  ;;  %v5110_v45 = vpop.f32.mrb[86].mxu1 }
 0x2ca   : > { %v3229_v27 = vmul.f32 %v6937_v61, %v3089_v10  ;;  %v3092_v26 = vadd.f32 %v5110_v45, %v4982_v55  ;;  %v3083_v17 = vpop.f32.mrb[87].mxu1  ;;  %v3288_v2 = vadd.f32 %v7052_v23, %v3265_v56  ;;  %v3303_v48 = vmax.f32 %v3287_v50, 0.0 }
 0x2cb   : > { %v3286_v51 = vadd.f32 %v7052_v23, %v3263_v34  ;;  %v3227_v24 = vmul.f32 %v6915_v4, %v3081_v19  ;;  %v3084_v25 = vadd.f32 %v7009_v44, %v3083_v17  ;;  %v3301_v11 = vmax.f32 %v3285_v37, 0.0 }
 0x2cc   : > { %v3245_v62 = vadd.f32 %v3229_v27, %v6977_v21  ;;  %v3230_v12 = vmul.f32 %v6931_v13, %v3092_v26  ;;  %v3304_v30 = vmax.f32 %v3288_v2, 0.0 }
 0x2cd   : > { %v3302_v1 = vmax.f32 %v3286_v51, 0.0  ;;  %v3243_v61 = vadd.f32 %v3227_v24, %v6959_v60  ;;  %v3228_v55 = vmul.f32 %v6913_v5, %v3084_v25  ;;  %v4995_v35 = vpop.f32.mrb[104].mxu0 }
 0x2ce   : > { %v3268_v7 = vmul.f32 %v7042_v43, %v3245_v62  ;;  %v3246_v14 = vadd.f32 %v3230_v12, %v6979_v28  ;;  %v4996_v4 = vpop.f32.mrb[105].mxu0  ;;  %v3318_v58 = vpack.c.bf16 %v3304_v30, %v3303_v48 }
 0x2cf   : > { %v3317_v44 = vpack.c.bf16 %v3302_v1, %v3301_v11  ;;  %v3266_v21 = vmul.f32 %v7042_v43, %v3243_v61  ;;  %v3244_v13 = vadd.f32 %v3228_v55, %v6967_v0  ;;  %v4997_v38 = vadd.f32 %v4996_v4, %v4995_v35  ;;  %v4998_v54 = vpop.f32.mrb[106].mxu0  ;;  %v5113_v56 = vpop.f32.mrb[88].mxu1 }
 0x2d0   : > { %v3269_v10 = vmul.f32 %v7042_v43, %v3246_v14  ;;  %v3105_v60 = vadd.f32 %v5113_v56, %v4991_v20  ;;  %v4999_v40 = vpop.f32.mrb[107].mxu0  ;;  %v3096_v5 = vpop.f32.mrb[89].mxu1  ;;  %v3291_v29 = vadd.f32 %v7052_v23, %v3268_v7 }
 0x2d1   : > { %v3267_v50 = vmul.f32 %v7042_v43, %v3244_v13  ;;  %v5000_v28 = vadd.f32 %v4999_v40, %v4998_v54  ;;  %v3097_v37 = vadd.f32 %v7031_v18, %v3096_v5  ;;  %v5114_v34 = vpop.f32.mrb[90].mxu1  ;;  %3550 = vmatmul.mubr.bf16.vlgmr.msra.gmra.mrb[96].mxu1 %v3317_v44  ;;  %3663 = vmatmul.mubr.bf16.vlgmr.msra.gmra.mrb[112].mxu0 %v3317_v44 }
 0x2d2   : > { %v3233_v0 = vmul.f32 %v6991_v47, %v3105_v60  ;;  %v3108_v19 = vadd.f32 %v5114_v34, %v4994_v59  ;;  %5127 = vmatpush1.bf16.msra.mxu1 %v6733_v9  ;;  %v3099_v45 = vpop.f32.mrb[91].mxu1  ;;  %3559 = vmatprep.mubr.bf16.mxu1 %v7524_v36  ;;  %v3289_v20 = vadd.f32 %v7052_v23, %v3266_v21  ;;  %v3307_v62 = vmax.f32 %v3291_v29, 0.0  ;;  %v3221_v60 = vpop.permute.xlu1 %3220  ;;  %v7536_v34 = vld [vmem:[#allocation15_spill] sm:$0xff] }
 0x2d3   : > { %v3231_v27 = vmul.f32 %v6963_v46, %v3097_v37  ;;  %v3100_v26 = vadd.f32 %v7034_v52, %v3099_v45  ;;  %5120 = vmatprep.subr.bf16.mxu1 %v6750_v3  ;;  %3672 = vmatprep.mubr.bf16.mxu0 %v7524_v36  ;;  %v3290_v18 = vadd.f32 %v7052_v23, %v3267_v50 }
 0x2d4   : > { %v3249_v47 = vadd.f32 %v3233_v0, %v7002_v31  ;;  %v3234_v59 = vmul.f32 %v6986_v39, %v3108_v19  ;;  %v3292_v9 = vadd.f32 %v7052_v23, %v3269_v10  ;;  %v3305_v46 = vmax.f32 %v3289_v20, 0.0 }
 0x2d5   : > { %v3247_v17 = vadd.f32 %v3231_v27, %v6989_v16  ;;  %v3232_v2 = vmul.f32 %v6955_v8, %v3100_v26  ;;  %v5001_v51 = vpop.f32.mrb[108].mxu0  ;;  %v3306_v24 = vmax.f32 %v3290_v18, 0.0  ;;  %v7537_v27 = vld [vmem:[#allocation16_spill] sm:$0xff]  ;;  %v7538_v26 = vld [vmem:[#allocation18_spill] sm:$0xff] }
 0x2d6   : > { %v3272_v52 = vmul.f32 %v7042_v43, %v3249_v47  ;;  %v3250_v3 = vadd.f32 %v3234_v59, %v7005_v6  ;;  %v5002_v25 = vpop.f32.mrb[109].mxu0  ;;  %5128 = vmatpush1.bf16.msra.mxu1 %v6756_v33  ;;  %v3308_v31 = vmax.f32 %v3292_v9, 0.0  ;;  %v7539_v59 = vld [vmem:[#allocation17_spill] sm:$0xff]  ;;  %v7540_v9 = vld [vmem:[#allocation20_spill] sm:$0xff] }
 0x2d7   : > { %v3270_v39 = vmul.f32 %v7042_v43, %v3247_v17  ;;  %v3248_v12 = vadd.f32 %v3232_v2, %v6993_v22  ;;  %v5003_v48 = vadd.f32 %v5002_v25, %v5001_v51  ;;  %v5004_v16 = vpop.f32.mrb[110].mxu0  ;;  %v5117_v30 = vpop.f32.mrb[92].mxu1  ;;  %5121 = vmatprep.subr.bf16.mxu1 %v6774_v42  ;;  %v3319_v8 = vpack.c.bf16 %v3306_v24, %v3305_v46  ;;  %v7544_v25 = vld [vmem:[#allocation23_spill] sm:$0xff] }
 0x2d8   : > { %v3273_v11 = vmul.f32 %v7042_v43, %v3250_v3  ;;  %v5005_v1 = vpop.f32.mrb[111].mxu0  ;;  %v3112_v61 = vpop.f32.mrb[93].mxu1  ;;  %v3320_v6 = vpack.c.bf16 %v3308_v31, %v3307_v62  ;;  %v3295_v55 = vadd.f32 %v7052_v23, %v3272_v52  ;;  %v7541_v52 = vld [vmem:[#allocation19_spill] sm:$0xff]  ;;  %v7542_v3 = vld [vmem:[#allocation21_spill] sm:$0xff]  ;;  %v7545_v62 = vld [vmem:[#allocation24_spill] sm:$0xff]  ;;  %v3745_v31 = vlaneseq }
 0x2d9   : > { %v3271_v33 = vmul.f32 %v7042_v43, %v3248_v12  ;;  %v3121_v35 = vadd.f32 %v5117_v30, %v5003_v48  ;;  %v5006_v7 = vadd.f32 %v5005_v1, %v5004_v16  ;;  %v3113_v14 = vadd.f32 %v4997_v38, %v3112_v61  ;;  %v5118_v4 = vpop.f32.mrb[94].mxu1  ;;  %3560 = vmatmul.mubr.bf16.gmra.mrb[100].mxu1 %v3318_v58  ;;  %v3216_v22 = vpop.permute.xlu0 %3215  ;;  %v3743_v16 = vld [vmem:[%s7546_s27] sm:$0xf]  ;;  %s5414_s27 = scalar_lea.vmem %s7400_s24, 4096 }
 0x2da   : > { %3673 = vmatmul.mubr.bf16.gmra.mrb[116].mxu0 %v3318_v58  ;;  %v3115_v44 = vpop.f32.mrb[95].mxu1  ;;  %3569 = vmatprep.mubr.bf16.mxu1 %v7524_v36  ;;  %v3293_v42 = vadd.f32 %v7052_v23, %v3270_v39  ;;  %v3296_v21 = vadd.f32 %v7052_v23, %v3273_v11  ;;  %v3311_v58 = vmax.f32 %v3295_v55, 0.0  ;;  %v3746_v39 = vshrl.u32 %v3745_v31, 7  ;;  %v3829_v11 = vld [vmem:[%s7547_s10] sm:$0xf]  ;;  %p5415_p4 = scmp.ne.s32.totalorder %s7400_s24, %s5414_s27  ;;  %p5422_p13 = scmp.lt.s32.totalorder %s5420_s29, %s5414_s27 }
 0x2db   : > { %v3237_v13 = vmul.f32 %v3216_v22, %v3121_v35  ;;  %v3235_v54 = vmul.f32 %v7013_v32, %v3113_v14  ;;  %v3124_v56 = vadd.f32 %v5118_v4, %v5006_v7  ;;  %v3116_v10 = vadd.f32 %v5000_v28, %v3115_v44  ;;  %3682 = vmatprep.mubr.bf16.mxu0 %v7524_v36 }
 0x2dc   : > { %5129 = vmatpush1.bf16.msra.mxu1 %v6769_v41  ;;  %v3294_v38 = vadd.f32 %v7052_v23, %v3271_v33  ;;  %v3312_v40 = vmax.f32 %v3296_v21, 0.0  ;;  %v3309_v32 = vmax.f32 %v3293_v42, 0.0  ;;  %v3747_v12 = vsub.s32 0, %v3746_v39  ;;  %p5416_p6 = pnand %p5415_p4, %p5663_p12  ;;  %p5423_p3 = por %p5422_p13, %p5421_p10 }
 0x2dd   : > { %v3253_v5 = vadd.f32 %v3237_v13, %v7026_v15  ;;  %v3251_v29 = vadd.f32 %v3235_v54, %v7016_v57  ;;  %v3238_v50 = vmul.f32 %v3221_v60, %v3124_v56  ;;  %v3236_v37 = vmul.f32 %v7019_v53, %v3116_v10  ;;  %5122 = vmatprep.subr.bf16.mxu1 %v7536_v34  ;;  %v3915_v13 = vld [vmem:[%s5715_s23] sm:$0xff]  ;;  %v3917_v54 = vld [vmem:[%s5715_s23 + $0x10] sm:$0xff] }
 0x2de   : > { %v3310_v28 = vmax.f32 %v3294_v38, 0.0  ;;  %v3322_v0 = vpack.c.bf16 %v3312_v40, %v3311_v58  ;;  %v3755_v48 = vsub.s32 2, %v3746_v39  ;;  %v3751_v30 = vsub.s32 1, %v3746_v39  ;;  %p5417_p8 = pneg %p5416_p6 }
 0x2df   : > { %v3276_v19 = vmul.f32 %v7042_v43, %v3253_v5  ;;  %v3274_v41 = vmul.f32 %v7042_v43, %v3251_v29  ;;  %v3254_v45 = vadd.f32 %v3238_v50, %v7029_v63  ;;  %v3252_v20 = vadd.f32 %v3236_v37, %v7021_v49  ;;  %v3916_v5 = vld [vmem:[%s5715_s23 + $0x8] sm:$0xff]  ;;  %v3918_v29 = vld [vmem:[%s5715_s23 + $0x18] sm:$0xff] }
 0x2e0   : > { %5130 = vmatpush1.bf16.msra.mxu1 %v7537_v27  ;;  %v3321_v15 = vpack.c.bf16 %v3310_v28, %v3309_v32  ;;  %v7150_v1 = vrot.slane %v3743_v16, %v3747_v12  ;;  %v7154_v61 = vrot.slane %v3743_v16, %v3751_v30  ;;  %v7158_v55 = vrot.slane %v3829_v11, %v3747_v12  ;;  %p5424_p7 = pnand %p5423_p3, %p5417_p8 }
 0x2e1   : > { %v3277_v57 = vmul.f32 %v7042_v43, %v3254_v45  ;;  %v3275_v53 = vmul.f32 %v7042_v43, %v3252_v20  ;;  %3570 = vmatmul.mubr.bf16.gmra.mrb[104].mxu1 %v3319_v8  ;;  %5123 = vmatprep.subr.bf16.mxu1 %v7538_v26  ;;  %v3297_v18 = vadd.f32 %v7052_v23, %v3274_v41  ;;  %v3921_v41 = vld [vmem:[%s5715_s23 + $0x30] sm:$0xff]  ;;  %v3920_v26 = vld [vmem:[%s5715_s23 + $0x28] sm:$0xff] }
 0x2e2   : > { %3683 = vmatmul.mubr.bf16.gmra.mrb[120].mxu0 %v3319_v8  ;;  %3579 = vmatprep.mubr.bf16.mxu1 %v7524_v36  ;;  %v3299_v47 = vadd.f32 %v7052_v23, %v3276_v19  ;;  %v3759_v8 = vsub.s32 3, %v3746_v39  ;;  %v7160_v33 = vrot.slane %v3829_v11, %v3755_v48  ;;  %v7162_v14 = vrot.slane %v3829_v11, %v3751_v30  ;;  %v3919_v19 = vld [vmem:[%s5715_s23 + $0x20] sm:$0xff] }
 0x2e3   : > { %3692 = vmatprep.mubr.bf16.mxu0 %v7524_v36  ;;  %v3298_v49 = vadd.f32 %v7052_v23, %v3275_v53  ;;  %v3300_v63 = vadd.f32 %v7052_v23, %v3277_v57  ;;  %v3313_v43 = vmax.f32 %v3297_v18, 0.0  ;;  %v7543_v23 = vld [vmem:[#allocation22_spill] sm:$0xff] }
 0x2e4   : > { %5131 = vmatpush1.bf16.msra.mxu1 %v7539_v59  ;;  %v3315_v2 = vmax.f32 %v3299_v47, 0.0  ;;  %v7164_v4 = vrot.slane %v3829_v11, %v3759_v8  ;;  %v3922_v18 = vld [vmem:[%s5715_s23 + $0x38] sm:$0xff] }
 0x2e5   : > { %5124 = vmatprep.subr.bf16.mxu1 %v7540_v9  ;;  %v3314_v17 = vmax.f32 %v3298_v49, 0.0  ;;  %v3316_v51 = vmax.f32 %v3300_v63, 0.0 }
 0x2e7   : > { %v3323_v46 = vpack.c.bf16 %v3314_v17, %v3313_v43  ;;  %v3324_v24 = vpack.c.bf16 %v3316_v51, %v3315_v2 }
 0x2e8   : > { %5132 = vmatpush1.bf16.msra.mxu1 %v7541_v52 }
 0x2e9   : > { %3580 = vmatmul.mubr.bf16.gmra.mrb[108].mxu1 %v3320_v6  ;;  %5125 = vmatprep.subr.bf16.mxu1 %v7542_v3 }
 0x2ea   : > { %3693 = vmatmul.mubr.bf16.gmra.mrb[124].mxu0 %v3320_v6  ;;  %3589 = vmatprep.mubr.bf16.mxu1 %v7524_v36  ;;  %v7156_v6 = vrot.slane %v3743_v16, %v3759_v8  ;;  %v3923_v8 = vld [vmem:[%s5715_s23 + $0x40] sm:$0xff] }
 0x2eb   : > { %3702 = vmatprep.mubr.bf16.mxu0 %v7524_v36 }
 0x2ec   : > { %5133 = vmatpush1.bf16.msra.mxu1 %v7543_v23 }
 0x2ed   : > { %5126 = vmatprep.subr.bf16.mxu1 %v7544_v25 }
 0x2f0   : > { %5134 = vmatpush1.bf16.msra.mxu1 %v7545_v62 }
 0x2f1   : > { %3590 = vmatmul.mubr.bf16.gmra.mrb[112].mxu1 %v3321_v15 }
 0x2f2   : > { %3703 = vmatmul.mubr.bf16.gmra.mrb[128].mxu0 %v3321_v15  ;;  %3599 = vmatprep.mubr.bf16.mxu1 %v7524_v36 }
 0x2f3   : > { %3712 = vmatprep.mubr.bf16.mxu0 %v7524_v36 }
 0x2f9   : > { %3600 = vmatmul.mubr.bf16.gmra.mrb[116].mxu1 %v3322_v0 }
 0x2fa   : > { %3713 = vmatmul.mubr.bf16.gmra.mrb[132].mxu0 %v3322_v0  ;;  %3609 = vmatprep.mubr.bf16.mxu1 %v7524_v36 }
 0x301   : > { %3610 = vmatmul.mubr.bf16.gmra.mrb[120].mxu1 %v3323_v46 }
 0x302   : > { %3619 = vmatprep.mubr.bf16.mxu1 %v7524_v36 }
 0x309   : > { %3620 = vmatmul.mubr.bf16.gmra.mrb[124].mxu1 %v3324_v24 }
 0x30a   : > { %3722 = vmatprep.mubr.bf16.mxu1 %v7524_v36 }
 0x311   : > { %3723 = vmatmul.mubr.bf16.vlgmr.msra.gmra.mrb[128].mxu1 %v3323_v46 }
 0x312   : > { %3732 = vmatprep.mubr.bf16.mxu1 %v7524_v36  ;;  %v7152_v36 = vrot.slane %v3743_v16, %v3755_v48 }
 0x319   : > { %3733 = vmatmul.mubr.bf16.gmra.mrb[132].mxu1 %v3324_v24 }
 0x3a4   : > { %v3551_v35 = vpop.f32.mrb[96].mxu1  ;;  %v3664_v7 = vpop.f32.mrb[112].mxu0 }
 0x3a5   : > { %v3765_v22 = vmul.f32 %v7150_v1, %v3551_v35  ;;  %v3767_v44 = vmul.f32 %v7152_v36, %v3664_v7  ;;  %v3553_v42 = vpop.f32.mrb[97].mxu1  ;;  %v3666_v21 = vpop.f32.mrb[113].mxu0 }
 0x3a6   : > { %v3766_v56 = vmul.f32 %v7154_v61, %v3553_v42  ;;  %v3768_v10 = vmul.f32 %v7156_v6, %v3666_v21  ;;  %v3555_v60 = vpop.f32.mrb[98].mxu1  ;;  %v3668_v38 = vpop.f32.mrb[114].mxu0 }
 0x3a7   : > { %v3851_v58 = vadd.f32 %v7158_v55, %v3765_v22  ;;  %v3853_v40 = vadd.f32 %v7160_v33, %v3767_v44  ;;  %v3769_v50 = vmul.f32 %v7150_v1, %v3555_v60  ;;  %v3771_v37 = vmul.f32 %v7152_v36, %v3668_v38  ;;  %v3557_v34 = vpop.f32.mrb[99].mxu1  ;;  %v3670_v32 = vpop.f32.mrb[115].mxu0  ;;  %v3924_v60 = vld [vmem:[%s5715_s23 + $0x48] sm:$0xff]  ;;  %v3926_v38 = vld [vmem:[%s5715_s23 + $0x58] sm:$0xff] }
 0x3a8   : > { %v3852_v28 = vadd.f32 %v7162_v14, %v3766_v56  ;;  %v3854_v0 = vadd.f32 %v7164_v4, %v3768_v10  ;;  %v3770_v45 = vmul.f32 %v7154_v61, %v3557_v34  ;;  %v3772_v20 = vmul.f32 %v7156_v6, %v3670_v32  ;;  %v3925_v10 = vld [vmem:[%s5715_s23 + $0x50] sm:$0xff]  ;;  %v3927_v32 = vld [vmem:[%s5715_s23 + $0x60] sm:$0xff] }
 0x3a9   : > { %v3979_v27 = vadd.f32 %v3915_v13, %v3851_v58  ;;  %v3981_v15 = vadd.f32 %v3917_v54, %v3853_v40  ;;  %v3855_v57 = vadd.f32 %v7158_v55, %v3769_v50  ;;  %v3857_v53 = vadd.f32 %v7160_v33, %v3771_v37 }
 0x3aa   : > { %v3980_v47 = vadd.f32 %v3916_v5, %v3852_v28  ;;  %v3982_v49 = vadd.f32 %v3918_v29, %v3854_v0  ;;  %v3856_v63 = vadd.f32 %v7162_v14, %v3770_v45  ;;  %v3858_v59 = vadd.f32 %v7164_v4, %v3772_v20  ;;  %v3929_v28 = vld [vmem:[%s5715_s23 + $0x70] sm:$0xff] }
 0x3ab   : > { %v4043_v9 = vmax.f32 %v3979_v27, 0.0  ;;  %v4045_v43 = vmax.f32 %v3981_v15, 0.0  ;;  %v3983_v17 = vadd.f32 %v3919_v19, %v3855_v57  ;;  %v3985_v2 = vadd.f32 %v3921_v41, %v3857_v53  ;;  %v3928_v53 = vld [vmem:[%s5715_s23 + $0x68] sm:$0xff] }
 0x3ac   : > { %v4044_v51 = vmax.f32 %v3980_v47, 0.0  ;;  %v4046_v46 = vmax.f32 %v3982_v49, 0.0  ;;  %v3984_v24 = vadd.f32 %v3920_v26, %v3856_v63  ;;  %v3986_v52 = vadd.f32 %v3922_v18, %v3858_v59  ;;  %v3561_v3 = vpop.f32.mrb[100].mxu1  ;;  %v3930_v26 = vld [vmem:[%s5715_s23 + $0x78] sm:$0xff] }
 0x3ad   : > { %v4047_v23 = vmax.f32 %v3983_v17, 0.0  ;;  %v4049_v25 = vmax.f32 %v3985_v2, 0.0  ;;  %v3773_v62 = vmul.f32 %v7150_v1, %v3561_v3  ;;  %v3674_v31 = vpop.f32.mrb[116].mxu0  ;;  %v3563_v39 = vpop.f32.mrb[101].mxu1 }
 0x3ae   : > { %v4621_v12 = vpack.c.bf16 %v4044_v51, %v4043_v9  ;;  %v4622_v48 = vpack.c.bf16 %v4046_v46, %v4045_v43  ;;  %v4048_v16 = vmax.f32 %v3984_v24, 0.0  ;;  %v4050_v30 = vmax.f32 %v3986_v52, 0.0  ;;  %v3676_v11 = vpop.f32.mrb[117].mxu0  ;;  %v3565_v35 = vpop.f32.mrb[102].mxu1 }
 0x3af   : > { %v3859_v7 = vadd.f32 %v7158_v55, %v3773_v62  ;;  %v3775_v22 = vmul.f32 %v7152_v36, %v3674_v31  ;;  %v3774_v44 = vmul.f32 %v7154_v61, %v3563_v39  ;;  %v3776_v42 = vmul.f32 %v7156_v6, %v3676_v11  ;;  %v3678_v21 = vpop.f32.mrb[118].mxu0  ;;  %v3567_v13 = vpop.f32.mrb[103].mxu1 }
 0x3b0   : > { %4299 = vst [vmem:[%s7199_s13] sm:$0xff] %v4621_v12  ;;  %4300 = vst [vmem:[%s7199_s13 + $0x8] sm:$0xff] %v4622_v48  ;;  %v4623_v54 = vpack.c.bf16 %v4048_v16, %v4047_v23  ;;  %v4624_v56 = vpack.c.bf16 %v4050_v30, %v4049_v25  ;;  %v3777_v58 = vmul.f32 %v7150_v1, %v3565_v35  ;;  %v3680_v5 = vpop.f32.mrb[119].mxu0  ;;  %v3931_v25 = vld [vmem:[%s5715_s23 + $0x80] sm:$0xff] }
 0x3b1   : > { %v3779_v40 = vmul.f32 %v7152_v36, %v3678_v21  ;;  %v3987_v29 = vadd.f32 %v3923_v8, %v3859_v7  ;;  %v3861_v50 = vadd.f32 %v7160_v33, %v3775_v22  ;;  %v3860_v37 = vadd.f32 %v7162_v14, %v3774_v44  ;;  %v3933_v7 = vld [vmem:[%s5715_s23 + $0x90] sm:$0xff] }
 0x3b2   : > { %v3862_v34 = vadd.f32 %v7164_v4, %v3776_v42  ;;  %4301 = vst [vmem:[%s7199_s13 + $0x10] sm:$0xff] %v4623_v54  ;;  %4302 = vst [vmem:[%s7199_s13 + $0x18] sm:$0xff] %v4624_v56  ;;  %v3863_v0 = vadd.f32 %v7158_v55, %v3777_v58  ;;  %v3778_v41 = vmul.f32 %v7154_v61, %v3567_v13  ;;  %v3932_v54 = vld [vmem:[%s5715_s23 + $0x88] sm:$0xff]  ;;  %v3934_v56 = vld [vmem:[%s5715_s23 + $0x98] sm:$0xff] }
 0x3b3   : > { %v3865_v19 = vadd.f32 %v7160_v33, %v3779_v40  ;;  %v3780_v45 = vmul.f32 %v7156_v6, %v3680_v5  ;;  %v4051_v20 = vmax.f32 %v3987_v29, 0.0  ;;  %v3989_v27 = vadd.f32 %v3925_v10, %v3861_v50  ;;  %v3935_v29 = vld [vmem:[%s5715_s23 + $0xa0] sm:$0xff]  ;;  %v3937_v50 = vld [vmem:[%s5715_s23 + $0xb0] sm:$0xff] }
 0x3b4   : > { %v3988_v15 = vadd.f32 %v3924_v60, %v3860_v37  ;;  %v3990_v57 = vadd.f32 %v3926_v38, %v3862_v34  ;;  %v3991_v18 = vadd.f32 %v3927_v32, %v3863_v0  ;;  %v3864_v49 = vadd.f32 %v7162_v14, %v3778_v41  ;;  %v3571_v59 = vpop.f32.mrb[104].mxu1 }
 0x3b5   : > { %v3993_v47 = vadd.f32 %v3929_v28, %v3865_v19  ;;  %v3866_v63 = vadd.f32 %v7164_v4, %v3780_v45  ;;  %v4053_v9 = vmax.f32 %v3989_v27, 0.0  ;;  %v3781_v2 = vmul.f32 %v7150_v1, %v3571_v59  ;;  %v3684_v51 = vpop.f32.mrb[120].mxu0  ;;  %v3573_v46 = vpop.f32.mrb[105].mxu1 }
 0x3b6   : > { %v4052_v43 = vmax.f32 %v3988_v15, 0.0  ;;  %v4054_v17 = vmax.f32 %v3990_v57, 0.0  ;;  %v4055_v24 = vmax.f32 %v3991_v18, 0.0  ;;  %v3992_v3 = vadd.f32 %v3928_v53, %v3864_v49  ;;  %v3686_v62 = vpop.f32.mrb[121].mxu0  ;;  %v3575_v31 = vpop.f32.mrb[106].mxu1  ;;  %v3936_v53 = vld [vmem:[%s5715_s23 + $0xa8] sm:$0xff] }
 0x3b7   : > { %v4057_v52 = vmax.f32 %v3993_v47, 0.0  ;;  %v3994_v23 = vadd.f32 %v3930_v26, %v3866_v63  ;;  %v3867_v48 = vadd.f32 %v7158_v55, %v3781_v2  ;;  %v3783_v16 = vmul.f32 %v7152_v36, %v3684_v51  ;;  %v3688_v30 = vpop.f32.mrb[122].mxu0  ;;  %v3577_v8 = vpop.f32.mrb[107].mxu1  ;;  %v3938_v26 = vld [vmem:[%s5715_s23 + $0xb8] sm:$0xff] }
 0x3b8   : > { %v4625_v39 = vpack.c.bf16 %v4052_v43, %v4051_v20  ;;  %v4626_v12 = vpack.c.bf16 %v4054_v17, %v4053_v9  ;;  %v4056_v11 = vmax.f32 %v3992_v3, 0.0  ;;  %v3782_v22 = vmul.f32 %v7154_v61, %v3573_v46  ;;  %v3690_v42 = vpop.f32.mrb[123].mxu0  ;;  %v3939_v17 = vld [vmem:[%s5715_s23 + $0xc0] sm:$0xff] }
 0x3b9   : > { %v4058_v35 = vmax.f32 %v3994_v23, 0.0  ;;  %v3784_v44 = vmul.f32 %v7156_v6, %v3686_v62  ;;  %v3995_v21 = vadd.f32 %v3931_v25, %v3867_v48  ;;  %v3869_v13 = vadd.f32 %v7160_v33, %v3783_v16  ;;  %v3941_v48 = vld [vmem:[%s5715_s23 + $0xd0] sm:$0xff] }
 0x3ba   : > { %4303 = vst [vmem:[%s7199_s13 + $0x20] sm:$0xff] %v4625_v39  ;;  %4304 = vst [vmem:[%s7199_s13 + $0x28] sm:$0xff] %v4626_v12  ;;  %v3785_v10 = vmul.f32 %v7150_v1, %v3575_v31  ;;  %v3787_v60 = vmul.f32 %v7152_v36, %v3688_v30  ;;  %v4627_v38 = vpack.c.bf16 %v4056_v11, %v4055_v24 }
 0x3bb   : > { %v4628_v58 = vpack.c.bf16 %v4058_v35, %v4057_v52  ;;  %v3868_v40 = vadd.f32 %v7162_v14, %v3782_v22  ;;  %v3870_v5 = vadd.f32 %v7164_v4, %v3784_v44  ;;  %v4059_v37 = vmax.f32 %v3995_v21, 0.0  ;;  %v3940_v44 = vld [vmem:[%s5715_s23 + $0xc8] sm:$0xff] }
 0x3bc   : > { %v3997_v34 = vadd.f32 %v3933_v7, %v3869_v13  ;;  %v3871_v32 = vadd.f32 %v7158_v55, %v3785_v10  ;;  %v3873_v28 = vadd.f32 %v7160_v33, %v3787_v60  ;;  %4305 = vst [vmem:[%s7199_s13 + $0x30] sm:$0xff] %v4627_v38  ;;  %v3786_v41 = vmul.f32 %v7154_v61, %v3577_v8  ;;  %v3581_v20 = vpop.f32.mrb[108].mxu1  ;;  %v3943_v38 = vld [vmem:[%s5715_s23 + $0xe0] sm:$0xff] }
 0x3bd   : > { %4306 = vst [vmem:[%s7199_s13 + $0x38] sm:$0xff] %v4628_v58  ;;  %v3996_v0 = vadd.f32 %v3932_v54, %v3868_v40  ;;  %v3998_v19 = vadd.f32 %v3934_v56, %v3870_v5  ;;  %v3788_v45 = vmul.f32 %v7156_v6, %v3690_v42  ;;  %v3789_v18 = vmul.f32 %v7150_v1, %v3581_v20  ;;  %v3694_v47 = vpop.f32.mrb[124].mxu0  ;;  %v3583_v49 = vpop.f32.mrb[109].mxu1  ;;  %v3942_v42 = vld [vmem:[%s5715_s23 + $0xd8] sm:$0xff]  ;;  %v3945_v58 = vld [vmem:[%s5715_s23 + $0xf0] sm:$0xff] }
 0x3be   : > { %v4061_v27 = vmax.f32 %v3997_v34, 0.0  ;;  %v3999_v15 = vadd.f32 %v3935_v29, %v3871_v32  ;;  %v4001_v57 = vadd.f32 %v3937_v50, %v3873_v28  ;;  %v3872_v9 = vadd.f32 %v7162_v14, %v3786_v41  ;;  %v3696_v2 = vpop.f32.mrb[125].mxu0  ;;  %v3585_v51 = vpop.f32.mrb[110].mxu1 }
 0x3bf   : > { %v4060_v63 = vmax.f32 %v3996_v0, 0.0  ;;  %v4062_v59 = vmax.f32 %v3998_v19, 0.0  ;;  %v3874_v43 = vadd.f32 %v7164_v4, %v3788_v45  ;;  %v3875_v52 = vadd.f32 %v7158_v55, %v3789_v18  ;;  %v3698_v23 = vpop.f32.mrb[126].mxu0  ;;  %v3587_v25 = vpop.f32.mrb[111].mxu1 }
 0x3c0   : > { %v4063_v46 = vmax.f32 %v3999_v15, 0.0  ;;  %v4065_v24 = vmax.f32 %v4001_v57, 0.0  ;;  %v3791_v3 = vmul.f32 %v7152_v36, %v3694_v47  ;;  %v4000_v39 = vadd.f32 %v3936_v53, %v3872_v9  ;;  %v3700_v16 = vpop.f32.mrb[127].mxu0 }
 0x3c1   : > { %v4629_v62 = vpack.c.bf16 %v4060_v63, %v4059_v37  ;;  %v4630_v31 = vpack.c.bf16 %v4062_v59, %v4061_v27  ;;  %v4002_v12 = vadd.f32 %v3938_v26, %v3874_v43  ;;  %v4003_v30 = vadd.f32 %v3939_v17, %v3875_v52  ;;  %v3944_v27 = vld [vmem:[%s5715_s23 + $0xe8] sm:$0xff]  ;;  %v3946_v63 = vld [vmem:[%s5715_s23 + $0xf8] sm:$0xff]  ;;  %v3947_v59 = vld [vmem:[%s5715_s23 + $0x100] sm:$0xff] }
 0x3c2   : > { %v3877_v8 = vadd.f32 %v7160_v33, %v3791_v3  ;;  %v3790_v11 = vmul.f32 %v7154_v61, %v3583_v49  ;;  %v3792_v35 = vmul.f32 %v7156_v6, %v3696_v2  ;;  %v4064_v7 = vmax.f32 %v4000_v39, 0.0  ;;  %v3949_v52 = vld [vmem:[%s5715_s23 + $0x110] sm:$0xff] }
 0x3c3   : > { %4307 = vst [vmem:[%s7199_s13 + $0x40] sm:$0xff] %v4629_v62  ;;  %4308 = vst [vmem:[%s7199_s13 + $0x48] sm:$0xff] %v4630_v31  ;;  %v4066_v22 = vmax.f32 %v4002_v12, 0.0  ;;  %v3793_v21 = vmul.f32 %v7150_v1, %v3585_v51  ;;  %v3795_v13 = vmul.f32 %v7152_v36, %v3698_v23  ;;  %v4067_v54 = vmax.f32 %v4003_v30, 0.0 }
 0x3c4   : > { %v4005_v56 = vadd.f32 %v3941_v48, %v3877_v8  ;;  %v3876_v10 = vadd.f32 %v7162_v14, %v3790_v11  ;;  %v3878_v60 = vadd.f32 %v7164_v4, %v3792_v35  ;;  %v4631_v40 = vpack.c.bf16 %v4064_v7, %v4063_v46  ;;  %v3591_v37 = vpop.f32.mrb[112].mxu1  ;;  %v3948_v11 = vld [vmem:[%s5715_s23 + $0x108] sm:$0xff]  ;;  %v3950_v35 = vld [vmem:[%s5715_s23 + $0x118] sm:$0xff] }
 0x3c5   : > { %v4632_v5 = vpack.c.bf16 %v4066_v22, %v4065_v24  ;;  %v3879_v29 = vadd.f32 %v7158_v55, %v3793_v21  ;;  %v3881_v50 = vadd.f32 %v7160_v33, %v3795_v13  ;;  %v3794_v0 = vmul.f32 %v7154_v61, %v3587_v25  ;;  %v3704_v19 = vpop.f32.mrb[128].mxu0  ;;  %v3593_v41 = vpop.f32.mrb[113].mxu1 }
 0x3c6   : > { %v4069_v34 = vmax.f32 %v4005_v56, 0.0  ;;  %v4004_v32 = vadd.f32 %v3940_v44, %v3876_v10  ;;  %v4006_v28 = vadd.f32 %v3942_v42, %v3878_v60  ;;  %4309 = vst [vmem:[%s7199_s13 + $0x50] sm:$0xff] %v4631_v40  ;;  %v3796_v15 = vmul.f32 %v7156_v6, %v3700_v16  ;;  %v3706_v53 = vpop.f32.mrb[129].mxu0  ;;  %v3595_v26 = vpop.f32.mrb[114].mxu1  ;;  %v3953_v56 = vld [vmem:[%s5715_s23 + $0x130] sm:$0xff] }
 0x3c7   : > { %4310 = vst [vmem:[%s7199_s13 + $0x58] sm:$0xff] %v4632_v5  ;;  %v4007_v45 = vadd.f32 %v3943_v38, %v3879_v29  ;;  %v4009_v20 = vadd.f32 %v3945_v58, %v3881_v50  ;;  %v3797_v57 = vmul.f32 %v7150_v1, %v3591_v37  ;;  %v3880_v49 = vadd.f32 %v7162_v14, %v3794_v0  ;;  %v3708_v43 = vpop.f32.mrb[130].mxu0  ;;  %v3597_v17 = vpop.f32.mrb[115].mxu1 }
 0x3c8   : > { %v4068_v18 = vmax.f32 %v4004_v32, 0.0  ;;  %v4070_v47 = vmax.f32 %v4006_v28, 0.0  ;;  %v3799_v9 = vmul.f32 %v7152_v36, %v3704_v19  ;;  %v3882_v46 = vadd.f32 %v7164_v4, %v3796_v15  ;;  %v3710_v3 = vpop.f32.mrb[131].mxu0 }
 0x3c9   : > { %v4071_v2 = vmax.f32 %v4007_v45, 0.0  ;;  %v4073_v51 = vmax.f32 %v4009_v20, 0.0  ;;  %v3883_v24 = vadd.f32 %v7158_v55, %v3797_v57  ;;  %v4008_v62 = vadd.f32 %v3944_v27, %v3880_v49  ;;  %v3952_v45 = vld [vmem:[%s5715_s23 + $0x128] sm:$0xff]  ;;  %v3955_v49 = vld [vmem:[%s5715_s23 + $0x140] sm:$0xff] }
 0x3ca   : > { %v4633_v23 = vpack.c.bf16 %v4068_v18, %v4067_v54  ;;  %v4634_v25 = vpack.c.bf16 %v4070_v47, %v4069_v34  ;;  %v3885_v31 = vadd.f32 %v7160_v33, %v3799_v9  ;;  %v4010_v39 = vadd.f32 %v3946_v63, %v3882_v46  ;;  %v3951_v54 = vld [vmem:[%s5715_s23 + $0x120] sm:$0xff]  ;;  %v3954_v47 = vld [vmem:[%s5715_s23 + $0x138] sm:$0xff] }
 0x3cb   : > { %v4011_v12 = vadd.f32 %v3947_v59, %v3883_v24  ;;  %v3798_v48 = vmul.f32 %v7154_v61, %v3593_v41  ;;  %v3800_v16 = vmul.f32 %v7156_v6, %v3706_v53  ;;  %v4072_v30 = vmax.f32 %v4008_v62, 0.0 }
 0x3cc   : > { %4311 = vst [vmem:[%s7199_s13 + $0x60] sm:$0xff] %v4633_v23  ;;  %4312 = vst [vmem:[%s7199_s13 + $0x68] sm:$0xff] %v4634_v25  ;;  %v4013_v8 = vadd.f32 %v3949_v52, %v3885_v31  ;;  %v3801_v7 = vmul.f32 %v7150_v1, %v3595_v26  ;;  %v3803_v22 = vmul.f32 %v7152_v36, %v3708_v43  ;;  %v4074_v44 = vmax.f32 %v4010_v39, 0.0  ;;  %v3601_v10 = vpop.f32.mrb[116].mxu1 }
 0x3cd   : > { %v4075_v42 = vmax.f32 %v4011_v12, 0.0  ;;  %v3884_v21 = vadd.f32 %v7162_v14, %v3798_v48  ;;  %v3886_v13 = vadd.f32 %v7164_v4, %v3800_v16  ;;  %v4635_v60 = vpack.c.bf16 %v4072_v30, %v4071_v2  ;;  %v3714_v5 = vpop.f32.mrb[132].mxu0  ;;  %v3603_v29 = vpop.f32.mrb[117].mxu1  ;;  %v3956_v48 = vld [vmem:[%s5715_s23 + $0x148] sm:$0xff]  ;;  %v3958_v16 = vld [vmem:[%s5715_s23 + $0x158] sm:$0xff] }
 0x3ce   : > { %v4077_v38 = vmax.f32 %v4013_v8, 0.0  ;;  %v3887_v58 = vadd.f32 %v7158_v55, %v3801_v7  ;;  %v3889_v40 = vadd.f32 %v7160_v33, %v3803_v22  ;;  %v4636_v50 = vpack.c.bf16 %v4074_v44, %v4073_v51  ;;  %v3716_v28 = vpop.f32.mrb[133].mxu0  ;;  %v3605_v0 = vpop.f32.mrb[118].mxu1  ;;  %v3957_v51 = vld [vmem:[%s5715_s23 + $0x150] sm:$0xff] }
 0x3cf   : > { %v4012_v37 = vadd.f32 %v3948_v11, %v3884_v21  ;;  %v4014_v34 = vadd.f32 %v3950_v35, %v3886_v13  ;;  %v3802_v32 = vmul.f32 %v7154_v61, %v3597_v17  ;;  %4313 = vst [vmem:[%s7199_s13 + $0x70] sm:$0xff] %v4635_v60  ;;  %v3804_v20 = vmul.f32 %v7156_v6, %v3710_v3  ;;  %v3718_v15 = vpop.f32.mrb[134].mxu0  ;;  %v3607_v57 = vpop.f32.mrb[119].mxu1  ;;  %v3961_v21 = vld [vmem:[%s5715_s23 + $0x170] sm:$0xff] }
 0x3d0   : > { %v4015_v19 = vadd.f32 %v3951_v54, %v3887_v58  ;;  %v4017_v41 = vadd.f32 %v3953_v56, %v3889_v40  ;;  %v3805_v27 = vmul.f32 %v7150_v1, %v3601_v10  ;;  %4314 = vst [vmem:[%s7199_s13 + $0x78] sm:$0xff] %v4636_v50  ;;  %v3807_v63 = vmul.f32 %v7152_v36, %v3714_v5  ;;  %v3720_v59 = vpop.f32.mrb[135].mxu0 }
 0x3d1   : > { %v4076_v53 = vmax.f32 %v4012_v37, 0.0  ;;  %v4078_v26 = vmax.f32 %v4014_v34, 0.0  ;;  %v3888_v18 = vadd.f32 %v7162_v14, %v3802_v32  ;;  %v3890_v17 = vadd.f32 %v7164_v4, %v3804_v20  ;;  %v3960_v32 = vld [vmem:[%s5715_s23 + $0x168] sm:$0xff]  ;;  %v3962_v20 = vld [vmem:[%s5715_s23 + $0x178] sm:$0xff] }
 0x3d2   : > { %v4079_v9 = vmax.f32 %v4015_v19, 0.0  ;;  %v4081_v43 = vmax.f32 %v4017_v41, 0.0  ;;  %v3891_v2 = vadd.f32 %v7158_v55, %v3805_v27  ;;  %v3893_v3 = vadd.f32 %v7160_v33, %v3807_v63  ;;  %v3963_v27 = vld [vmem:[%s5715_s23 + $0x180] sm:$0xff] }
 0x3d3   : > { %v4637_v46 = vpack.c.bf16 %v4076_v53, %v4075_v42  ;;  %v4638_v24 = vpack.c.bf16 %v4078_v26, %v4077_v38  ;;  %v4016_v52 = vadd.f32 %v3952_v45, %v3888_v18  ;;  %v4018_v23 = vadd.f32 %v3954_v47, %v3890_v17  ;;  %v3959_v42 = vld [vmem:[%s5715_s23 + $0x160] sm:$0xff]  ;;  %v3964_v47 = vld [vmem:[%s5715_s23 + $0x188] sm:$0xff] }
 0x3d4   : > { %v4019_v25 = vadd.f32 %v3955_v49, %v3891_v2  ;;  %v3806_v62 = vmul.f32 %v7154_v61, %v3603_v29  ;;  %v3808_v31 = vmul.f32 %v7156_v6, %v3716_v28  ;;  %v4021_v12 = vadd.f32 %v3957_v51, %v3893_v3  ;;  %v3611_v11 = vpop.f32.mrb[120].mxu1  ;;  %v3967_v3 = vld [vmem:[%s5715_s23 + $0x1a0] sm:$0xff] }
 0x3d5   : > { %4315 = vst [vmem:[%s7199_s13 + $0x80] sm:$0xff] %v4637_v46  ;;  %4316 = vst [vmem:[%s7199_s13 + $0x88] sm:$0xff] %v4638_v24  ;;  %v4080_v39 = vmax.f32 %v4016_v52, 0.0  ;;  %v3809_v30 = vmul.f32 %v7150_v1, %v3605_v0  ;;  %v3811_v8 = vmul.f32 %v7152_v36, %v3718_v15  ;;  %v4082_v35 = vmax.f32 %v4018_v23, 0.0  ;;  %v3613_v13 = vpop.f32.mrb[121].mxu1  ;;  %v3968_v23 = vld [vmem:[%s5715_s23 + $0x1a8] sm:$0xff] }
 0x3d6   : > { %v4083_v7 = vmax.f32 %v4019_v25, 0.0  ;;  %v3892_v22 = vadd.f32 %v7162_v14, %v3806_v62  ;;  %v3894_v44 = vadd.f32 %v7164_v4, %v3808_v31  ;;  %v4085_v56 = vmax.f32 %v4021_v12, 0.0  ;;  %v3615_v38 = vpop.f32.mrb[122].mxu1 }
 0x3d7   : > { %v4639_v54 = vpack.c.bf16 %v4080_v39, %v4079_v9  ;;  %v3895_v10 = vadd.f32 %v7158_v55, %v3809_v30  ;;  %v3897_v60 = vadd.f32 %v7160_v33, %v3811_v8  ;;  %v4640_v58 = vpack.c.bf16 %v4082_v35, %v4081_v43  ;;  %v3617_v50 = vpop.f32.mrb[123].mxu1 }
 0x3d8   : > { %v4020_v40 = vadd.f32 %v3956_v48, %v3892_v22  ;;  %v4022_v5 = vadd.f32 %v3958_v16, %v3894_v44  ;;  %v3810_v29 = vmul.f32 %v7154_v61, %v3607_v57  ;;  %v3812_v28 = vmul.f32 %v7156_v6, %v3720_v59  ;;  %v3971_v16 = vld [vmem:[%s5715_s23 + $0x1c0] sm:$0xff] }
 0x3d9   : > { %4317 = vst [vmem:[%s7199_s13 + $0x90] sm:$0xff] %v4639_v54  ;;  %v4023_v37 = vadd.f32 %v3959_v42, %v3895_v10  ;;  %v4025_v34 = vadd.f32 %v3961_v21, %v3897_v60  ;;  %v3813_v0 = vmul.f32 %v7150_v1, %v3611_v11  ;;  %4318 = vst [vmem:[%s7199_s13 + $0x98] sm:$0xff] %v4640_v58 }
 0x3da   : > { %v4084_v19 = vmax.f32 %v4020_v40, 0.0  ;;  %v4086_v41 = vmax.f32 %v4022_v5, 0.0  ;;  %v3896_v45 = vadd.f32 %v7162_v14, %v3810_v29  ;;  %v3814_v15 = vmul.f32 %v7154_v61, %v3613_v13  ;;  %v3972_v13 = vld [vmem:[%s5715_s23 + $0x1c8] sm:$0xff] }
 0x3db   : > { %v4087_v57 = vmax.f32 %v4023_v37, 0.0  ;;  %v4089_v53 = vmax.f32 %v4025_v34, 0.0  ;;  %v3898_v26 = vadd.f32 %v7164_v4, %v3812_v28  ;;  %v3899_v18 = vadd.f32 %v7158_v55, %v3813_v0 }
 0x3dc   : > { %v4641_v49 = vpack.c.bf16 %v4084_v19, %v4083_v7  ;;  %v4642_v63 = vpack.c.bf16 %v4086_v41, %v4085_v56  ;;  %v4024_v59 = vadd.f32 %v3960_v32, %v3896_v45  ;;  %v3900_v9 = vadd.f32 %v7162_v14, %v3814_v15  ;;  %v3621_v46 = vpop.f32.mrb[124].mxu1 }
 0x3dd   : > { %v4026_v43 = vadd.f32 %v3962_v20, %v3898_v26  ;;  %v4027_v17 = vadd.f32 %v3963_v27, %v3899_v18  ;;  %v3817_v2 = vmul.f32 %v7150_v1, %v3615_v38  ;;  %v3818_v51 = vmul.f32 %v7154_v61, %v3617_v50  ;;  %v3623_v62 = vpop.f32.mrb[125].mxu1  ;;  %v3975_v38 = vld [vmem:[%s5715_s23 + $0x1e0] sm:$0xff]  ;;  %v3976_v50 = vld [vmem:[%s5715_s23 + $0x1e8] sm:$0xff]  ;;  %v3966_v26 = vld [vmem:[%s5715_s23 + $0x198] sm:$0xff] }
 0x3de   : > { %4319 = vst [vmem:[%s7199_s13 + $0xa0] sm:$0xff] %v4641_v49  ;;  %4320 = vst [vmem:[%s7199_s13 + $0xa8] sm:$0xff] %v4642_v63  ;;  %v4088_v24 = vmax.f32 %v4024_v59, 0.0  ;;  %v4028_v52 = vadd.f32 %v3964_v47, %v3900_v9  ;;  %v3821_v25 = vmul.f32 %v7150_v1, %v3621_v46  ;;  %v3625_v30 = vpop.f32.mrb[126].mxu1  ;;  %v3822_v7 = vmul.f32 %v7154_v61, %v3623_v62  ;;  %v3969_v63 = vld [vmem:[%s5715_s23 + $0x1b0] sm:$0xff] }
 0x3df   : > { %v4090_v31 = vmax.f32 %v4026_v43, 0.0  ;;  %v4091_v39 = vmax.f32 %v4027_v17, 0.0  ;;  %v3903_v12 = vadd.f32 %v7158_v55, %v3817_v2  ;;  %v3904_v48 = vadd.f32 %v7162_v14, %v3818_v51  ;;  %v3627_v22 = vpop.f32.mrb[127].mxu1  ;;  %v3970_v2 = vld [vmem:[%s5715_s23 + $0x1b8] sm:$0xff] }
 0x3e0   : > { %v4643_v8 = vpack.c.bf16 %v4088_v24, %v4087_v57  ;;  %v4092_v11 = vmax.f32 %v4028_v52, 0.0  ;;  %v3907_v35 = vadd.f32 %v7158_v55, %v3821_v25  ;;  %v3825_v54 = vmul.f32 %v7150_v1, %v3625_v30 }
 0x3e1   : > { %v4644_v44 = vpack.c.bf16 %v4090_v31, %v4089_v53  ;;  %v4031_v42 = vadd.f32 %v3967_v3, %v3903_v12  ;;  %v4032_v21 = vadd.f32 %v3968_v23, %v3904_v48  ;;  %v3908_v60 = vadd.f32 %v7162_v14, %v3822_v7 }
 0x3e2   : > { %4321 = vst [vmem:[%s7199_s13 + $0xb0] sm:$0xff] %v4643_v8  ;;  %v4645_v56 = vpack.c.bf16 %v4092_v11, %v4091_v39  ;;  %v4035_v10 = vadd.f32 %v3971_v16, %v3907_v35  ;;  %v3826_v58 = vmul.f32 %v7154_v61, %v3627_v22  ;;  %v3911_v29 = vadd.f32 %v7158_v55, %v3825_v54  ;;  %v3965_v55 = vld [vmem:[%s5715_s23 + $0x190] sm:$0xff]  ;;  %v3974_v35 = vld [vmem:[%s5715_s23 + $0x1d8] sm:$0xff] }
 0x3e3   : > { %4322 = vst [vmem:[%s7199_s13 + $0xb8] sm:$0xff] %v4644_v44  ;;  %v4095_v40 = vmax.f32 %v4031_v42, 0.0  ;;  %v4096_v5 = vmax.f32 %v4032_v21, 0.0  ;;  %v4036_v34 = vadd.f32 %v3972_v13, %v3908_v60  ;;  %v3973_v16 = vld [vmem:[%s5715_s23 + $0x1d0] sm:$0xff] }
 0x3e4   : > { %4323 = vst [vmem:[%s7199_s13 + $0xc0] sm:$0xff] %v4645_v56  ;;  %v4099_v37 = vmax.f32 %v4035_v10, 0.0  ;;  %v3912_v1 = vadd.f32 %v7162_v14, %v3826_v58  ;;  %v4039_v28 = vadd.f32 %v3975_v38, %v3911_v29  ;;  %v3724_v0 = vpop.f32.mrb[128].mxu1  ;;  %v3977_v21 = vld [vmem:[%s5715_s23 + $0x1f0] sm:$0xff]  ;;  %v3978_v10 = vld [vmem:[%s5715_s23 + $0x1f8] sm:$0xff]  ;;  %s7398_s23 = scalar_lea.hbm %s7548_s14, %s4654_s20 }
 0x3e5   : > { %v4647_v32 = vpack.c.bf16 %v4096_v5, %v4095_v40  ;;  %v4100_v19 = vmax.f32 %v4036_v34, 0.0  ;;  %v3815_v41 = vmul.f32 %v7152_v36, %v3724_v0  ;;  %v3726_v45 = vpop.f32.mrb[129].mxu1 }
 0x3e6   : > { %v4040_v61 = vadd.f32 %v3976_v50, %v3912_v1  ;;  %v4103_v20 = vmax.f32 %v4039_v28, 0.0  ;;  %v3816_v27 = vmul.f32 %v7156_v6, %v3726_v45  ;;  %v3728_v15 = vpop.f32.mrb[130].mxu1 }
 0x3e7   : > { %4325 = vst [vmem:[%s7199_s13 + $0xd0] sm:$0xff] %v4647_v32  ;;  %v4649_v57 = vpack.c.bf16 %v4100_v19, %v4099_v37  ;;  %v3901_v53 = vadd.f32 %v7160_v33, %v3815_v41  ;;  %v3819_v18 = vmul.f32 %v7152_v36, %v3728_v15  ;;  %v3730_v47 = vpop.f32.mrb[131].mxu1 }
 0x3e8   : > { %v4104_v14 = vmax.f32 %v4040_v61, 0.0  ;;  %v3902_v49 = vadd.f32 %v7164_v4, %v3816_v27  ;;  %v3820_v59 = vmul.f32 %v7156_v6, %v3730_v47 }
 0x3e9   : > { %4327 = vst [vmem:[%s7199_s13 + $0xe0] sm:$0xff] %v4649_v57  ;;  %v4029_v43 = vadd.f32 %v3965_v55, %v3901_v53  ;;  %v3905_v17 = vadd.f32 %v7160_v33, %v3819_v18 }
 0x3ea   : > { %v4651_v9 = vpack.c.bf16 %v4104_v14, %v4103_v20  ;;  %v4030_v51 = vadd.f32 %v3966_v26, %v3902_v49  ;;  %v3906_v46 = vadd.f32 %v7164_v4, %v3820_v59 }
 0x3eb   : > { %v4093_v24 = vmax.f32 %v4029_v43, 0.0  ;;  %v4033_v52 = vadd.f32 %v3969_v63, %v3905_v17 }
 0x3ec   : > { %4329 = vst [vmem:[%s7199_s13 + $0xf0] sm:$0xff] %v4651_v9  ;;  %v4094_v3 = vmax.f32 %v4030_v51, 0.0  ;;  %v4034_v23 = vadd.f32 %v3970_v2, %v3906_v46  ;;  %v3734_v25 = vpop.f32.mrb[132].mxu1 }
 0x3ed   : > { %v4097_v62 = vmax.f32 %v4033_v52, 0.0  ;;  %v3823_v31 = vmul.f32 %v7152_v36, %v3734_v25  ;;  %v3736_v39 = vpop.f32.mrb[133].mxu1 }
 0x3ee   : > { %v4646_v12 = vpack.c.bf16 %v4094_v3, %v4093_v24  ;;  %v4098_v48 = vmax.f32 %v4034_v23, 0.0  ;;  %v3824_v30 = vmul.f32 %v7156_v6, %v3736_v39  ;;  %v3738_v8 = vpop.f32.mrb[134].mxu1 }
 0x3ef   : > { %v3909_v11 = vadd.f32 %v7160_v33, %v3823_v31  ;;  %v3827_v7 = vmul.f32 %v7152_v36, %v3738_v8  ;;  %v3740_v22 = vpop.f32.mrb[135].mxu1 }
 0x3f0   : > { %4324 = vst [vmem:[%s7199_s13 + $0xc8] sm:$0xff] %v4646_v12  ;;  %v4648_v44 = vpack.c.bf16 %v4098_v48, %v4097_v62  ;;  %v3910_v42 = vadd.f32 %v7164_v4, %v3824_v30  ;;  %v3828_v13 = vmul.f32 %v7156_v6, %v3740_v22 }
 0x3f1   : > { %v4037_v54 = vadd.f32 %v3973_v16, %v3909_v11  ;;  %v3913_v56 = vadd.f32 %v7160_v33, %v3827_v7 }
 0x3f2   : > { %4326 = vst [vmem:[%s7199_s13 + $0xd8] sm:$0xff] %v4648_v44  ;;  %v4038_v60 = vadd.f32 %v3974_v35, %v3910_v42  ;;  %v3914_v36 = vadd.f32 %v7164_v4, %v3828_v13 }
 0x3f3   : > { %v4101_v38 = vmax.f32 %v4037_v54, 0.0  ;;  %v4041_v58 = vadd.f32 %v3977_v21, %v3913_v56 }
 0x3f4   : > { %v4102_v40 = vmax.f32 %v4038_v60, 0.0  ;;  %v4042_v5 = vadd.f32 %v3978_v10, %v3914_v36 }
 0x3f5   : > { %v4105_v29 = vmax.f32 %v4041_v58, 0.0 }
 0x3f6   : > { %v4650_v6 = vpack.c.bf16 %v4102_v40, %v4101_v38  ;;  %v4106_v50 = vmax.f32 %v4042_v5, 0.0 }
 0x3f8   : > { %4328 = vst [vmem:[%s7199_s13 + $0xe8] sm:$0xff] %v4650_v6  ;;  %v4652_v33 = vpack.c.bf16 %v4106_v50, %v4105_v29 }
 0x3fa   : > { %4330 = vst [vmem:[%s7199_s13 + $0xf8] sm:$0xff] %v4652_v33 }
 0x3fb   : > { %5427 = shalt.err (!%p5424_p7)
}
 0x3fc   : > { %s5428_s10 = scalar_lea.hbm %s7398_s23, 4096  ;;  %s5432_s20 = scalar_lea.hbm %s7548_s14, 8192 }
 0x3fd   : > { %p5429_p9 = scmp.ne.s32.totalorder %s7398_s23, %s5428_s10  ;;  %p5433_p5 = scmp.lt.u32.totalorder %s7398_s23, %s7548_s14 }
 0x3fe   : > { %p5434_p11 = scmp.lt.u32.totalorder %s5432_s20, %s5428_s10  ;;  %p5436_p4 = scmp.lt.u32.totalorder %s5428_s10, %s7398_s23 }
 0x3ff   : > { %p5430_p2 = pnand %p5429_p9, %p5663_p12 }
 0x400   : > { %p5435_p1 = por %p5434_p11, %p5433_p5 }
 0x401   : > { %p5431_p0 = pneg %p5430_p2 }
 0x402   : > { %p5437_p6 = por %p5436_p4, %p5435_p1 }
 0x404   : > { %p5438_p8 = pnand %p5437_p6, %p5431_p0 }
 0x406   : > { %5441 = shalt.err (!%p5438_p8)
}
 0x407   : > { %s5495_s27 = smov 256   ;;  %s5496_s17 = smov 16  }
 0x408   : > { %5141 = dma.vmem_to_hbm [thread:$0]  (%p5663_p12), %s7400_s24, 4096, %s7398_s23, %s4332_s26, %s5495_s27, %s5495_s27, %s5496_s17  }
 0x409 PF: > { %s7549_s19 = sld [smem:[#allocation12_spill]]  ;;  %s7550_s29 = sld [smem:[#allocation13_spill]] }
 0x40a   : > { %p7552_p13 = scmp.ge.s32.totalorder %s5484_s16, 2 }
 0x40f   : > { %s4361_s12 = sand.u32 1, %s7549_s19   ;;  %p7551_p10 = scmp.ne.s32.totalorder %s7550_s29, 0 }
 0x410   : > { %s4362_s10 = scalar_lea.sflag [#allocation5], %s4361_s12 }
 0x411   : > { %p5152_p3 = pnand %p7552_p13, %p7551_p10 }
 0x413   : > { %5467 = dma.done.wait (!%p5152_p3), %s4362_s10, 4096  }
 0x414   : > { %5469 = vsyncadd (!%p5152_p3), %s4362_s10, 4294963200  ;;  %s7553_s16 = sld [smem:[#allocation14_spill]]  ;;  %s7554_s29 = smov %s5476_s30 }
 0x415   : > { %s7555_s30 = smov %s5480_s15  ;;  %s7556_s15 = smov %s5659_s25 }
 0x41a   : > { %p28_p7 = scmp.ge.s32.totalorder %s7553_s16, 4  }
 0x41c   :  { %30 = sbr.rel (!%p28_p7) target bundleno = 11 (0xb), region = 125 }
 0x423   :  { %4367 = vsyncpa [#allocation4], 1 }
 0x424   :  { %4369 = vsyncpa [#allocation4 + $0x1], 1 }
 0x425   :  { %4370 = vsyncpa [#allocation7], 1 }
 0x426   :  { %4371 = vsyncpa [#allocation5], 1 }
 0x427   :  { %4373 = vsyncpa [#allocation5 + $0x1], 1 }

</bundles_post_ra>
